<compile_context>
chip_gen: v7x
topology: tpu7x:2x2x1
jax: 0.10.0
libtpu: 0.0.40
codegen_flags: <defaults>
</compile_context>

<pallas_src>
import functools
import math

import jax
import jax.numpy as jnp
from jax.experimental import pallas as pl
from jax.experimental.pallas import tpu as pltpu

MIN_NORM = 1e-15
BALL_EPS = 4e-3  # PoincareBall.proj eps for float32


# ---------------- PoincareBall math (wrapper hoists + pure-JAX reference) ----
def _lnorm(x):
    return jnp.maximum(jnp.sqrt(jnp.sum(x * x, axis=-1, keepdims=True)), MIN_NORM)


def _artanh(x):
    x = jnp.clip(x, -1.0 + 1e-7, 1.0 - 1e-7)
    return 0.5 * (jnp.log1p(x) - jnp.log1p(-x))


def _proj(x, c):
    norm = _lnorm(x)
    maxnorm = (1.0 - BALL_EPS) / math.sqrt(c)
    projected = x / norm * maxnorm
    return jnp.where(norm > maxnorm, projected, x)


def _expmap0(u, c):
    sqrt_c = math.sqrt(c)
    u_norm = _lnorm(u)
    return jnp.tanh(sqrt_c * u_norm) * u / (sqrt_c * u_norm)


def _logmap0(p, c):
    sqrt_c = math.sqrt(c)
    p_norm = _lnorm(p)
    return (_artanh(sqrt_c * p_norm) / (sqrt_c * p_norm)) * p


def _mobius_add(x, y, c):
    x2 = jnp.sum(x * x, axis=-1, keepdims=True)
    y2 = jnp.sum(y * y, axis=-1, keepdims=True)
    xy = jnp.sum(x * y, axis=-1, keepdims=True)
    num = (1.0 + 2.0 * c * xy + c * y2) * x + (1.0 - c * x2) * y
    denom = 1.0 + 2.0 * c * xy + c * c * x2 * y2
    return num / jnp.maximum(denom, MIN_NORM)


# ---------------- Kernel 1: HypLinear + logmap0 -> bf16 tangent rows ---------
def hyp_linear_logmap_kernel(x_ref, wt_ref, hb_ref, hb_sq_ref, xt_ref, *, c_in):
    sqrt_ci = math.sqrt(c_in)
    maxnorm_i = (1.0 - BALL_EPS) / sqrt_ci

    x = x_ref[...]                 # (tm, F_in)  f32 nodes on the ball
    w_t = wt_ref[...]              # (F_in, F_out) f32
    hb = hb_ref[...]               # (1, F_out)  f32 precomputed hyperbolic bias
    y2 = hb_sq_ref[0, 0]           # scalar sum(hb*hb), hoisted to the wrapper

    # mobius_matvec(W, x, c_in) + proj, via per-row (tm,1) scales.
    x_sq = jnp.sum(x * x, axis=-1, keepdims=True)
    x_norm = jnp.maximum(jnp.sqrt(x_sq), MIN_NORM)
    mx = jnp.dot(x, w_t, preferred_element_type=jnp.float32)          # (tm, F_out)
    mx_sq = jnp.sum(mx * mx, axis=-1, keepdims=True)
    mx_norm = jnp.maximum(jnp.sqrt(mx_sq), MIN_NORM)
    zero_row = mx_sq == 0.0        # row of mx entirely zero

    th = jnp.tanh(mx_norm * pl.reciprocal(x_norm, approx=True)
                  * _artanh(sqrt_ci * x_norm))
    inv_mx = pl.reciprocal(mx_norm, approx=True)
    mv_scale = jnp.where(zero_row, 0.0, th * inv_mx * (1.0 / sqrt_ci))
    mv_norm = jnp.where(zero_row, 0.0, th * (1.0 / sqrt_ci))          # analytic ||mv||
    prj1 = jnp.where(
        mv_norm > maxnorm_i,
        maxnorm_i * pl.reciprocal(jnp.maximum(mv_norm, MIN_NORM), approx=True),
        1.0)
    res = mx * (mv_scale * prj1)                                      # proj(mobius_matvec)
    res_norm = jnp.minimum(mv_norm, maxnorm_i)

    # mobius_add(res, hyp_bias, c_in) + proj, reusing res_norm analytically.
    x2 = res_norm * res_norm                                          # (tm,1)
    xy = jnp.sum(res * hb, axis=-1, keepdims=True)                    # (tm,1)
    inv_den = pl.reciprocal(
        jnp.maximum(1.0 + 2.0 * c_in * xy + c_in * c_in * x2 * y2, MIN_NORM),
        approx=True)
    coef_x = (1.0 + 2.0 * c_in * xy + c_in * y2) * inv_den
    coef_y = (1.0 - c_in * x2) * inv_den
    add = res * coef_x + hb * coef_y                                  # (tm, F_out)

    add_sq = jnp.sum(add * add, axis=-1, keepdims=True)
    add_norm = jnp.maximum(jnp.sqrt(add_sq), MIN_NORM)
    prj2 = jnp.where(add_norm > maxnorm_i,
                     maxnorm_i * pl.reciprocal(add_norm, approx=True), 1.0)
    p_norm = jnp.minimum(add_norm, maxnorm_i)                         # ||proj(add)||

    # logmap0(proj(add), c_in): tangent features, stored bf16 for aggregation.
    log_scale = (_artanh(sqrt_ci * p_norm)
                 * pl.reciprocal(sqrt_ci * p_norm, approx=True))
    xt_ref[...] = (add * (prj2 * log_scale)).astype(xt_ref.dtype)


# ---------------- Kernel 2: K-tiled HypAgg (adj @ tangent) + HypAct ----------
def hyp_agg_act_kernel(adj_ref, xt_ref, out_ref, acc_ref, *, c_in, c_out):
    k = pl.program_id(1)
    sqrt_ci = math.sqrt(c_in)
    sqrt_co = math.sqrt(c_out)
    maxnorm_i = (1.0 - BALL_EPS) / sqrt_ci
    maxnorm_o = (1.0 - BALL_EPS) / sqrt_co

    @pl.when(k == 0)
    def _init():
        acc_ref[...] = jnp.zeros_like(acc_ref)

    # support_t accumulation: bf16 adj block @ bf16 tangent block -> f32 acc.
    acc_ref[...] += jnp.dot(adj_ref[...], xt_ref[...],
                            preferred_element_type=jnp.float32)

    @pl.when(k == pl.num_programs(1) - 1)
    def _finalize():
        support = acc_ref[...]                                        # (tm, F_out) f32
        s_sq = jnp.sum(support * support, axis=-1, keepdims=True)
        s_norm = jnp.maximum(jnp.sqrt(s_sq), MIN_NORM)
        th = jnp.tanh(sqrt_ci * s_norm)
        exp_scale = th * pl.reciprocal(sqrt_ci * s_norm, approx=True)  # expmap0(., c_in)
        h_norm = th * (1.0 / sqrt_ci)                                  # analytic ||expmap0||
        prj1 = jnp.where(
            h_norm > maxnorm_i,
            maxnorm_i * pl.reciprocal(jnp.maximum(h_norm, MIN_NORM), approx=True),
            1.0)
        hp_norm = jnp.maximum(jnp.minimum(h_norm, maxnorm_i), MIN_NORM)
        log_scale = (_artanh(sqrt_ci * hp_norm)
                     * pl.reciprocal(sqrt_ci * hp_norm, approx=True))  # logmap0(., c_in)
        t = jnp.maximum(support * (exp_scale * prj1 * log_scale), 0.0)  # ReLU act

        t_sq = jnp.sum(t * t, axis=-1, keepdims=True)
        t_norm = jnp.maximum(jnp.sqrt(t_sq), MIN_NORM)
        th2 = jnp.tanh(sqrt_co * t_norm)
        exp2 = th2 * pl.reciprocal(sqrt_co * t_norm, approx=True)      # expmap0(., c_out)
        o_norm = th2 * (1.0 / sqrt_co)
        prj2 = jnp.where(
            o_norm > maxnorm_o,
            maxnorm_o * pl.reciprocal(jnp.maximum(o_norm, MIN_NORM), approx=True),
            1.0)
        out_ref[...] = (t * (exp2 * prj2)).astype(out_ref.dtype)       # proj(., c_out)


# ---------------- Wrapper ----------------------------------------------------
def _pick_tk(n, tk_max):
    """Largest K tile that divides n, is a multiple of 128, and <= tk_max."""
    best = None
    t = 128
    while t <= min(tk_max, n):
        if n % t == 0:
            best = t
        t += 128
    return best if best is not None else n  # fall back to full dim (always legal)


def hyperbolic_graph_conv(x, adj, weight, bias, *, c_in, c_out, tm=128, tk=2048):
    N, f_in = x.shape
    f_out = weight.shape[0]
    tm = min(tm, N)
    assert N % tm == 0, "N must be a multiple of the row tile"
    tk = _pick_tk(N, tk)
    n_row = N // tm
    n_k = N // tk

    x = x.astype(jnp.float32)
    w_t = weight.T.astype(jnp.float32)                    # (F_in, F_out)
    # adj streamed in bf16: row-normalized values in [0,1]; halves the dominant
    # HBM stream (the MXU consumes bf16 operands at default precision anyway).
    adj_bf16 = adj.astype(jnp.bfloat16)
    # Grid-invariant hyperbolic bias and its squared norm, hoisted out of the kernel.
    hyp_bias = _proj(_expmap0(bias.reshape(1, f_out).astype(jnp.float32), c_in), c_in)
    hb_sq = jnp.sum(hyp_bias * hyp_bias, axis=-1, keepdims=True)       # (1,1)

    # ---- explicit VMEM arithmetic (double-buffered BlockSpec inputs/outputs) ----
    vmem1 = (2 * tm * f_in * 4          # x blocks (f32)
             + 2 * f_in * f_out * 4     # weight (constant index -> fetched once)
             + 2 * f_out * 4            # hyperbolic bias
             + 2 * tm * f_out * 2)      # bf16 tangent output blocks
    vmem2 = (2 * tm * tk * 2            # adj blocks (bf16)
             + 2 * tk * f_out * 2       # tangent blocks (bf16)
             + tm * f_out * 4           # f32 accumulator scratch
             + 2 * tm * f_out * 4)      # f32 output blocks

    def _vmem_limit(v):
        # 4x headroom for compiler-internal scratch; floor at the v5e default
        # scoped limit (16 MiB); stay well below v7x's 64 MiB physical VMEM.
        return int(min(max(4 * v, 16 << 20), 48 << 20))

    # ---------------- kernel 1: HypLinear + logmap0 -> bf16 tangent ----------
    xt = pl.pallas_call(
        functools.partial(hyp_linear_logmap_kernel, c_in=float(c_in)),
        out_shape=jax.ShapeDtypeStruct((N, f_out), jnp.bfloat16),
        grid=(n_row,),
        in_specs=[
            pl.BlockSpec((tm, f_in), lambda i: (i, 0)),
            pl.BlockSpec((f_in, f_out), lambda i: (0, 0)),
            pl.BlockSpec((1, f_out), lambda i: (0, 0)),
            pl.BlockSpec(memory_space=pltpu.MemorySpace.SMEM),   # hoisted sum(hb^2)
        ],
        out_specs=pl.BlockSpec((tm, f_out), lambda i: (i, 0)),
        compiler_params=pltpu.CompilerParams(
            dimension_semantics=("parallel",),       # row tiles shard across TCs (v7x)
            vmem_limit_bytes=_vmem_limit(vmem1),
        ),
    )(x, w_t, hyp_bias, hb_sq)

    # ---------------- kernel 2: K-tiled HypAgg + HypAct ----------------------
    # NOTE: with (tm, tk) adj blocks the working set is small everywhere; deeper
    # buffering (pipeline_mode=pl.Buffered(3)) is a cheap follow-up on v5e/v6e
    # if DMA issue gaps show up in traces.
    out = pl.pallas_call(
        functools.partial(hyp_agg_act_kernel, c_in=float(c_in), c_out=float(c_out)),
        out_shape=jax.ShapeDtypeStruct((N, f_out), jnp.float32),
        grid=(n_row, n_k),                            # reduction (K) axis innermost
        in_specs=[
            pl.BlockSpec((tm, tk), lambda i, k: (i, k)),      # adj (bf16)
            pl.BlockSpec((tk, f_out), lambda i, k: (k, 0)),   # tangent (bf16)
        ],
        out_specs=pl.BlockSpec((tm, f_out), lambda i, k: (i, 0)),
        scratch_shapes=[pltpu.VMEM((tm, f_out), jnp.float32)],
        compiler_params=pltpu.CompilerParams(
            dimension_semantics=("parallel", "arbitrary"),
            vmem_limit_bytes=_vmem_limit(vmem2),
        ),
    )(adj_bf16, xt)
    return out


# ---------------- Pure-JAX reference (direct port of the torch math) ---------
def _reference(x, adj, weight, bias, c_in, c_out):
    sqrt_c = math.sqrt(c_in)
    x_norm = _lnorm(x)
    mx = jnp.dot(x, weight.T, precision=jax.lax.Precision.HIGHEST)
    mx_norm = _lnorm(mx)
    res_c = jnp.tanh(mx_norm / x_norm * _artanh(sqrt_c * x_norm)) * mx / (mx_norm * sqrt_c)
    mv = jnp.where(jnp.max(jnp.abs(mx), -1, keepdims=True) == 0.0, 0.0, res_c)
    res = _proj(mv, c_in)
    hyp_bias = _proj(_expmap0(bias.reshape(1, -1), c_in), c_in)
    res = _proj(_mobius_add(res, hyp_bias, c_in), c_in)
    support = jnp.dot(adj, _logmap0(res, c_in), precision=jax.lax.Precision.HIGHEST)
    h = _proj(_expmap0(support, c_in), c_in)
    t = jnp.maximum(_logmap0(h, c_in), 0.0)
    return _proj(_expmap0(t, c_out), c_out)


if __name__ == "__main__":
    N, F_IN, F_OUT = 256, 64, 128
    C_IN, C_OUT = 1.0, 0.7

    key = jax.random.PRNGKey(0)
    k_feat, k_adj, k_w, k_b = jax.random.split(key, 4)

    # Euclidean features mapped onto the Poincare ball (standard HGCN input prep).
    feats = 0.1 * jax.random.normal(k_feat, (N, F_IN), dtype=jnp.float32)
    x = _proj(_expmap0(feats, C_IN), C_IN)

    # Dense, row-normalized adjacency with self loops (torch.spmm -> dense matmul).
    a = (jax.random.uniform(k_adj, (N, N)) < 0.05).astype(jnp.float32) + jnp.eye(N, dtype=jnp.float32)
    adj = a / jnp.sum(a, axis=1, keepdims=True)

    # HypLinear params: weight (F_OUT, F_IN) xavier_uniform(gain=sqrt(2)); bias (F_OUT,)
    limit = math.sqrt(2.0) * math.sqrt(6.0 / (F_IN + F_OUT))
    weight = jax.random.uniform(k_w, (F_OUT, F_IN), minval=-limit, maxval=limit, dtype=jnp.float32)
    bias = 0.05 * jax.random.normal(k_b, (F_OUT,), dtype=jnp.float32)  # nonzero -> exercise mobius_add

    out = hyperbolic_graph_conv(x, adj, weight, bias, c_in=C_IN, c_out=C_OUT)
    jax.block_until_ready(out)

    ref = _reference(x, adj, weight, bias, C_IN, C_OUT)
    assert out.shape == (N, F_OUT)
    err = float(jnp.max(jnp.abs(out - ref)))
    # bf16 MXU operands + bf16 tangent/adjacency streams + approx reciprocals:
    # accept bf16-level accuracy explicitly (per review), vs f32-HIGHEST reference.
    assert err < 5e-3, f"kernel mismatch vs reference: {err}"
    print("KERNEL_OK")
</pallas_src>

<mosaic_0001>
module attributes {stable_mosaic.version = 11 : i64} {
  func.func @hyp_linear_logmap_kernel(%arg0: i32, %arg1: memref<128x64xf32, #tpu.memory_space<vmem>>, %arg2: memref<64x128xf32, #tpu.memory_space<vmem>>, %arg3: memref<1x128xf32, #tpu.memory_space<vmem>>, %arg4: memref<1x1xf32, #tpu.memory_space<smem>>, %arg5: memref<128x128xbf16, #tpu.memory_space<vmem>>) attributes {dimension_semantics = [#tpu.dimension_semantics<parallel>], iteration_bounds = array<i64: 2>, scalar_prefetch = 0 : i64, scratch_operands = 0 : i64, tpu.core_type = #tpu.core_type<tc>, window_params = [{transform_indices = @transform_0, window_bounds = array<i64: 128, 64>}, {pipeline_mode = #tpu.pipeline_mode<synchronous>, transform_indices = @transform_1, window_bounds = array<i64: 64, 128>}, {pipeline_mode = #tpu.pipeline_mode<synchronous>, transform_indices = @transform_2, window_bounds = array<i64: 1, 128>}, {transform_indices = @transform_3, window_bounds = array<i64: 1, 1>}, {transform_indices = @transform_4, window_bounds = array<i64: 128, 128>}]} {
    %c0 = arith.constant 0 : index
    %c0_0 = arith.constant 0 : index
    %0 = vector.load %arg1[%c0, %c0_0] : memref<128x64xf32, #tpu.memory_space<vmem>>, vector<128x64xf32>
    %c0_1 = arith.constant 0 : index
    %c0_2 = arith.constant 0 : index
    %1 = vector.load %arg2[%c0_1, %c0_2] : memref<64x128xf32, #tpu.memory_space<vmem>>, vector<64x128xf32>
    %c0_3 = arith.constant 0 : index
    %c0_4 = arith.constant 0 : index
    %2 = vector.load %arg3[%c0_3, %c0_4] : memref<1x128xf32, #tpu.memory_space<vmem>>, vector<1x128xf32>
    %c0_5 = arith.constant 0 : index
    %c0_6 = arith.constant 0 : index
    %3 = memref.load %arg4[%c0_5, %c0_6] : memref<1x1xf32, #tpu.memory_space<smem>>
    %4 = arith.mulf %0, %0 : vector<128x64xf32>
    %cst = arith.constant dense<0.000000e+00> : vector<128xf32>
    %5 = vector.multi_reduction <add>, %4, %cst [1] : vector<128x64xf32> to vector<128xf32>
    %6 = vector.shape_cast %5 : vector<128xf32> to vector<128x1xf32>
    %7 = math.sqrt %6 : vector<128x1xf32>
    %cst_7 = arith.constant 1.000000e-15 : f32
    %8 = vector.broadcast %cst_7 : f32 to vector<128x1xf32>
    %9 = arith.maximumf %7, %8 : vector<128x1xf32>
    %cst_8 = arith.constant dense<0.000000e+00> : vector<128x128xf32>
    %10 = tpu.matmul %0, %1, %cst_8 {dimension_numbers = #tpu.dot_dimension_numbers<[1], [0], [0], [1], [0, 0, 1, 1], [], []>} : vector<128x64xf32>, vector<64x128xf32>, vector<128x128xf32> -> vector<128x128xf32>
    %11 = arith.mulf %10, %10 : vector<128x128xf32>
    %cst_9 = arith.constant dense<0.000000e+00> : vector<128xf32>
    %12 = vector.multi_reduction <add>, %11, %cst_9 [1] : vector<128x128xf32> to vector<128xf32>
    %13 = vector.shape_cast %12 : vector<128xf32> to vector<128x1xf32>
    %14 = math.sqrt %13 : vector<128x1xf32>
    %cst_10 = arith.constant 1.000000e-15 : f32
    %15 = vector.broadcast %cst_10 : f32 to vector<128x1xf32>
    %16 = arith.maximumf %14, %15 : vector<128x1xf32>
    %cst_11 = arith.constant 0.000000e+00 : f32
    %17 = vector.broadcast %cst_11 : f32 to vector<128x1xf32>
    %18 = arith.cmpf oeq, %13, %17 : vector<128x1xf32>
    %19 = tpu.reciprocal %9 {approx = true} : vector<128x1xf32> -> vector<128x1xf32>
    %20 = arith.mulf %16, %19 : vector<128x1xf32>
    %cst_12 = arith.constant 1.000000e+00 : f32
    %21 = vector.broadcast %cst_12 : f32 to vector<128x1xf32>
    %22 = arith.mulf %21, %9 : vector<128x1xf32>
    %cst_13 = arith.constant -0.99999988 : f32
    %cst_14 = arith.constant 0.99999988 : f32
    %23 = vector.broadcast %cst_13 : f32 to vector<128x1xf32>
    %24 = arith.maximumf %23, %22 : vector<128x1xf32>
    %25 = vector.broadcast %cst_14 : f32 to vector<128x1xf32>
    %26 = arith.minimumf %25, %24 : vector<128x1xf32>
    %27 = math.log1p %26 : vector<128x1xf32>
    %cst_15 = arith.constant 0.000000e+00 : f32
    %28 = vector.broadcast %cst_15 : f32 to vector<128x1xf32>
    %29 = arith.subf %28, %26 : vector<128x1xf32>
    %30 = math.log1p %29 : vector<128x1xf32>
    %31 = arith.subf %27, %30 : vector<128x1xf32>
    %cst_16 = arith.constant 5.000000e-01 : f32
    %32 = vector.broadcast %cst_16 : f32 to vector<128x1xf32>
    %33 = arith.mulf %32, %31 : vector<128x1xf32>
    %34 = arith.mulf %20, %33 : vector<128x1xf32>
    %35 = math.tanh %34 : vector<128x1xf32>
    %36 = tpu.reciprocal %16 {approx = true} : vector<128x1xf32> -> vector<128x1xf32>
    %37 = arith.mulf %35, %36 : vector<128x1xf32>
    %cst_17 = arith.constant 1.000000e+00 : f32
    %38 = vector.broadcast %cst_17 : f32 to vector<128x1xf32>
    %39 = arith.mulf %37, %38 : vector<128x1xf32>
    %cst_18 = arith.constant 0.000000e+00 : f32
    %40 = vector.broadcast %cst_18 : f32 to vector<128x1xf32>
    %41 = arith.select %18, %40, %39 : vector<128x1xi1>, vector<128x1xf32>
    %cst_19 = arith.constant 1.000000e+00 : f32
    %42 = vector.broadcast %cst_19 : f32 to vector<128x1xf32>
    %43 = arith.mulf %35, %42 : vector<128x1xf32>
    %cst_20 = arith.constant 0.000000e+00 : f32
    %44 = vector.broadcast %cst_20 : f32 to vector<128x1xf32>
    %45 = arith.select %18, %44, %43 : vector<128x1xi1>, vector<128x1xf32>
    %cst_21 = arith.constant 0.995999991 : f32
    %46 = vector.broadcast %cst_21 : f32 to vector<128x1xf32>
    %47 = arith.cmpf ogt, %45, %46 : vector<128x1xf32>
    %cst_22 = arith.constant 1.000000e-15 : f32
    %48 = vector.broadcast %cst_22 : f32 to vector<128x1xf32>
    %49 = arith.maximumf %45, %48 : vector<128x1xf32>
    %50 = tpu.reciprocal %49 {approx = true} : vector<128x1xf32> -> vector<128x1xf32>
    %cst_23 = arith.constant 0.995999991 : f32
    %51 = vector.broadcast %cst_23 : f32 to vector<128x1xf32>
    %52 = arith.mulf %51, %50 : vector<128x1xf32>
    %cst_24 = arith.constant 1.000000e+00 : f32
    %53 = vector.broadcast %cst_24 : f32 to vector<128x1xf32>
    %54 = arith.select %47, %52, %53 : vector<128x1xi1>, vector<128x1xf32>
    %55 = arith.mulf %41, %54 : vector<128x1xf32>
    %56 = vector.broadcast %55 : vector<128x1xf32> to vector<128x128xf32>
    %57 = arith.mulf %10, %56 : vector<128x128xf32>
    %cst_25 = arith.constant 0.995999991 : f32
    %58 = vector.broadcast %cst_25 : f32 to vector<128x1xf32>
    %59 = arith.minimumf %45, %58 : vector<128x1xf32>
    %60 = arith.mulf %59, %59 : vector<128x1xf32>
    %61 = vector.broadcast %2 : vector<1x128xf32> to vector<128x128xf32>
    %62 = arith.mulf %57, %61 : vector<128x128xf32>
    %cst_26 = arith.constant dense<0.000000e+00> : vector<128xf32>
    %63 = vector.multi_reduction <add>, %62, %cst_26 [1] : vector<128x128xf32> to vector<128xf32>
    %64 = vector.shape_cast %63 : vector<128xf32> to vector<128x1xf32>
    %cst_27 = arith.constant 2.000000e+00 : f32
    %65 = vector.broadcast %cst_27 : f32 to vector<128x1xf32>
    %66 = arith.mulf %65, %64 : vector<128x1xf32>
    %cst_28 = arith.constant 1.000000e+00 : f32
    %67 = vector.broadcast %cst_28 : f32 to vector<128x1xf32>
    %68 = arith.addf %67, %66 : vector<128x1xf32>
    %cst_29 = arith.constant 1.000000e+00 : f32
    %69 = vector.broadcast %cst_29 : f32 to vector<128x1xf32>
    %70 = arith.mulf %69, %60 : vector<128x1xf32>
    %71 = vector.broadcast %3 : f32 to vector<128x1xf32>
    %72 = arith.mulf %70, %71 : vector<128x1xf32>
    %73 = arith.addf %68, %72 : vector<128x1xf32>
    %cst_30 = arith.constant 1.000000e-15 : f32
    %74 = vector.broadcast %cst_30 : f32 to vector<128x1xf32>
    %75 = arith.maximumf %73, %74 : vector<128x1xf32>
    %76 = tpu.reciprocal %75 {approx = true} : vector<128x1xf32> -> vector<128x1xf32>
    %cst_31 = arith.constant 2.000000e+00 : f32
    %77 = vector.broadcast %cst_31 : f32 to vector<128x1xf32>
    %78 = arith.mulf %77, %64 : vector<128x1xf32>
    %cst_32 = arith.constant 1.000000e+00 : f32
    %79 = vector.broadcast %cst_32 : f32 to vector<128x1xf32>
    %80 = arith.addf %79, %78 : vector<128x1xf32>
    %cst_33 = arith.constant 1.000000e+00 : f32
    %81 = arith.mulf %cst_33, %3 : f32
    %82 = vector.broadcast %81 : f32 to vector<128x1xf32>
    %83 = arith.addf %80, %82 : vector<128x1xf32>
    %84 = arith.mulf %83, %76 : vector<128x1xf32>
    %cst_34 = arith.constant 1.000000e+00 : f32
    %85 = vector.broadcast %cst_34 : f32 to vector<128x1xf32>
    %86 = arith.mulf %85, %60 : vector<128x1xf32>
    %cst_35 = arith.constant 1.000000e+00 : f32
    %87 = vector.broadcast %cst_35 : f32 to vector<128x1xf32>
    %88 = arith.subf %87, %86 : vector<128x1xf32>
    %89 = arith.mulf %88, %76 : vector<128x1xf32>
    %90 = vector.broadcast %84 : vector<128x1xf32> to vector<128x128xf32>
    %91 = arith.mulf %57, %90 : vector<128x128xf32>
    %92 = vector.broadcast %2 : vector<1x128xf32> to vector<128x128xf32>
    %93 = vector.broadcast %89 : vector<128x1xf32> to vector<128x128xf32>
    %94 = arith.mulf %92, %93 : vector<128x128xf32>
    %95 = arith.addf %91, %94 : vector<128x128xf32>
    %96 = arith.mulf %95, %95 : vector<128x128xf32>
    %cst_36 = arith.constant dense<0.000000e+00> : vector<128xf32>
    %97 = vector.multi_reduction <add>, %96, %cst_36 [1] : vector<128x128xf32> to vector<128xf32>
    %98 = vector.shape_cast %97 : vector<128xf32> to vector<128x1xf32>
    %99 = math.sqrt %98 : vector<128x1xf32>
    %cst_37 = arith.constant 1.000000e-15 : f32
    %100 = vector.broadcast %cst_37 : f32 to vector<128x1xf32>
    %101 = arith.maximumf %99, %100 : vector<128x1xf32>
    %cst_38 = arith.constant 0.995999991 : f32
    %102 = vector.broadcast %cst_38 : f32 to vector<128x1xf32>
    %103 = arith.cmpf ogt, %101, %102 : vector<128x1xf32>
    %104 = tpu.reciprocal %101 {approx = true} : vector<128x1xf32> -> vector<128x1xf32>
    %cst_39 = arith.constant 0.995999991 : f32
    %105 = vector.broadcast %cst_39 : f32 to vector<128x1xf32>
    %106 = arith.mulf %105, %104 : vector<128x1xf32>
    %cst_40 = arith.constant 1.000000e+00 : f32
    %107 = vector.broadcast %cst_40 : f32 to vector<128x1xf32>
    %108 = arith.select %103, %106, %107 : vector<128x1xi1>, vector<128x1xf32>
    %cst_41 = arith.constant 0.995999991 : f32
    %109 = vector.broadcast %cst_41 : f32 to vector<128x1xf32>
    %110 = arith.minimumf %101, %109 : vector<128x1xf32>
    %cst_42 = arith.constant 1.000000e+00 : f32
    %111 = vector.broadcast %cst_42 : f32 to vector<128x1xf32>
    %112 = arith.mulf %111, %110 : vector<128x1xf32>
    %cst_43 = arith.constant -0.99999988 : f32
    %cst_44 = arith.constant 0.99999988 : f32
    %113 = vector.broadcast %cst_43 : f32 to vector<128x1xf32>
    %114 = arith.maximumf %113, %112 : vector<128x1xf32>
    %115 = vector.broadcast %cst_44 : f32 to vector<128x1xf32>
    %116 = arith.minimumf %115, %114 : vector<128x1xf32>
    %117 = math.log1p %116 : vector<128x1xf32>
    %cst_45 = arith.constant 0.000000e+00 : f32
    %118 = vector.broadcast %cst_45 : f32 to vector<128x1xf32>
    %119 = arith.subf %118, %116 : vector<128x1xf32>
    %120 = math.log1p %119 : vector<128x1xf32>
    %121 = arith.subf %117, %120 : vector<128x1xf32>
    %cst_46 = arith.constant 5.000000e-01 : f32
    %122 = vector.broadcast %cst_46 : f32 to vector<128x1xf32>
    %123 = arith.mulf %122, %121 : vector<128x1xf32>
    %cst_47 = arith.constant 1.000000e+00 : f32
    %124 = vector.broadcast %cst_47 : f32 to vector<128x1xf32>
    %125 = arith.mulf %124, %110 : vector<128x1xf32>
    %126 = tpu.reciprocal %125 {approx = true} : vector<128x1xf32> -> vector<128x1xf32>
    %127 = arith.mulf %123, %126 : vector<128x1xf32>
    %128 = arith.mulf %108, %127 : vector<128x1xf32>
    %129 = vector.broadcast %128 : vector<128x1xf32> to vector<128x128xf32>
    %130 = arith.mulf %95, %129 : vector<128x128xf32>
    %131 = arith.truncf %130 : vector<128x128xf32> to vector<128x128xbf16>
    %c0_48 = arith.constant 0 : index
    %c0_49 = arith.constant 0 : index
    %132 = vector.load %arg5[%c0_48, %c0_49] : memref<128x128xbf16, #tpu.memory_space<vmem>>, vector<128x128xbf16>
    tpu.vector_store %arg5[%c0_48, %c0_49], %131 {strides = array<i32>} : memref<128x128xbf16, #tpu.memory_space<vmem>>, vector<128x128xbf16>,
    return
  }
  func.func @transform_0(%arg0: i32) -> (i32, i32) {
    %c0_i32 = arith.constant 0 : i32
    %c0_i32_0 = arith.constant 0 : i32
    return %arg0, %c0_i32 : i32, i32
  }
  func.func @transform_1(%arg0: i32) -> (i32, i32) {
    %c0_i32 = arith.constant 0 : i32
    %c0_i32_0 = arith.constant 0 : i32
    %c0_i32_1 = arith.constant 0 : i32
    return %c0_i32, %c0_i32_0 : i32, i32
  }
  func.func @transform_2(%arg0: i32) -> (i32, i32) {
    %c0_i32 = arith.constant 0 : i32
    %c0_i32_0 = arith.constant 0 : i32
    %c0_i32_1 = arith.constant 0 : i32
    return %c0_i32, %c0_i32_0 : i32, i32
  }
  func.func @transform_3(%arg0: i32) -> (i32, i32) {
    %c0_i32 = arith.constant 0 : i32
    %c0_i32_0 = arith.constant 0 : i32
    %c0_i32_1 = arith.constant 0 : i32
    return %c0_i32, %c0_i32_0 : i32, i32
  }
  func.func @transform_4(%arg0: i32) -> (i32, i32) {
    %c0_i32 = arith.constant 0 : i32
    %c0_i32_0 = arith.constant 0 : i32
    return %arg0, %c0_i32 : i32, i32
  }
}

</mosaic_0001>

<bundles_post_ra>
// kernel: tpu_custom_call.1
= control target key start
LH: loop header
LB: loop body
LE: loop exit
PB: predicated region body
PF: predicated region fallthrough
CT: control target
= control target key end

     0   :  { %s5664_s0 = inlined_call_operand.vmem [shape: f32[256,64], index: 0, kind: input, shape index: {}]   ;;  %s5665_s1 = inlined_call_operand.vmem [shape: f32[64,128], index: 1, kind: input, shape index: {}]   ;;  %s5666_s2 = inlined_call_operand.vmem [shape: f32[1,128], index: 2, kind: input, shape index: {}]   ;;  %s5667_s3 = inlined_call_operand.<no memory space> [shape: f32[1,1], index: 3, kind: input, shape index: {}]   ;;  %s5668_s4 = inlined_call_operand.hbm [shape: bf16[256,128], index: 4, kind: output, shape index: {}]  }
   0x1   :  { %9 = sst [smem:[#allocation2]] %s5667_s3 }
   0x2   :  { %10 = vsyncpa [#allocation4], 0 }
   0x3   :  { %12 = vsyncpa [#allocation4 + $0x1], 0  ;;  %s3365_s17 = smov 0   ;;  %s3367_s18 = smov 0  }
   0x4   :  { %s3369_s19 = smov 0   ;;  %s3371_s20 = smov 0  }
   0x5 LB: > { %s3386_s3 = sadd.s32 4294967295, %s3332_s20   ;;  %s2551_s21 = sadd.s32 4294967294, %s3332_s20   ;;  %s3332_s20 = sphi %s3371_s20, %s5849_s20   ;;  %s3328_s19 = sphi %s3369_s19, %s5848_s19   ;;  %s3324_s18 = sphi %s3367_s18, %s5847_s18   ;;  %s3320_s17 = sphi %s3365_s17, %s5846_s17  }
   0x6   : > { %s3390_s22 = sadd.s32 1, %s3332_s20   ;;  %s114_s23 = sadd.s32 1, %s3328_s19 }
   0x7   : > { %s111_s24 = ssub.s32 %s3332_s20, %s3390_s22  ;;  %p124_p0 = scmp.ne.s32.totalorder %s3328_s19, %s3324_s18 }
   0x8   : > { %p112_p1 = scmp.eq.s32.totalorder %s111_s24, 0  ;;  %p125_p2 = scmp.eq.s32.totalorder %s3386_s3, 1 }
   0x9   : > { %p130_p3 = scmp.ne.s32.totalorder %s3324_s18, %s3320_s17  ;;  %p131_p4 = scmp.eq.s32.totalorder %s2551_s21, 1 }
   0xa   : > { %s3401_s25 = scalar_select %p112_p1, %s3328_s19, %s114_s23  }
   0xb   : > { %p3403_p5 = por %p125_p2, %p124_p0  ;;  %p3407_p6 = por %p131_p4, %p130_p3 }
   0xc   : > { %p2554_p7 = scmp.ge.s32.totalorder %s3332_s20, 1  ;;  %p167_p8 = scmp.lt.s32.totalorder %s3332_s20, 3 }
   0xe   : > { %p168_p9 = pnand %p2554_p7, %p167_p8 }
  0x10   : > { %171 = sbr.rel (%p168_p9) target bundleno = 963 (0x3c3), region = 36 }
  0x17   : > { %v216_v0 = vld [vmem:[%s5665_s1] sm:$0xff]  ;;  %v217_v1 = vld [vmem:[%s5665_s1 + $0x8] sm:$0xff]  ;;  %v218_v2 = vld [vmem:[%s5665_s1 + $0x10] sm:$0xff]  ;;  %s2556_s8 = sshll.u32 %s3386_s3, 4  ;;  %vm242_vm0 = vcmask 523264   ;;  %s225_s7 = sld [smem:[#allocation2]] }
  0x18   : > { %v2756_v3 = vpack.c.bf16 %v217_v1, %v216_v0  ;;  %v219_v4 = vld [vmem:[%s5665_s1 + $0x18] sm:$0xff]  ;;  %p194_p10 = scmp.lt.s32.totalorder %s2556_s8, 31  ;;  %v220_v6 = vld [vmem:[%s5665_s1 + $0x20] sm:$0xff]  ;;  %v221_v7 = vld [vmem:[%s5665_s1 + $0x28] sm:$0xff]  ;;  %s190_s10 = sand.u32 1, %s3324_s18  }
  0x19   : > { %v2760_v5 = vpack.c.bf16 %v219_v4, %v218_v2  ;;  %v2764_v8 = vpack.c.bf16 %v221_v7, %v220_v6  ;;  %v222_v9 = vld [vmem:[%s5665_s1 + $0x30] sm:$0xff]  ;;  %v223_v10 = vld [vmem:[%s5665_s1 + $0x38] sm:$0xff]  ;;  %s2555_s11 = sshll.u32 %s190_s10, 6  ;;  %s2644_s13 = sshll.u32 %s3386_s3, 10 }
  0x1a   : > { %2757 = vmatprep.subr.bf16.mxu0 %v2756_v3  ;;  %2772 = vmatprep.subr.bf16.mxu1 %v2756_v3  ;;  %s5851_s8 = smov (!%p194_p10, %s2556_s8), 31  ;;  %v2768_v17 = vpack.c.bf16 %v223_v10, %v222_v9  ;;  %s5225_s12 = scalar_lea.vmem [#allocation3], %s2555_s11 }
  0x1b   : > { %2759 = vmatpush3.bf16.msra.mxu0 %v2756_v3  ;;  %2776 = vmatpush3.bf16.msra.mxu1 %v2756_v3  ;;  %s2557_s15 = sshll.u32 %s5851_s8, 3  ;;  %s2489_s14 = sshll.u32 %s5225_s12, 4  ;;  %s5618_s14 = int_to_ptr.vmem [resolvable:$true] %s2489_s14 }
  0x1c   : > { %2761 = vmatprep.subr.bf16.mxu0 %v2760_v5  ;;  %2773 = vmatprep.subr.bf16.mxu1 %v2760_v5  ;;  %s3441_s30 = scalar_lea.vmem %s5664_s0, %s2557_s15  ;;  %s5616_s21 = scalar_lea.hbm %s5668_s4, %s2644_s13 }
  0x1d   : > { %v200_v11 = vld [vmem:[%s3441_s30] sm:$0xff]  ;;  %v201_v12 = vld [vmem:[%s3441_s30 + $0x8] sm:$0xff]  ;;  %v202_v15 = vld [vmem:[%s3441_s30 + $0x10] sm:$0xff]  ;;  %s5623_s23 = scalar_lea.sflag [#allocation4], %s190_s10  ;;  %s3270_s24 = scalar_lea.vmem %s5618_s14, 1024 }
  0x1e   : > { %v208_v13 = vld [vmem:[%s3441_s30 + $0x40] sm:$0xff]  ;;  %v226_v14 = vmul.f32 %v200_v11, %v200_v11  ;;  %v227_v16 = vmul.f32 %v201_v12, %v201_v12  ;;  %v228_v18 = vmul.f32 %v202_v15, %v202_v15  ;;  %2732 = vmatprep.mubr.msk.f32.mxu0 %vm242_vm0, %v200_v11  ;;  %v203_v19 = vld [vmem:[%s3441_s30 + $0x18] sm:$0xff]  ;;  %v205_v25 = vld [vmem:[%s3441_s30 + $0x28] sm:$0xff]  ;;  %p3271_p11 = scmp.ne.s32.totalorder %s5618_s14, %s3270_s24  ;;  %s3334_s3 = smov [#allocation3]  }
  0x1f   : > { %2763 = vmatpush3.bf16.msra.mxu0 %v2760_v5  ;;  %2777 = vmatpush3.bf16.msra.mxu1 %v2760_v5  ;;  %v229_v22 = vmul.f32 %v203_v19, %v203_v19  ;;  %v204_v24 = vld [vmem:[%s3441_s30 + $0x20] sm:$0xff]  ;;  %v231_v28 = vmul.f32 %v205_v25, %v205_v25  ;;  %v209_v29 = vld [vmem:[%s3441_s30 + $0x48] sm:$0xff]  ;;  %v210_v30 = vld [vmem:[%s3441_s30 + $0x50] sm:$0xff]  ;;  %v234_v39 = vmul.f32 %v208_v13, %v208_v13  ;;  %s3274_s28 = sshll.u32 %s3334_s3, 4  ;;  %s3275_s28 = int_to_ptr.vmem [resolvable:$false] %s3274_s28 }
  0x20   : > { %2765 = vmatprep.subr.bf16.mxu0 %v2764_v8  ;;  %2774 = vmatprep.subr.bf16.mxu1 %v2764_v8  ;;  %v243_v20 = vsel %vm242_vm0, %v226_v14, 0.0  ;;  %v249_v21 = vsel %vm242_vm0, %v228_v18, 0.0  ;;  %v246_v23 = vsel %vm242_vm0, %v227_v16, 0.0  ;;  %v230_v26 = vmul.f32 %v204_v24, %v204_v24  ;;  %v206_v31 = vld [vmem:[%s3441_s30 + $0x30] sm:$0xff]  ;;  %v207_v32 = vld [vmem:[%s3441_s30 + $0x38] sm:$0xff]  ;;  %v212_v38 = vld [vmem:[%s3441_s30 + $0x60] sm:$0xff]  ;;  %p3272_p12 = pnand %p3271_p11, %p3403_p5  ;;  %p3277_p0 = scmp.lt.s32.totalorder %s5618_s14, %s3275_s28 }
  0x21   : > { %2744 = vmatprep.mubr.msk.f32.mxu1 %vm242_vm0, %v208_v13  ;;  %244 = vadd.xlane.f32.xlu0 %v243_v20  ;;  %v252_v27 = vsel %vm242_vm0, %v229_v22, 0.0  ;;  %v232_v34 = vmul.f32 %v206_v31, %v206_v31  ;;  %v258_v35 = vsel %vm242_vm0, %v231_v28, 0.0  ;;  %v233_v36 = vmul.f32 %v207_v32, %v207_v32  ;;  %v211_v37 = vld [vmem:[%s3441_s30 + $0x58] sm:$0xff]  ;;  %v213_v43 = vld [vmem:[%s3441_s30 + $0x68] sm:$0xff]  ;;  %v214_v44 = vld [vmem:[%s3441_s30 + $0x70] sm:$0xff]  ;;  %s3276_s29 = scalar_lea.vmem %s3275_s28, 2048 }
  0x22   : > { %250 = vadd.xlane.f32.xlu1 %v249_v21  ;;  %v255_v33 = vsel %vm242_vm0, %v230_v26, 0.0  ;;  %v235_v42 = vmul.f32 %v209_v29, %v209_v29  ;;  %v267_v45 = vsel %vm242_vm0, %v234_v39, 0.0  ;;  %v236_v46 = vmul.f32 %v210_v30, %v210_v30  ;;  %v215_v49 = vld [vmem:[%s3441_s30 + $0x78] sm:$0xff]  ;;  %p3273_p13 = pneg %p3272_p12  ;;  %p3278_p1 = scmp.lt.s32.totalorder %s3276_s29, %s3270_s24 }
  0x23   : > { %2767 = vmatpush3.bf16.msra.mxu0 %v2764_v8  ;;  %2778 = vmatpush3.bf16.msra.mxu1 %v2764_v8  ;;  %v261_v40 = vsel %vm242_vm0, %v232_v34, 0.0  ;;  %v264_v41 = vsel %vm242_vm0, %v233_v36, 0.0  ;;  %v237_v48 = vmul.f32 %v211_v37, %v211_v37  ;;  %v238_v51 = vmul.f32 %v212_v38, %v212_v38 }
  0x24   : > { %2769 = vmatprep.subr.bf16.mxu0 %v2768_v17  ;;  %2775 = vmatprep.subr.bf16.mxu1 %v2768_v17  ;;  %v270_v47 = vsel %vm242_vm0, %v235_v42, 0.0  ;;  %v273_v50 = vsel %vm242_vm0, %v236_v46, 0.0  ;;  %v239_v53 = vmul.f32 %v213_v43, %v213_v43  ;;  %v240_v55 = vmul.f32 %v214_v44, %v214_v44  ;;  %p3279_p2 = por %p3278_p1, %p3277_p0 }
  0x25   : > { %247 = vadd.xlane.f32.xlu0 %v246_v23  ;;  %v276_v52 = vsel %vm242_vm0, %v237_v48, 0.0  ;;  %v279_v54 = vsel %vm242_vm0, %v238_v51, 0.0  ;;  %v241_v57 = vmul.f32 %v215_v49, %v215_v49 }
  0x26   : > { %253 = vadd.xlane.f32.xlu1 %v252_v27  ;;  %v282_v56 = vsel %vm242_vm0, %v239_v53, 0.0  ;;  %v285_v58 = vsel %vm242_vm0, %v240_v55, 0.0  ;;  %p3280_p3 = pnand %p3279_p2, %p3273_p13 }
  0x27   : > { %2771 = vmatpush3.bf16.msra.mxu0 %v2768_v17  ;;  %2779 = vmatpush3.bf16.msra.mxu1 %v2768_v17  ;;  %v288_v59 = vsel %vm242_vm0, %v241_v57, 0.0 }
  0x29   : > { %256 = vadd.xlane.f32.xlu0 %v255_v33 }
  0x2a   : > { %2733 = vmatmul.mubr.msk.f32.vlgmr.msra.gmra.mrb[0].mxu0 %vm242_vm0, %v201_v12  ;;  %2745 = vmatmul.mubr.msk.f32.vlgmr.msra.gmra.mrb[0].mxu1 %vm242_vm0, %v209_v29 }
  0x2b   : > { %2735 = vmatprep.mubr.msk.f32.mxu0 %vm242_vm0, %v202_v15  ;;  %2747 = vmatprep.mubr.msk.f32.mxu1 %vm242_vm0, %v210_v30 }
  0x2c   : > { %259 = vadd.xlane.f32.xlu1 %v258_v35 }
  0x2d   : > { %262 = vadd.xlane.f32.xlu0 %v261_v40 }
  0x2e   : > { %2736 = vmatmul.mubr.msk.f32.gmra.mrb[2].mxu0 %vm242_vm0, %v203_v19  ;;  %2748 = vmatmul.mubr.msk.f32.gmra.mrb[2].mxu1 %vm242_vm0, %v211_v37 }
  0x2f   : > { %2738 = vmatprep.mubr.msk.f32.mxu0 %vm242_vm0, %v204_v24  ;;  %2750 = vmatprep.mubr.msk.f32.mxu1 %vm242_vm0, %v212_v38 }
  0x30   : > { %265 = vadd.xlane.f32.xlu1 %v264_v41 }
  0x31   : > { %268 = vadd.xlane.f32.xlu0 %v267_v45 }
  0x32   : > { %2739 = vmatmul.mubr.msk.f32.gmra.mrb[4].mxu0 %vm242_vm0, %v205_v25  ;;  %2751 = vmatmul.mubr.msk.f32.gmra.mrb[4].mxu1 %vm242_vm0, %v213_v43 }
  0x33   : > { %2741 = vmatprep.mubr.msk.f32.mxu0 %vm242_vm0, %v206_v31  ;;  %2753 = vmatprep.mubr.msk.f32.mxu1 %vm242_vm0, %v214_v44 }
  0x34   : > { %271 = vadd.xlane.f32.xlu1 %v270_v47 }
  0x35   : > { %274 = vadd.xlane.f32.xlu0 %v273_v50 }
  0x36   : > { %2742 = vmatmul.mubr.msk.f32.gmra.mrb[6].mxu0 %vm242_vm0, %v207_v32  ;;  %2754 = vmatmul.mubr.msk.f32.gmra.mrb[6].mxu1 %vm242_vm0, %v215_v49 }
  0x38   : > { %277 = vadd.xlane.f32.xlu1 %v276_v52 }
  0x39   : > { %280 = vadd.xlane.f32.xlu0 %v279_v54 }
  0x3c   : > { %283 = vadd.xlane.f32.xlu1 %v282_v56 }
  0x3d   : > { %286 = vadd.xlane.f32.xlu0 %v285_v58 }
  0x40   : > { %289 = vadd.xlane.f32.xlu1 %v288_v59 }
  0xae   : > { %v3529_v15 = vpop.xlane.xlu0 %244 }
  0xaf   : > { %v3517_v9 = vpop.xlane.xlu1 %250  ;;  %2821 = vrsqrt.f32 %v3529_v15  ;;  %vm293_vm1 = vcmp.eq.f32.partialorder %v3529_v15, inf  ;;  %vm295_vm2 = vcmp.eq.f32.partialorder %v3529_v15, 0.0  ;;  %v296_v43 = vand.u32 2147483648, %v3529_v15 }
  0xb0   : > { %2823 = vrsqrt.f32 %v3517_v9  ;;  %vm307_vm3 = vcmp.eq.f32.partialorder %v3517_v9, inf  ;;  %vm309_vm6 = vcmp.eq.f32.partialorder %v3517_v9, 0.0  ;;  %v310_v50 = vand.u32 2147483648, %v3517_v9 }
  0xb2   : > { %v3549_v25 = vpop.xlane.xlu0 %247 }
  0xb3   : > { %v3543_v22 = vpop.xlane.xlu1 %253  ;;  %2825 = vrsqrt.f32 %v3549_v25  ;;  %vm300_vm4 = vcmp.eq.f32.partialorder %v3549_v25, inf  ;;  %vm302_vm7 = vcmp.eq.f32.partialorder %v3549_v25, 0.0  ;;  %v303_v51 = vand.u32 2147483648, %v3549_v25 }
  0xb4   : > { %2827 = vrsqrt.f32 %v3543_v22  ;;  %vm314_vm5 = vcmp.eq.f32.partialorder %v3543_v22, inf  ;;  %v317_v55 = vand.u32 2147483648, %v3543_v22  ;;  %vm316_vm8 = vcmp.eq.f32.partialorder %v3543_v22, 0.0 }
  0xb6   : > { %v3561_v29 = vpop.xlane.xlu0 %256 }
  0xb7   : > { %2829 = vrsqrt.f32 %v3561_v29  ;;  %vm321_vm10 = vcmp.eq.f32.partialorder %v3561_v29, inf  ;;  %vm323_vm11 = vcmp.eq.f32.partialorder %v3561_v29, 0.0 }
  0xb9   : > { %v3557_v28 = vpop.xlane.xlu1 %259  ;;  %v2822_v34 = vpop.eup %2821 }
  0xba   : > { %2831 = vrsqrt.f32 %v3557_v28  ;;  %v3575_v36 = vpop.xlane.xlu0 %262  ;;  %v2824_v37 = vpop.eup %2823  ;;  %v292_v39 = vmul.f32 %v2822_v34, %v3529_v15  ;;  %vm328_vm9 = vcmp.eq.f32.partialorder %v3557_v28, inf  ;;  %vm330_vm12 = vcmp.eq.f32.partialorder %v3557_v28, 0.0 }
  0xbb   : > { %2833 = vrsqrt.f32 %v3575_v36  ;;  %v306_v42 = vmul.f32 %v2824_v37, %v3517_v9  ;;  %vm335_vm13 = vcmp.eq.f32.partialorder %v3575_v36, inf  ;;  %vm337_vm0 = vcmp.eq.f32.partialorder %v3575_v36, 0.0 }
  0xbc   : > { %v294_v47 = vsel %vm293_vm1, %v3529_v15, %v292_v39  ;;  %v338_v39 = vand.u32 2147483648, %v3575_v36 }
  0xbd   : > { %v3569_v32 = vpop.xlane.xlu1 %265  ;;  %v2826_v38 = vpop.eup %2825  ;;  %v308_v53 = vsel %vm307_vm3, %v3517_v9, %v306_v42  ;;  %v297_v54 = vsel %vm295_vm2, %v296_v43, %v294_v47 }
  0xbe   : > { %v2828_v40 = vpop.eup %2827  ;;  %2835 = vrsqrt.f32 %v3569_v32  ;;  %v299_v44 = vmul.f32 %v2826_v38, %v3549_v25  ;;  %v3588_v45 = vpop.xlane.xlu0 %268  ;;  %vm342_vm14 = vcmp.eq.f32.partialorder %v3569_v32, inf  ;;  %vm344_vm15 = vcmp.eq.f32.partialorder %v3569_v32, 0.0 }
  0xbf   : > { %v313_v48 = vmul.f32 %v2828_v40, %v3543_v22  ;;  %v345_v38 = vand.u32 2147483648, %v3569_v32  ;;  %vm349_vm3 = vcmp.eq.f32.partialorder %v3588_v45, inf }
  0xc0   : > { %v301_v56 = vsel %vm300_vm4, %v3549_v25, %v299_v44  ;;  %vm351_vm4 = vcmp.eq.f32.partialorder %v3588_v45, 0.0 }
  0xc1   : > { %v3580_v41 = vpop.xlane.xlu1 %271  ;;  %v2830_v46 = vpop.eup %2829  ;;  %v315_v58 = vsel %vm314_vm5, %v3543_v22, %v313_v48 }
  0xc2   : > { %2837 = vrsqrt.f32 %v3580_v41  ;;  %v3608_v57 = vpop.xlane.xlu0 %274  ;;  %v318_v15 = vsel %vm316_vm8, %v317_v55, %v315_v58  ;;  %vm356_vm1 = vcmp.eq.f32.partialorder %v3580_v41, inf  ;;  %vm358_vm2 = vcmp.eq.f32.partialorder %v3580_v41, 0.0 }
  0xc3   : > { %2839 = vrsqrt.f32 %v3588_v45 }
  0xc4   : > { %v2832_v49 = vpop.eup %2831 }
  0xc5   : > { %v3599_v52 = vpop.xlane.xlu1 %277  ;;  %v327_v59 = vmul.f32 %v2832_v49, %v3557_v28 }
  0xc6   : > { %2841 = vrsqrt.f32 %v3599_v52  ;;  %vm370_vm5 = vcmp.eq.f32.partialorder %v3599_v52, inf }
  0xc7   : > { %v329_v22 = vsel %vm328_vm9, %v3557_v28, %v327_v59  ;;  %2843 = vrsqrt.f32 %v3608_v57  ;;  %vm365_vm9 = vcmp.eq.f32.partialorder %v3608_v57, 0.0 }
  0xc9   : > { %v3629_v9 = vpop.xlane.xlu1 %283 }
  0xca   : > { %2845 = vrsqrt.f32 %v3629_v9  ;;  %vm384_vm8 = vcmp.eq.f32.partialorder %v3629_v9, inf }
  0xfd   : > { %v3491_v60 = vpop.f32.mrb[0].mxu0  ;;  %v3493_v61 = vpop.f32.mrb[0].mxu1 }
  0xfe   : > { %5688 = vst [vmem:[#allocation6_spill] sm:$0xff] %v3491_v60  ;;  %5689 = vst [vmem:[#allocation7_spill] sm:$0xff] %v3493_v61  ;;  %v3495_v62 = vpop.f32.mrb[1].mxu0  ;;  %v613_v63 = vmul.f32 %v3491_v60, %v3491_v60  ;;  %v3499_v0 = vpop.f32.mrb[1].mxu1  ;;  %v621_v2 = vmul.f32 %v3493_v61, %v3493_v61 }
  0xff   : > { %5690 = vst [vmem:[#allocation8_spill] sm:$0xff] %v3495_v62  ;;  %5691 = vst [vmem:[#allocation9_spill] sm:$0xff] %v3499_v0  ;;  %v612_v1 = vmul.f32 %v3495_v62, %v3495_v62  ;;  %v620_v4 = vmul.f32 %v3499_v0, %v3499_v0 }
 0x100   : > { %630 = vadd.xlane.f32.xlu1 %v613_v63  ;;  %v320_v63 = vmul.f32 %v2830_v46, %v3561_v29  ;;  %v3658_v46 = vpop.xlane.xlu1 %289 }
 0x101   : > { %628 = vadd.xlane.f32.xlu0 %v612_v1  ;;  %v3505_v3 = vpop.f32.mrb[2].mxu0  ;;  %v3509_v5 = vpop.f32.mrb[2].mxu1 }
 0x102   : > { %5692 = vst [vmem:[#allocation10_spill] sm:$0xff] %v3505_v3  ;;  %5693 = vst [vmem:[#allocation11_spill] sm:$0xff] %v3509_v5  ;;  %v3511_v6 = vpop.f32.mrb[3].mxu0  ;;  %v3513_v7 = vpop.f32.mrb[3].mxu1  ;;  %v615_v8 = vmul.f32 %v3505_v3, %v3505_v3  ;;  %v623_v16 = vmul.f32 %v3509_v5, %v3509_v5 }
 0x103   : > { %5694 = vst [vmem:[#allocation12_spill] sm:$0xff] %v3511_v6  ;;  %5695 = vst [vmem:[#allocation13_spill] sm:$0xff] %v3513_v7  ;;  %v614_v10 = vmul.f32 %v3511_v6, %v3511_v6  ;;  %v622_v17 = vmul.f32 %v3513_v7, %v3513_v7  ;;  %v2834_v1 = vpop.eup %2833 }
 0x104   : > { %646 = vadd.xlane.f32.xlu1 %v621_v2  ;;  %v311_v2 = vsel %vm309_vm6, %v310_v50, %v308_v53  ;;  %vm372_vm6 = vcmp.eq.f32.partialorder %v3599_v52, 0.0 }
 0x105   : > { %644 = vadd.xlane.f32.xlu0 %v620_v4  ;;  %v3521_v11 = vpop.f32.mrb[4].mxu0  ;;  %v3523_v12 = vpop.f32.mrb[4].mxu1  ;;  %v403_v4 = vmax.f32 %v297_v54, 1e-15 }
 0x106   : > { %5696 = vst [vmem:[#allocation14_spill] sm:$0xff] %v3521_v11  ;;  %5697 = vst [vmem:[#allocation15_spill] sm:$0xff] %v3523_v12  ;;  %v3525_v13 = vpop.f32.mrb[5].mxu0  ;;  %v3527_v14 = vpop.f32.mrb[5].mxu1  ;;  %v617_v23 = vmul.f32 %v3521_v11, %v3521_v11  ;;  %v625_v26 = vmul.f32 %v3523_v12, %v3523_v12 }
 0x107   : > { %5698 = vst [vmem:[#allocation16_spill] sm:$0xff] %v3525_v13  ;;  %5699 = vst [vmem:[#allocation17_spill] sm:$0xff] %v3527_v14  ;;  %v616_v24 = vmul.f32 %v3525_v13, %v3525_v13  ;;  %v624_v27 = vmul.f32 %v3527_v14, %v3527_v14 }
 0x108   : > { %634 = vadd.xlane.f32.xlu1 %v615_v8  ;;  %v304_v8 = vsel %vm302_vm7, %v303_v51, %v301_v56  ;;  %v359_v51 = vand.u32 2147483648, %v3580_v41  ;;  %vm363_vm7 = vcmp.eq.f32.partialorder %v3608_v57, inf }
 0x109   : > { %632 = vadd.xlane.f32.xlu0 %v614_v10  ;;  %v3535_v18 = vpop.f32.mrb[6].mxu0  ;;  %v3537_v19 = vpop.f32.mrb[6].mxu1  ;;  %v324_v10 = vand.u32 2147483648, %v3561_v29  ;;  %v404_v25 = vmax.f32 %v304_v8, 1e-15 }
 0x10a   : > { %5700 = vst [vmem:[#allocation18_spill] sm:$0xff] %v3535_v18  ;;  %5701 = vst [vmem:[#allocation19_spill] sm:$0xff] %v3537_v19  ;;  %v3539_v20 = vpop.f32.mrb[7].mxu0  ;;  %v3541_v21 = vpop.f32.mrb[7].mxu1  ;;  %v619_v30 = vmul.f32 %v3535_v18, %v3535_v18  ;;  %v627_v33 = vmul.f32 %v3537_v19, %v3537_v19 }
 0x10b   : > { %5702 = vst [vmem:[#allocation20_spill] sm:$0xff] %v3539_v20  ;;  %5703 = vst [vmem:[#allocation21_spill] sm:$0xff] %v3541_v21  ;;  %v618_v31 = vmul.f32 %v3539_v20, %v3539_v20  ;;  %v626_v35 = vmul.f32 %v3541_v21, %v3541_v21  ;;  %v3651_v42 = vclamps-f32 %v404_v25, 0.9999999 }
 0x10c   : > { %650 = vadd.xlane.f32.xlu1 %v623_v16  ;;  %v331_v16 = vand.u32 2147483648, %v3557_v28 }
 0x10d   : > { %648 = vadd.xlane.f32.xlu0 %v622_v17  ;;  %v2836_v17 = vpop.eup %2835  ;;  %v3676_v55 = vsub.f32 0.0, %v3651_v42  ;;  %v883_v13 = vand.u32 2147483647, %v3651_v42 }
 0x10e   : > { %v332_v34 = vsel %vm330_vm12, %v331_v16, %v329_v22  ;;  %v341_v37 = vmul.f32 %v2836_v17, %v3569_v32 }
 0x10f   : > { %v408_v43 = vmax.f32 %v332_v34, 1e-15  ;;  %v1043_v5 = vand.u32 2147483647, %v3676_v55 }
 0x110   : > { %638 = vadd.xlane.f32.xlu1 %v617_v23  ;;  %v322_v23 = vsel %vm321_vm10, %v3561_v29, %v320_v63  ;;  %v343_v49 = vsel %vm342_vm14, %v3569_v32, %v341_v37  ;;  %v352_v32 = vand.u32 2147483648, %v3588_v45  ;;  %vm400_vm14 = vcmp.eq.f32.partialorder %v3658_v46, 0.0 }
 0x111   : > { %636 = vadd.xlane.f32.xlu0 %v616_v24  ;;  %v405_v24 = vmax.f32 %v311_v2, 1e-15  ;;  %v3680_v59 = vclamps-f32 %v408_v43, 0.9999999  ;;  %v346_v63 = vsel %vm344_vm15, %v345_v38, %v343_v49 }
 0x112   : > { %v410_v17 = vmax.f32 %v346_v63, 1e-15 }
 0x113   : > { %v3649_v40 = vclamps-f32 %v405_v24, 0.9999999 }
 0x114   : > { %654 = vadd.xlane.f32.xlu1 %v625_v26  ;;  %v334_v26 = vmul.f32 %v2834_v1, %v3575_v36 }
 0x115   : > { %652 = vadd.xlane.f32.xlu0 %v624_v27  ;;  %v3633_v27 = vpop.xlane.xlu0 %280  ;;  %v3673_v54 = vsub.f32 0.0, %v3649_v40 }
 0x116   : > { %2847 = vrsqrt.f32 %v3633_v27  ;;  %v336_v28 = vsel %vm335_vm13, %v3575_v36, %v334_v26  ;;  %vm377_vm10 = vcmp.eq.f32.partialorder %v3633_v27, inf  ;;  %vm379_vm12 = vcmp.eq.f32.partialorder %v3633_v27, 0.0 }
 0x117   : > { %2849 = vrcp.f32 %v403_v4  ;;  %v339_v50 = vsel %vm337_vm0, %v338_v39, %v336_v28  ;;  %v3720_v39 = vclamps-f32 %v410_v17, 0.9999999  ;;  %vm398_vm13 = vcmp.eq.f32.partialorder %v3658_v46, inf }
 0x118   : > { %642 = vadd.xlane.f32.xlu1 %v619_v30  ;;  %v2838_v30 = vpop.eup %2837  ;;  %2851 = vrcp.f32 %v405_v24  ;;  %v3701_v24 = vsub.f32 0.0, %v3680_v59 }
 0x119   : > { %640 = vadd.xlane.f32.xlu0 %v618_v31  ;;  %v3635_v31 = vclamps-f32 %v403_v4, 0.9999999  ;;  %v355_v29 = vmul.f32 %v2838_v30, %v3580_v41  ;;  %2853 = vrcp.f32 %v404_v25  ;;  %v2840_v53 = vpop.eup %2839  ;;  %v3687_v1 = vpop.xlane.xlu0 %286  ;;  %v409_v4 = vmax.f32 %v339_v50, 1e-15 }
 0x11a   : > { %2855 = vrsqrt.f32 %v3658_v46  ;;  %v2842_v58 = vpop.eup %2841  ;;  %v373_v30 = vand.u32 2147483648, %v3599_v52  ;;  %vm391_vm15 = vcmp.eq.f32.partialorder %v3687_v1, inf  ;;  %vm393_vm0 = vcmp.eq.f32.partialorder %v3687_v1, 0.0 }
 0x11b   : > { %v3661_v47 = vsub.f32 0.0, %v3635_v31  ;;  %v357_v56 = vsel %vm356_vm1, %v3580_v41, %v355_v29  ;;  %v2844_v8 = vpop.eup %2843  ;;  %v369_v22 = vmul.f32 %v2842_v58, %v3599_v52  ;;  %v3707_v25 = vclamps-f32 %v409_v4, 0.9999999 }
 0x11c   : > { %658 = vadd.xlane.f32.xlu1 %v627_v33  ;;  %v406_v33 = vmax.f32 %v318_v15, 1e-15  ;;  %v348_v15 = vmul.f32 %v2840_v53, %v3588_v45  ;;  %v2846_v16 = vpop.eup %2845  ;;  %v387_v53 = vand.u32 2147483648, %v3629_v9  ;;  %v874_v18 = vand.u32 2147483647, %v3635_v31 }
 0x11d   : > { %656 = vadd.xlane.f32.xlu0 %v626_v35  ;;  %v325_v35 = vsel %vm323_vm11, %v324_v10, %v322_v23  ;;  %v360_v10 = vsel %vm358_vm2, %v359_v51, %v357_v56  ;;  %v383_v37 = vmul.f32 %v2846_v16, %v3629_v9  ;;  %v371_v28 = vsel %vm370_vm5, %v3599_v52, %v369_v22 }
 0x11e   : > { %v407_v44 = vmax.f32 %v325_v35, 1e-15  ;;  %v3663_v48 = vclamps-f32 %v406_v33, 0.9999999  ;;  %2857 = vrcp.f32 %v406_v33  ;;  %v412_v26 = vmax.f32 %v360_v10, 1e-15 }
 0x11f   : > { %v350_v34 = vsel %vm349_vm3, %v3588_v45, %v348_v15  ;;  %v362_v35 = vmul.f32 %v2844_v8, %v3608_v57  ;;  %vm386_vm11 = vcmp.eq.f32.partialorder %v3629_v9, 0.0  ;;  %v374_v56 = vsel %vm372_vm6, %v373_v30, %v371_v28 }
 0x120   : > { %v3682_v36 = vclamps-f32 %v407_v44, 0.9999999  ;;  %v3690_v2 = vsub.f32 0.0, %v3663_v48  ;;  %2859 = vrcp.f32 %v407_v44  ;;  %v2848_v23 = vpop.eup %2847  ;;  %v366_v44 = vand.u32 2147483648, %v3608_v57 }
 0x121   : > { %2861 = vrsqrt.f32 %v3687_v1  ;;  %v3710_v33 = vpop.eup %2849  ;;  %v376_v29 = vmul.f32 %v2848_v23, %v3633_v27  ;;  %v3732_v50 = vclamps-f32 %v412_v26, 0.9999999  ;;  %v353_v51 = vsel %vm351_vm4, %v352_v32, %v350_v34 }
 0x122   : > { %2863 = vrcp.f32 %v408_v43  ;;  %v3704_v41 = vsub.f32 0.0, %v3682_v36  ;;  %v3718_v38 = vpop.eup %2851  ;;  %v364_v58 = vsel %vm363_vm7, %v3608_v57, %v362_v35  ;;  %v385_v63 = vsel %vm384_vm8, %v3629_v9, %v383_v37 }
 0x123   : > { %2865 = vrcp.f32 %v409_v4  ;;  %5704 = vst [vmem:[#allocation22_spill] sm:$0xff] %v3718_v38  ;;  %v3727_v43 = vpop.eup %2853  ;;  %v380_v4 = vand.u32 2147483648, %v3633_v27  ;;  %v3748_v45 = vsub.f32 0.0, %v3720_v39  ;;  %v3751_v10 = vsub.f32 0.0, %v3707_v25 }
 0x124   : > { %2867 = vrcp.f32 %v410_v17  ;;  %v2856_v49 = vpop.eup %2855  ;;  %v378_v15 = vsel %vm377_vm10, %v3633_v27, %v376_v29  ;;  %v411_v32 = vmax.f32 %v353_v51, 1e-15  ;;  %v414_v22 = vmax.f32 %v374_v56, 1e-15 }
 0x125   : > { %2869 = vrcp.f32 %v412_v26  ;;  %v397_v16 = vmul.f32 %v2856_v49, %v3658_v46  ;;  %v367_v23 = vsel %vm365_vm9, %v366_v44, %v364_v58  ;;  %v388_v30 = vsel %vm386_vm11, %v387_v53, %v385_v63 }
 0x126   : > { %v877_v34 = vadd.f32 1.0, %v3651_v42  ;;  %v3767_v27 = vsub.f32 0.0, %v3732_v50  ;;  %2871 = vrcp.f32 %v411_v32  ;;  %v381_v26 = vsel %vm379_vm12, %v380_v4, %v378_v15 }
 0x127   : > { %v1037_v37 = vadd.f32 1.0, %v3676_v55  ;;  %2873 = vrcp.f32 %v414_v22  ;;  %v401_v57 = vand.u32 2147483648, %v3658_v46  ;;  %v413_v9 = vmax.f32 %v367_v23, 1e-15 }
 0x128   : > { %v3745_v8 = vpop.eup %2857  ;;  %v416_v29 = vmax.f32 %v388_v30, 1e-15  ;;  %v399_v44 = vsel %vm398_vm13, %v3658_v46, %v397_v16  ;;  %v3779_v51 = vclamps-f32 %v411_v32, 0.9999999  ;;  %v415_v53 = vmax.f32 %v381_v26, 1e-15 }
 0x129   : > { %5705 = vst [vmem:[#allocation23_spill] sm:$0xff] %v3745_v8  ;;  %2875 = vlog2.f32 %v877_v34  ;;  %v868_v56 = vadd.f32 1.0, %v3635_v31  ;;  %v3784_v63 = vclamps-f32 %v414_v22, 0.9999999  ;;  %v1028_v4 = vadd.f32 1.0, %v3661_v47 }
 0x12a   : > { %v3755_v52 = vpop.eup %2859  ;;  %2877 = vlog2.f32 %v1037_v37  ;;  %v3790_v15 = vsel %vm400_vm14, %v401_v57, %v399_v44  ;;  %v394_v32 = vand.u32 2147483648, %v3687_v1  ;;  %v895_v16 = vadd.f32 1.0, %v3663_v48 }
 0x12b   : > { %5706 = vst [vmem:[#allocation24_spill] sm:$0xff] %v3755_v52  ;;  %v2862_v17 = vpop.eup %2861  ;;  %2879 = vrcp.f32 %v413_v9  ;;  %v3796_v23 = vclamps-f32 %v416_v29, 0.9999999  ;;  %v3802_v30 = vsub.f32 0.0, %v3779_v51  ;;  %v3804_v34 = vclamps-f32 %v415_v53, 0.9999999 }
 0x12c   : > { %v3764_v35 = vpop.eup %2863  ;;  %v390_v49 = vmul.f32 %v2862_v17, %v3687_v1  ;;  %v3794_v17 = vclamps-f32 %v413_v9, 0.9999999  ;;  %2881 = vrcp.f32 %v416_v29  ;;  %v1055_v46 = vadd.f32 1.0, %v3690_v2 }
 0x12d   : > { %5707 = vst [vmem:[#allocation25_spill] sm:$0xff] %v3764_v35  ;;  %v3770_v28 = vpop.eup %2865  ;;  %2883 = vlog2.f32 %v868_v56  ;;  %v3810_v37 = vsub.f32 0.0, %v3784_v63  ;;  %v880_v9 = vmul.f32 -0.5, %v3651_v42  ;;  %v1040_v44 = vmul.f32 -0.5, %v3676_v55 }
 0x12e   : > { %5708 = vst [vmem:[#allocation26_spill] sm:$0xff] %v3770_v28  ;;  %v3782_v58 = vpop.eup %2867  ;;  %v392_v22 = vsel %vm391_vm15, %v3687_v1, %v390_v49  ;;  %2885 = vlog2.f32 %v1028_v4  ;;  %v886_v49 = vadd.f32 1.0, %v3649_v40  ;;  %v3823_v21 = vsub.f32 0.0, %v3794_v17 }
 0x12f   : > { %5709 = vst [vmem:[#allocation27_spill] sm:$0xff] %v3782_v58  ;;  %v3807_v26 = vpop.eup %2869  ;;  %v3816_v29 = vsel %vm393_vm0, %v394_v32, %v392_v22  ;;  %2887 = vlog2.f32 %v895_v16  ;;  %v3826_v19 = vsub.f32 0.0, %v3796_v23  ;;  %v1046_v4 = vadd.f32 1.0, %v3673_v54 }
 0x130   : > { %v3820_v56 = vpop.eup %2871  ;;  %2889 = vrcp.f32 %v415_v53  ;;  %v3832_v1 = vsub.f32 0.0, %v3804_v34  ;;  %v871_v32 = vmul.f32 -0.5, %v3635_v31  ;;  %v1031_v16 = vmul.f32 -0.5, %v3661_v47 }
 0x131   : > { %5710 = vst [vmem:[#allocation28_spill] sm:$0xff] %v3820_v56  ;;  %v3829_v57 = vpop.eup %2873  ;;  %2891 = vlog2.f32 %v1055_v46  ;;  %v5712_v22 = vmax.f32 %v3790_v15, 1e-15  ;;  %v881_v14 = vadd.f32 1.0, %v880_v9  ;;  %v949_v53 = vadd.f32 1.0, %v3732_v50 }
 0x132   : > { %5711 = vst [vmem:[#allocation29_spill] sm:$0xff] %v3829_v57  ;;  %v1041_v11 = vadd.f32 1.0, %v1040_v44  ;;  %v1109_v28 = vadd.f32 1.0, %v3767_v27  ;;  %2893 = vlog2.f32 %v886_v49  ;;  %v940_v46 = vadd.f32 1.0, %v3779_v51 }
 0x133   : > { %v3838_v20 = vclamps-f32 %v5712_v22, 0.9999999  ;;  %v2876_v12 = vpop.eup %2875  ;;  %v898_v22 = vmul.f32 -0.5, %v3663_v48  ;;  %2895 = vlog2.f32 %v1046_v4  ;;  %v872_v9 = vadd.f32 1.0, %v871_v32 }
 0x134   : > { %v2878_v7 = vpop.eup %2877  ;;  %v1032_v6 = vadd.f32 1.0, %v1031_v16  ;;  %v1100_v3 = vadd.f32 1.0, %v3802_v30  ;;  %v3853_v0 = vmul.f32 0.6931472, %v2876_v12  ;;  %v3856_v49 = vmul.f32 %v3651_v42, %v881_v14 }
 0x135   : > { %v3847_v58 = vpop.eup %2879  ;;  %2897 = vlog2.f32 %v949_v53  ;;  %v1058_v61 = vmul.f32 -0.5, %v3690_v2  ;;  %vm3859_vm1 = vcmp.lt.f32.partialorder %v883_v13, 0.0004427343  ;;  %v3863_v32 = vmul.f32 0.6931472, %v2878_v7 }
 0x136   : > { %5713 = vst [vmem:[#allocation30_spill] sm:$0xff] %v3847_v58  ;;  %v3851_v44 = vpop.eup %2881  ;;  %v3866_v16 = vmul.f32 %v1041_v11, %v3676_v55  ;;  %2899 = vlog2.f32 %v1109_v28  ;;  %vm3868_vm2 = vcmp.lt.f32.partialorder %v1043_v5, 0.0004427343  ;;  %v1034_v14 = vand.u32 2147483647, %v3661_v47 }
 0x137   : > { %5714 = vst [vmem:[#allocation31_spill] sm:$0xff] %v3851_v44  ;;  %v2884_v62 = vpop.eup %2883  ;;  %2901 = vlog2.f32 %v940_v46  ;;  %v899_v42 = vadd.f32 1.0, %v898_v22  ;;  %v3874_v13 = vmul.f32 %v3635_v31, %v872_v9  ;;  %v901_v7 = vand.u32 2147483647, %v3663_v48 }
 0x138   : > { %v2886_v44 = vpop.eup %2885  ;;  %2903 = vlog2.f32 %v1100_v3  ;;  %v889_v11 = vmul.f32 -0.5, %v3649_v40  ;;  %v3884_v28 = vmul.f32 0.6931472, %v2884_v62  ;;  %v3887_v46 = vmul.f32 %v1032_v6, %v3661_v47 }
 0x139   : > { %v2888_v53 = vpop.eup %2887  ;;  %v1059_v22 = vadd.f32 1.0, %v1058_v61  ;;  %v1045_v3 = vsel %vm3868_vm2, %v3866_v16, %v3863_v32  ;;  %vm3893_vm3 = vcmp.lt.f32.partialorder %v874_v18, 0.0004427343  ;;  %v1061_v5 = vand.u32 2147483647, %v3690_v2 }
 0x13a   : > { %v3878_v55 = vpop.eup %2889  ;;  %vm3900_vm4 = vcmp.lt.f32.partialorder %v1034_v14, 0.0004427343  ;;  %v952_v61 = vmul.f32 -0.5, %v3732_v50  ;;  %v3905_v6 = vmul.f32 0.6931472, %v2888_v53  ;;  %v3908_v47 = vmul.f32 %v3663_v48, %v899_v42 }
 0x13b   : > { %5719 = vst [vmem:[#allocation32_spill] sm:$0xff] %v3878_v55  ;;  %v2892_v31 = vpop.eup %2891  ;;  %v3897_v55 = vmul.f32 0.6931472, %v2886_v44  ;;  %v1112_v18 = vmul.f32 -0.5, %v3767_v27  ;;  %vm3911_vm5 = vcmp.lt.f32.partialorder %v901_v7, 0.0004427343  ;;  %v1060_v35 = vmul.f32 %v1059_v22, %v3690_v2 }
 0x13c   : > { %v2894_v32 = vpop.eup %2893  ;;  %v890_v44 = vadd.f32 1.0, %v889_v11  ;;  %v892_v12 = vand.u32 2147483647, %v3649_v40  ;;  %v943_v60 = vmul.f32 -0.5, %v3779_v51  ;;  %v1103_v52 = vmul.f32 -0.5, %v3802_v30 }
 0x13d   : > { %v2896_v14 = vpop.eup %2895  ;;  %v1057_v53 = vmul.f32 0.6931472, %v2892_v31  ;;  %v876_v48 = vsel %vm3893_vm3, %v3874_v13, %v3884_v28  ;;  %v1036_v42 = vsel %vm3900_vm4, %v3887_v46, %v3897_v55  ;;  %vm3927_vm6 = vcmp.lt.f32.partialorder %v1061_v5, 0.0004427343 }
 0x13e   : > { %v1049_v11 = vmul.f32 -0.5, %v3673_v54  ;;  %v953_v31 = vadd.f32 1.0, %v952_v61  ;;  %v955_v2 = vand.u32 2147483647, %v3732_v50  ;;  %v903_v13 = vsel %vm3911_vm5, %v3908_v47, %v3905_v6 }
 0x13f   : > { %v2898_v58 = vpop.eup %2897  ;;  %v888_v28 = vmul.f32 0.6931472, %v2894_v32  ;;  %v1113_v9 = vadd.f32 1.0, %v1112_v18  ;;  %v1115_v55 = vand.u32 2147483647, %v3767_v27  ;;  %v891_v5 = vmul.f32 %v3649_v40, %v890_v44 }
 0x140   : > { %v2900_v22 = vpop.eup %2899  ;;  %v1048_v46 = vmul.f32 0.6931472, %v2896_v14  ;;  %v944_v57 = vadd.f32 1.0, %v943_v60  ;;  %v1104_v38 = vadd.f32 1.0, %v1103_v52  ;;  %v1063_v61 = vsel %vm3927_vm6, %v1060_v35, %v1057_v53 }
 0x141   : > { %v2902_v62 = vpop.eup %2901  ;;  %v967_v8 = vadd.f32 1.0, %v3784_v63  ;;  %v946_v16 = vand.u32 2147483647, %v3779_v51  ;;  %v1106_v6 = vand.u32 2147483647, %v3802_v30  ;;  %v1050_v47 = vadd.f32 1.0, %v1049_v11 }
 0x142   : > { %v2904_v56 = vpop.eup %2903  ;;  %v1127_v32 = vadd.f32 1.0, %v3810_v37  ;;  %v951_v18 = vmul.f32 0.6931472, %v2898_v58  ;;  %v954_v40 = vmul.f32 %v3732_v50, %v953_v31  ;;  %vm3946_vm7 = vcmp.lt.f32.partialorder %v955_v2, 0.0004427343 }
 0x143   : > { %v1052_v60 = vand.u32 2147483647, %v3673_v54  ;;  %v1111_v52 = vmul.f32 0.6931472, %v2900_v22  ;;  %v1114_v35 = vmul.f32 %v1113_v9, %v3767_v27  ;;  %vm3952_vm8 = vcmp.lt.f32.partialorder %v1115_v55, 0.0004427343 }
 0x144   : > { %v942_v53 = vmul.f32 0.6931472, %v2902_v62  ;;  %v945_v7 = vmul.f32 %v3779_v51, %v944_v57  ;;  %v1102_v11 = vmul.f32 0.6931472, %v2904_v56  ;;  %v1105_v58 = vmul.f32 %v1104_v38, %v3802_v30 }
 0x145   : > { %2905 = vlog2.f32 %v967_v8  ;;  %vm3958_vm9 = vcmp.lt.f32.partialorder %v946_v16, 0.0004427343  ;;  %vm3962_vm10 = vcmp.lt.f32.partialorder %v1106_v6, 0.0004427343  ;;  %v1051_v27 = vmul.f32 %v1050_v47, %v3673_v54 }
 0x146   : > { %2907 = vlog2.f32 %v1127_v32  ;;  %v5736_v2 = vmax.f32 %v3790_v15, 1e-15  ;;  %v5737_v51 = vmax.f32 %v3816_v29, 1e-15  ;;  %vm3973_vm11 = vcmp.lt.f32.partialorder %v892_v12, 0.0004427343 }
 0x147   : > { %vm3977_vm12 = vcmp.lt.f32.partialorder %v1052_v60, 0.0004427343  ;;  %v5742_v54 = vsel %vm3859_vm1, %v3856_v49, %v3853_v0  ;;  %v957_v15 = vsel %vm3946_vm7, %v954_v40, %v951_v18  ;;  %v1117_v56 = vsel %vm3952_vm8, %v1114_v35, %v1111_v52 }
 0x148   : > { %2909 = vrcp.f32 %v5736_v2  ;;  %v3971_v57 = vclamps-f32 %v5737_v51, 0.9999999  ;;  %v1173_v30 = vsub.f32 %v5742_v54, %v1045_v3  ;;  %v970_v12 = vmul.f32 -0.5, %v3784_v63 }
 0x149   : > { %v1172_v22 = vsub.f32 %v876_v48, %v1036_v42  ;;  %v948_v9 = vsel %vm3958_vm9, %v945_v7, %v942_v53  ;;  %v1108_v55 = vsel %vm3962_vm10, %v1105_v58, %v1102_v11  ;;  %v1175_v4 = vsub.f32 %v903_v13, %v1063_v61 }
 0x14a   : > { %v894_v0 = vsel %vm3973_vm11, %v891_v5, %v888_v28  ;;  %v1054_v49 = vsel %vm3977_vm12, %v1051_v27, %v1048_v46  ;;  %v1130_v3 = vmul.f32 -0.5, %v3810_v37  ;;  %v958_v62 = vadd.f32 1.0, %v3794_v17 }
 0x14b   : > { %v4002_v16 = vsub.f32 0.0, %v3838_v20  ;;  %v1181_v48 = vsub.f32 %v957_v15, %v1117_v56  ;;  %v973_v42 = vand.u32 2147483647, %v3784_v63  ;;  %v1118_v6 = vadd.f32 1.0, %v3823_v21 }
 0x14c   : > { %v5743_v13 = vmov %v5737_v51  ;;  %v4009_v28 = vsub.f32 0.0, %v3971_v57  ;;  %v1180_v5 = vsub.f32 %v948_v9, %v1108_v55  ;;  %v971_v46 = vadd.f32 1.0, %v970_v12 }
 0x14d   : > { %2911 = vrcp.f32 %v5743_v13  ;;  %v4011_v61 = vmul.f32 0.5, %v1173_v30  ;;  %v4013_v47 = vmul.f32 0.5, %v1172_v22  ;;  %v4015_v32 = vmul.f32 0.5, %v1175_v4 }
 0x14e   : > { %v1174_v18 = vsub.f32 %v894_v0, %v1054_v49  ;;  %v1131_v40 = vadd.f32 1.0, %v1130_v3  ;;  %2913 = vlog2.f32 %v958_v62  ;;  %v961_v44 = vmul.f32 -0.5, %v3794_v17 }
 0x14f   : > { %v913_v60 = vadd.f32 1.0, %v3680_v59  ;;  %v2906_v29 = vpop.eup %2905  ;;  %v4019_v52 = vmul.f32 0.5, %v1181_v48  ;;  %vm4021_vm13 = vcmp.lt.f32.partialorder %v973_v42, 0.0004427343  ;;  %2915 = vlog2.f32 %v1118_v6 }
 0x150   : > { %v1073_v14 = vadd.f32 1.0, %v3701_v24  ;;  %v2908_v53 = vpop.eup %2907  ;;  %v4026_v7 = vmul.f32 0.5, %v1180_v5  ;;  %v972_v11 = vmul.f32 %v3784_v63, %v971_v46  ;;  %v1133_v58 = vand.u32 2147483647, %v3810_v37 }
 0x151   : > { %v904_v50 = vadd.f32 1.0, %v3682_v36  ;;  %v4033_v27 = vmul.f32 0.5, %v1174_v18  ;;  %v964_v2 = vand.u32 2147483647, %v3794_v17  ;;  %v1121_v51 = vmul.f32 -0.5, %v3823_v21 }
 0x152   : > { %v4031_v31 = vpop.eup %2909  ;;  %v1064_v38 = vadd.f32 1.0, %v3704_v41  ;;  %v1132_v8 = vmul.f32 %v1131_v40, %v3810_v37  ;;  %v962_v54 = vadd.f32 1.0, %v961_v44  ;;  %2917 = vlog2.f32 %v913_v60 }
 0x153   : > { %v916_v63 = vmul.f32 -0.5, %v3680_v59  ;;  %v969_v30 = vmul.f32 0.6931472, %v2906_v29  ;;  %v1129_v15 = vmul.f32 0.6931472, %v2908_v53  ;;  %2919 = vlog2.f32 %v1073_v14 }
 0x154   : > { %v1076_v56 = vmul.f32 -0.5, %v3701_v24  ;;  %vm4041_vm14 = vcmp.lt.f32.partialorder %v1133_v58, 0.0004427343  ;;  %v1124_v22 = vand.u32 2147483647, %v3823_v21  ;;  %2921 = vlog2.f32 %v904_v50 }
 0x155   : > { %v907_v9 = vmul.f32 -0.5, %v3682_v36  ;;  %vm4047_vm15 = vcmp.lt.f32.partialorder %v964_v2, 0.0004427343  ;;  %v1122_v55 = vadd.f32 1.0, %v1121_v51  ;;  %v919_v4 = vand.u32 2147483647, %v3680_v59 }
 0x156   : > { %2923 = vlog2.f32 %v1064_v38  ;;  %v963_v49 = vmul.f32 %v3794_v17, %v962_v54  ;;  %v917_v3 = vadd.f32 1.0, %v916_v63  ;;  %v1079_v62 = vand.u32 2147483647, %v3701_v24 }
 0x157   : > { %v4052_v0 = vpop.eup %2911  ;;  %v985_v48 = vadd.f32 1.0, %v3796_v23  ;;  %v975_v42 = vsel %vm4021_vm13, %v972_v11, %v969_v30  ;;  %v1135_v6 = vsel %vm4041_vm14, %v1132_v8, %v1129_v15  ;;  %v1077_v13 = vadd.f32 1.0, %v1076_v56 }
 0x158   : > { %v1067_v5 = vmul.f32 -0.5, %v3704_v41  ;;  %v2914_v46 = vpop.eup %2913  ;;  %vm4062_vm0 = vcmp.lt.f32.partialorder %v1124_v22, 0.0004427343  ;;  %v908_v17 = vadd.f32 1.0, %v907_v9  ;;  %v910_v40 = vand.u32 2147483647, %v3682_v36 }
 0x159   : > { %v1145_v44 = vadd.f32 1.0, %v3826_v19  ;;  %v2916_v60 = vpop.eup %2915  ;;  %v1123_v29 = vmul.f32 %v1122_v55, %v3823_v21  ;;  %vm4069_vm1 = vcmp.lt.f32.partialorder %v919_v4, 0.0004427343  ;;  %v1070_v14 = vand.u32 2147483647, %v3704_v41 }
 0x15a   : > { %v976_v53 = vadd.f32 1.0, %v3804_v34  ;;  %v1183_v11 = vsub.f32 %v975_v42, %v1135_v6  ;;  %v4076_v58 = vmul.f32 %v3680_v59, %v917_v3  ;;  %2925 = vlog2.f32 %v985_v48 }
 0x15b   : > { %v1136_v50 = vadd.f32 1.0, %v3832_v1  ;;  %v960_v2 = vmul.f32 0.6931472, %v2914_v46  ;;  %v4080_v51 = vmul.f32 %v1077_v13, %v3701_v24  ;;  %vm4082_vm2 = vcmp.lt.f32.partialorder %v1079_v62, 0.0004427343 }
 0x15c   : > { %v1068_v38 = vadd.f32 1.0, %v1067_v5  ;;  %v2918_v8 = vpop.eup %2917  ;;  %v1120_v54 = vmul.f32 0.6931472, %v2916_v60  ;;  %v4087_v63 = vmul.f32 %v3682_v36, %v908_v17  ;;  %vm4089_vm3 = vcmp.lt.f32.partialorder %v910_v40, 0.0004427343 }
 0x15d   : > { %2927 = vlog2.f32 %v1145_v44  ;;  %v2920_v30 = vpop.eup %2919  ;;  %vm4093_vm4 = vcmp.lt.f32.partialorder %v1070_v14, 0.0004427343  ;;  %v988_v24 = vmul.f32 -0.5, %v3796_v23  ;;  %v931_v56 = vadd.f32 1.0, %v3720_v39 }
 0x15e   : > { %2929 = vlog2.f32 %v976_v53  ;;  %v2922_v12 = vpop.eup %2921  ;;  %v4099_v22 = vmul.f32 0.5, %v1183_v11  ;;  %v1148_v36 = vmul.f32 -0.5, %v3826_v19  ;;  %v1091_v9 = vadd.f32 1.0, %v3748_v45 }
 0x15f   : > { %2931 = vlog2.f32 %v1136_v50  ;;  %v966_v4 = vsel %vm4047_vm15, %v963_v49, %v960_v2  ;;  %v4106_v3 = vmul.f32 %v1068_v38, %v3704_v41  ;;  %v934_v62 = vmul.f32 -0.5, %v3720_v39 }
 0x160   : > { %v2924_v55 = vpop.eup %2923  ;;  %v937_v48 = vand.u32 2147483647, %v3720_v39  ;;  %v1126_v42 = vsel %vm4062_vm0, %v1123_v29, %v1120_v54  ;;  %v4112_v6 = vmul.f32 0.6931472, %v2918_v8  ;;  %v4114_v13 = vmul.f32 0.6931472, %v2920_v30 }
 0x161   : > { %v979_v5 = vmul.f32 -0.5, %v3804_v34  ;;  %v4117_v46 = vmul.f32 0.6931472, %v2922_v12  ;;  %v989_v37 = vadd.f32 1.0, %v988_v24  ;;  %2933 = vlog2.f32 %v931_v56 }
 0x162   : > { %v1094_v41 = vmul.f32 -0.5, %v3748_v45  ;;  %v4120_v49 = vmul.f32 0.6931472, %v2924_v55  ;;  %v991_v17 = vand.u32 2147483647, %v3796_v23  ;;  %v1149_v40 = vadd.f32 1.0, %v1148_v36 }
 0x163   : > { %2935 = vlog2.f32 %v1091_v9  ;;  %v4123_v18 = vsub.f32 %v966_v4, %v1126_v42  ;;  %v1151_v44 = vand.u32 2147483647, %v3826_v19  ;;  %v1139_v60 = vmul.f32 -0.5, %v3832_v1 }
 0x164   : > { %v935_v29 = vadd.f32 1.0, %v934_v62  ;;  %v2926_v14 = vpop.eup %2925  ;;  %v921_v53 = vsel %vm4069_vm1, %v4076_v58, %v4112_v6  ;;  %v1081_v11 = vsel %vm4082_vm2, %v4080_v51, %v4114_v13  ;;  %v980_v50 = vadd.f32 1.0, %v979_v5 }
 0x165   : > { %v922_v2 = vadd.f32 1.0, %v3707_v25  ;;  %v912_v38 = vsel %vm4089_vm3, %v4087_v63, %v4117_v46  ;;  %v990_v8 = vmul.f32 %v3796_v23, %v989_v37  ;;  %v982_v54 = vand.u32 2147483647, %v3804_v34 }
 0x166   : > { %v1082_v35 = vadd.f32 1.0, %v3751_v10  ;;  %v1072_v51 = vsel %vm4093_vm4, %v4106_v3, %v4120_v49  ;;  %vm4147_vm5 = vcmp.lt.f32.partialorder %v991_v17, 0.0004427343  ;;  %v1150_v30 = vmul.f32 %v1149_v40, %v3826_v19 }
 0x167   : > { %v2928_v58 = vpop.eup %2927  ;;  %v1003_v63 = vadd.f32 1.0, %v3838_v20  ;;  %v987_v23 = vmul.f32 0.6931472, %v2926_v14  ;;  %vm4153_vm6 = vcmp.lt.f32.partialorder %v1151_v44, 0.0004427343  ;;  %v1140_v56 = vadd.f32 1.0, %v1139_v60 }
 0x168   : > { %v2930_v59 = vpop.eup %2929  ;;  %v1163_v12 = vadd.f32 1.0, %v4002_v16  ;;  %v981_v15 = vmul.f32 %v3804_v34, %v980_v50  ;;  %v1142_v9 = vand.u32 2147483647, %v3832_v1  ;;  %2937 = vlog2.f32 %v922_v2 }
 0x169   : > { %v2932_v36 = vpop.eup %2931  ;;  %v994_v55 = vadd.f32 1.0, %v3971_v57  ;;  %v1147_v19 = vmul.f32 0.6931472, %v2928_v58  ;;  %vm4161_vm7 = vcmp.lt.f32.partialorder %v982_v54, 0.0004427343  ;;  %2939 = vlog2.f32 %v1082_v35 }
 0x16a   : > { %v1154_v3 = vadd.f32 1.0, %v4009_v28  ;;  %v978_v62 = vmul.f32 0.6931472, %v2930_v59  ;;  %v936_v42 = vmul.f32 %v3720_v39, %v935_v29  ;;  %v1095_v6 = vadd.f32 1.0, %v1094_v41 }
 0x16b   : > { %2941 = vlog2.f32 %v1003_v63  ;;  %v2934_v13 = vpop.eup %2933  ;;  %v1138_v34 = vmul.f32 0.6931472, %v2932_v36  ;;  %v1141_v5 = vmul.f32 %v1140_v56, %v3832_v1  ;;  %vm4168_vm8 = vcmp.lt.f32.partialorder %v937_v48, 0.0004427343 }
 0x16c   : > { %2943 = vlog2.f32 %v1163_v12  ;;  %v993_v49 = vsel %vm4147_vm5, %v990_v8, %v987_v23  ;;  %vm4174_vm9 = vcmp.lt.f32.partialorder %v1142_v9, 0.0004427343  ;;  %v1097_v39 = vand.u32 2147483647, %v3748_v45 }
 0x16d   : > { %v2936_v37 = vpop.eup %2935  ;;  %2945 = vlog2.f32 %v994_v55  ;;  %v1153_v41 = vsel %vm4153_vm6, %v1150_v30, %v1147_v19  ;;  %v925_v1 = vmul.f32 -0.5, %v3707_v25  ;;  %v1085_v48 = vmul.f32 -0.5, %v3751_v10 }
 0x16e   : > { %2947 = vlog2.f32 %v1154_v3  ;;  %v984_v40 = vsel %vm4161_vm7, %v981_v15, %v978_v62  ;;  %v933_v44 = vmul.f32 0.6931472, %v2934_v13  ;;  %v1096_v60 = vmul.f32 %v1095_v6, %v3748_v45 }
 0x16f   : > { %v928_v29 = vand.u32 2147483647, %v3707_v25  ;;  %v1144_v14 = vsel %vm4174_vm9, %v1141_v5, %v1138_v34  ;;  %v1093_v50 = vmul.f32 0.6931472, %v2936_v37  ;;  %v1006_v2 = vmul.f32 -0.5, %v3838_v20 }
 0x170   : > { %v1166_v8 = vmul.f32 -0.5, %v4002_v16  ;;  %v1177_v54 = vsub.f32 %v921_v53, %v1081_v11  ;;  %v1176_v35 = vsub.f32 %v912_v38, %v1072_v51  ;;  %vm4191_vm10 = vcmp.lt.f32.partialorder %v1097_v39, 0.0004427343 }
 0x171   : > { %v997_v21 = vmul.f32 -0.5, %v3971_v57  ;;  %v1185_v30 = vsub.f32 %v993_v49, %v1153_v41  ;;  %v926_v45 = vadd.f32 1.0, %v925_v1  ;;  %v1086_v63 = vadd.f32 1.0, %v1085_v48 }
 0x172   : > { %v1088_v59 = vand.u32 2147483647, %v3751_v10  ;;  %v2938_v23 = vpop.eup %2937  ;;  %v1184_v56 = vsub.f32 %v984_v40, %v1144_v14  ;;  %v939_v12 = vsel %vm4168_vm8, %v936_v42, %v933_v44  ;;  %vm4201_vm11 = vcmp.lt.f32.partialorder %v928_v29, 0.0004427343 }
 0x173   : > { %v1157_v11 = vmul.f32 -0.5, %v4009_v28  ;;  %v2940_v38 = vpop.eup %2939  ;;  %v1099_v36 = vsel %vm4191_vm10, %v1096_v60, %v1093_v50  ;;  %v1007_v15 = vadd.f32 1.0, %v1006_v2  ;;  %v1167_v9 = vadd.f32 1.0, %v1166_v8 }
 0x174   : > { %v1009_v19 = vand.u32 2147483647, %v3838_v20  ;;  %v1169_v4 = vand.u32 2147483647, %v4002_v16  ;;  %v998_v3 = vadd.f32 1.0, %v997_v21  ;;  %v927_v6 = vmul.f32 %v3707_v25, %v926_v45 }
 0x175   : > { %v2942_v55 = vpop.eup %2941  ;;  %v924_v42 = vmul.f32 0.6931472, %v2938_v23  ;;  %v1087_v13 = vmul.f32 %v1086_v63, %v3751_v10  ;;  %vm4216_vm12 = vcmp.lt.f32.partialorder %v1088_v59, 0.0004427343  ;;  %v1179_v37 = vsub.f32 %v939_v12, %v1099_v36 }
 0x176   : > { %v2944_v62 = vpop.eup %2943  ;;  %v1084_v49 = vmul.f32 0.6931472, %v2940_v38  ;;  %v1000_v17 = vand.u32 2147483647, %v3971_v57  ;;  %v1158_v39 = vadd.f32 1.0, %v1157_v11  ;;  %v1008_v25 = vmul.f32 %v3838_v20, %v1007_v15 }
 0x177   : > { %v2946_v5 = vpop.eup %2945  ;;  %v1168_v10 = vmul.f32 %v1167_v9, %v4002_v16  ;;  %v1160_v48 = vand.u32 2147483647, %v4009_v28  ;;  %vm4230_vm13 = vcmp.lt.f32.partialorder %v1009_v19, 0.0004427343  ;;  %vm4234_vm14 = vcmp.lt.f32.partialorder %v1169_v4, 0.0004427343 }
 0x178   : > { %v2948_v41 = vpop.eup %2947  ;;  %v999_v60 = vmul.f32 %v3971_v57, %v998_v3  ;;  %v930_v29 = vsel %vm4201_vm11, %v927_v6, %v924_v42  ;;  %v1005_v20 = vmul.f32 0.6931472, %v2942_v55  ;;  %v1165_v14 = vmul.f32 0.6931472, %v2944_v62 }
 0x179   : > { %v996_v16 = vmul.f32 0.6931472, %v2946_v5  ;;  %v1090_v2 = vsel %vm4216_vm12, %v1087_v13, %v1084_v49  ;;  %vm4245_vm15 = vcmp.lt.f32.partialorder %v1000_v17, 0.0004427343  ;;  %v1156_v58 = vmul.f32 0.6931472, %v2948_v41 }
 0x17a   : > { %v1159_v21 = vmul.f32 %v1158_v39, %v4009_v28  ;;  %v4254_v45 = vmul.f32 0.5, %v4123_v18  ;;  %v4256_v63 = vmul.f32 0.5, %v1177_v54  ;;  %vm4258_vm0 = vcmp.lt.f32.partialorder %v1160_v48, 0.0004427343 }
 0x17b   : > { %v4262_v23 = vmul.f32 0.5, %v1176_v35  ;;  %v4264_v12 = vmul.f32 0.5, %v1185_v30  ;;  %v4266_v53 = vmul.f32 0.5, %v1184_v56  ;;  %v4268_v28 = vmul.f32 0.5, %v1179_v37 }
 0x17c   : > { %v1178_v38 = vsub.f32 %v930_v29, %v1090_v2  ;;  %v1011_v18 = vsel %vm4230_vm13, %v1008_v25, %v1005_v20  ;;  %v1171_v54 = vsel %vm4234_vm14, %v1168_v10, %v1165_v14  ;;  %v1002_v36 = vsel %vm4245_vm15, %v999_v60, %v996_v16 }
 0x17d   : > { %v1162_v56 = vsel %vm4258_vm0, %v1159_v21, %v1156_v58  ;;  %v4309_v39 = vsub.f32 %v1011_v18, %v1171_v54 }
 0x17e   : > { %v4299_v13 = vmul.f32 0.5, %v1178_v38  ;;  %v4316_v48 = vsub.f32 %v1002_v36, %v1162_v56 }
 0x18d   : > { %v4197_v24 = vpop.xlane.xlu1 %630 }
 0x18e   : > { %2949 = vrsqrt.f32 %v4197_v24  ;;  %v4207_v51 = vpop.xlane.xlu0 %628  ;;  %vm669_vm1 = vcmp.eq.f32.partialorder %v4197_v24, inf  ;;  %v672_v9 = vand.u32 2147483648, %v4197_v24  ;;  %vm671_vm2 = vcmp.eq.f32.partialorder %v4197_v24, 0.0 }
 0x18f   : > { %2951 = vrsqrt.f32 %v4207_v51  ;;  %vm662_vm3 = vcmp.eq.f32.partialorder %v4207_v51, inf  ;;  %v665_v3 = vand.u32 2147483648, %v4207_v51  ;;  %vm664_vm4 = vcmp.eq.f32.partialorder %v4207_v51, 0.0 }
 0x191   : > { %v4220_v46 = vpop.xlane.xlu1 %646 }
 0x192   : > { %2953 = vrsqrt.f32 %v4220_v46  ;;  %v4224_v1 = vpop.xlane.xlu0 %644  ;;  %vm725_vm5 = vcmp.eq.f32.partialorder %v4220_v46, inf  ;;  %v728_v41 = vand.u32 2147483648, %v4220_v46  ;;  %vm727_vm7 = vcmp.eq.f32.partialorder %v4220_v46, 0.0 }
 0x193   : > { %2955 = vrsqrt.f32 %v4224_v1  ;;  %vm718_vm6 = vcmp.eq.f32.partialorder %v4224_v1, inf  ;;  %v721_v44 = vand.u32 2147483648, %v4224_v1  ;;  %vm720_vm9 = vcmp.eq.f32.partialorder %v4224_v1, 0.0 }
 0x195   : > { %v4241_v50 = vpop.xlane.xlu1 %634 }
 0x196   : > { %2957 = vrsqrt.f32 %v4241_v50  ;;  %v4251_v57 = vpop.xlane.xlu0 %632  ;;  %vm683_vm8 = vcmp.eq.f32.partialorder %v4241_v50, inf  ;;  %v686_v2 = vand.u32 2147483648, %v4241_v50  ;;  %vm685_vm11 = vcmp.eq.f32.partialorder %v4241_v50, 0.0 }
 0x197   : > { %2959 = vrsqrt.f32 %v4251_v57  ;;  %vm676_vm10 = vcmp.eq.f32.partialorder %v4251_v57, inf  ;;  %v679_v38 = vand.u32 2147483648, %v4251_v57  ;;  %vm678_vm13 = vcmp.eq.f32.partialorder %v4251_v57, 0.0 }
 0x198   : > { %v2950_v11 = vpop.eup %2949 }
 0x199   : > { %v2952_v15 = vpop.eup %2951  ;;  %v668_v35 = vmul.f32 %v2950_v11, %v4197_v24  ;;  %v4279_v30 = vpop.xlane.xlu1 %650 }
 0x19a   : > { %v661_v55 = vmul.f32 %v2952_v15, %v4207_v51  ;;  %2961 = vrsqrt.f32 %v4279_v30  ;;  %v4286_v19 = vpop.xlane.xlu0 %648  ;;  %vm739_vm12 = vcmp.eq.f32.partialorder %v4279_v30, inf  ;;  %v742_v54 = vand.u32 2147483648, %v4279_v30 }
 0x19b   : > { %v670_v4 = vsel %vm669_vm1, %v4197_v24, %v668_v35  ;;  %2963 = vrsqrt.f32 %v4286_v19  ;;  %vm732_vm14 = vcmp.eq.f32.partialorder %v4286_v19, inf  ;;  %vm741_vm15 = vcmp.eq.f32.partialorder %v4279_v30, 0.0 }
 0x19c   : > { %v2954_v62 = vpop.eup %2953  ;;  %v663_v42 = vsel %vm662_vm3, %v4207_v51, %v661_v55  ;;  %v4296_v6 = vsel %vm671_vm2, %v672_v9, %v670_v4  ;;  %vm734_vm0 = vcmp.eq.f32.partialorder %v4286_v19, 0.0 }
 0x19d   : > { %v2956_v34 = vpop.eup %2955  ;;  %v724_v5 = vmul.f32 %v2954_v62, %v4220_v46  ;;  %v4302_v37 = vpop.xlane.xlu1 %638  ;;  %v773_v49 = vmax.f32 %v4296_v6, 1e-15  ;;  %v4307_v17 = vsel %vm664_vm4, %v665_v3, %v663_v42  ;;  %v735_v3 = vand.u32 2147483648, %v4286_v19 }
 0x19e   : > { %v717_v25 = vmul.f32 %v2956_v34, %v4224_v1  ;;  %v4314_v10 = vpop.xlane.xlu0 %636  ;;  %2965 = vrsqrt.f32 %v4302_v37  ;;  %v772_v14 = vmax.f32 %v4307_v17, 1e-15  ;;  %vm697_vm1 = vcmp.eq.f32.partialorder %v4302_v37, inf  ;;  %v5784_v17 = vld [vmem:[#allocation28_spill] sm:$0xff] }
 0x19f   : > { %v726_v40 = vsel %vm725_vm5, %v4220_v46, %v724_v5  ;;  %v821_v20 = vmul.f32 %v3727_v43, %v773_v49  ;;  %2967 = vrsqrt.f32 %v4314_v10  ;;  %vm699_vm3 = vcmp.eq.f32.partialorder %v4302_v37, 0.0 }
 0x1a0   : > { %v2958_v60 = vpop.eup %2957  ;;  %v719_v29 = vsel %vm718_vm6, %v4224_v1, %v717_v25  ;;  %v4337_v21 = vsel %vm727_vm7, %v728_v41, %v726_v40  ;;  %v820_v15 = vmul.f32 %v3710_v33, %v772_v14  ;;  %vm690_vm5 = vcmp.eq.f32.partialorder %v4314_v10, inf }
 0x1a1   : > { %v682_v16 = vmul.f32 %v2958_v60, %v4241_v50  ;;  %v4329_v8 = vpop.xlane.xlu1 %654  ;;  %v4341_v43 = vsel %vm720_vm9, %v721_v44, %v719_v29  ;;  %v2960_v59 = vpop.eup %2959  ;;  %v1205_v36 = vmul.f32 %v4011_v61, %v821_v20  ;;  %v781_v9 = vmax.f32 %v4337_v21, 1e-15 }
 0x1a2   : > { %v4333_v58 = vpop.xlane.xlu0 %652  ;;  %2969 = vrsqrt.f32 %v4329_v8  ;;  %v780_v55 = vmax.f32 %v4341_v43, 1e-15  ;;  %v675_v4 = vmul.f32 %v2960_v59, %v4251_v57  ;;  %v1204_v6 = vmul.f32 %v4013_v47, %v820_v15  ;;  %v5785_v59 = vld [vmem:[#allocation23_spill] sm:$0xff] }
 0x1a3   : > { %v684_v11 = vsel %vm683_vm8, %v4241_v50, %v682_v16  ;;  %2971 = vrsqrt.f32 %v4333_v58  ;;  %v829_v34 = vmul.f32 %v3807_v26, %v781_v9  ;;  %v700_v47 = vand.u32 2147483648, %v4302_v37 }
 0x1a4   : > { %v2962_v18 = vpop.eup %2961  ;;  %v4366_v61 = vsel %vm685_vm11, %v686_v2, %v684_v11  ;;  %v828_v41 = vmul.f32 %v5784_v17, %v780_v55  ;;  %v677_v44 = vsel %vm676_vm10, %v4251_v57, %v675_v4  ;;  %v693_v26 = vand.u32 2147483648, %v4314_v10 }
 0x1a5   : > { %v2964_v35 = vpop.eup %2963  ;;  %v4355_v56 = vpop.xlane.xlu1 %642  ;;  %v738_v62 = vmul.f32 %v2962_v18, %v4279_v30  ;;  %v775_v25 = vmax.f32 %v4366_v61, 1e-15  ;;  %v756_v29 = vand.u32 2147483648, %v4329_v8  ;;  %v1213_v16 = vmul.f32 %v4019_v52, %v829_v34 }
 0x1a6   : > { %2973 = vrsqrt.f32 %v4355_v56  ;;  %v4362_v33 = vpop.xlane.xlu0 %640  ;;  %v731_v42 = vmul.f32 %v2964_v35, %v4286_v19  ;;  %v1212_v2 = vmul.f32 %v4026_v7, %v828_v41  ;;  %v680_v18 = vsel %vm678_vm13, %v679_v38, %v677_v44  ;;  %v5787_v41 = vld [vmem:[#allocation29_spill] sm:$0xff] }
 0x1a7   : > { %2975 = vrsqrt.f32 %v4362_v33  ;;  %v823_v11 = vmul.f32 %v5785_v59, %v775_v25  ;;  %vm753_vm6 = vcmp.eq.f32.partialorder %v4329_v8, inf  ;;  %vm746_vm8 = vcmp.eq.f32.partialorder %v4333_v58, inf }
 0x1a8   : > { %2977 = vtanh.f32 %v1205_v36  ;;  %v2966_v40 = vpop.eup %2965  ;;  %v733_v20 = vsel %vm732_vm14, %v4286_v19, %v731_v42  ;;  %v749_v52 = vand.u32 2147483648, %v4333_v58  ;;  %v774_v7 = vmax.f32 %v680_v18, 1e-15  ;;  %v5786_v42 = vld [vmem:[#allocation22_spill] sm:$0xff] }
 0x1a9   : > { %v4376_v5 = vpop.xlane.xlu1 %658  ;;  %2979 = vrcp.f32 %v773_v49  ;;  %v740_v49 = vsel %vm739_vm12, %v4279_v30, %v738_v62  ;;  %v696_v21 = vmul.f32 %v2966_v40, %v4302_v37  ;;  %vm711_vm10 = vcmp.eq.f32.partialorder %v4355_v56, inf }
 0x1aa   : > { %v4387_v60 = vpop.xlane.xlu0 %656  ;;  %2981 = vrcp.f32 %v772_v14  ;;  %v2968_v14 = vpop.eup %2967  ;;  %v743_v15 = vsel %vm741_vm15, %v742_v54, %v740_v49  ;;  %v714_v4 = vand.u32 2147483648, %v4355_v56  ;;  %v1207_v38 = vmul.f32 %v4015_v32, %v823_v11 }
 0x1ab   : > { %2983 = vrsqrt.f32 %v4376_v5  ;;  %v783_v61 = vmax.f32 %v743_v15, 1e-15  ;;  %vm704_vm12 = vcmp.eq.f32.partialorder %v4362_v33, inf  ;;  %v4418_v34 = vsel %vm734_vm0, %v735_v3, %v733_v20 }
 0x1ac   : > { %2985 = vtanh.f32 %v1204_v6  ;;  %v2970_v36 = vpop.eup %2969  ;;  %v822_v6 = vmul.f32 %v5786_v42, %v774_v7  ;;  %v698_v17 = vsel %vm697_vm1, %v4302_v37, %v696_v21  ;;  %v782_v32 = vmax.f32 %v4418_v34, 1e-15 }
 0x1ad   : > { %2987 = vrsqrt.f32 %v4387_v60  ;;  %v2972_v35 = vpop.eup %2971  ;;  %v831_v40 = vmul.f32 %v5787_v41, %v783_v61  ;;  %v689_v49 = vmul.f32 %v2968_v14, %v4314_v10  ;;  %v4440_v43 = vsel %vm699_vm3, %v700_v47, %v698_v17 }
 0x1ae   : > { %2989 = vtanh.f32 %v1213_v16  ;;  %v1206_v3 = vmul.f32 %v4033_v27, %v822_v6  ;;  %v745_v16 = vmul.f32 %v2972_v35, %v4333_v58  ;;  %v707_v18 = vand.u32 2147483648, %v4362_v33 }
 0x1af   : > { %2991 = vtanh.f32 %v1212_v2  ;;  %v1215_v21 = vmul.f32 %v4099_v22, %v831_v40  ;;  %v691_v22 = vsel %vm690_vm5, %v4314_v10, %v689_v49  ;;  %vm767_vm14 = vcmp.eq.f32.partialorder %v4376_v5, inf }
 0x1b0   : > { %v2974_v62 = vpop.eup %2973  ;;  %2993 = vrcp.f32 %v781_v9  ;;  %v752_v9 = vmul.f32 %v2970_v36, %v4329_v8  ;;  %v5788_v36 = vld [vmem:[#allocation30_spill] sm:$0xff]  ;;  %v777_v6 = vmax.f32 %v4440_v43, 1e-15  ;;  %v763_v19 = vand.u32 2147483648, %v4387_v60 }
 0x1b1   : > { %v2976_v54 = vpop.eup %2975  ;;  %2995 = vtanh.f32 %v1207_v38  ;;  %v710_v14 = vmul.f32 %v2974_v62, %v4355_v56  ;;  %v4457_v62 = vsel %vm746_vm8, %v4333_v58, %v745_v16 }
 0x1b2   : > { %v2978_v44 = vpop.eup %2977  ;;  %2997 = vrcp.f32 %v780_v55  ;;  %v703_v55 = vmul.f32 %v2976_v54, %v4362_v33  ;;  %v4452_v47 = vsel %vm753_vm6, %v4329_v8, %v752_v9 }
 0x1b3   : > { %v2980_v20 = vpop.eup %2979  ;;  %v4433_v2 = vsel %vm671_vm2, 0.0, %v2978_v44  ;;  %2999 = vrcp.f32 %v775_v25  ;;  %v830_v25 = vmul.f32 %v5788_v36, %v782_v32  ;;  %v4467_v54 = vsel %vm711_vm10, %v4355_v56, %v710_v14 }
 0x1b4   : > { %v2982_v59 = vpop.eup %2981  ;;  %v1317_v11 = vmax.f32 %v4433_v2, 1e-15  ;;  %3001 = vtanh.f32 %v1206_v3  ;;  %v1253_v35 = vmul.f32 %v2980_v20, %v2978_v44  ;;  %v4474_v44 = vsel %vm704_vm12, %v4362_v33, %v703_v55 }
 0x1b5   : > { %v2984_v27 = vpop.eup %2983  ;;  %3003 = vtanh.f32 %v1215_v21  ;;  %v1214_v41 = vmul.f32 %v4254_v45, %v830_v25  ;;  %vm1301_vm1 = vcmp.gt.f32.partialorder %v4433_v2, 0.996  ;;  %vm713_vm10 = vcmp.eq.f32.partialorder %v4355_v56, 0.0 }
 0x1b6   : > { %v2986_v15 = vpop.eup %2985  ;;  %3005 = vrcp.f32 %v1317_v11  ;;  %v766_v49 = vmul.f32 %v2984_v27, %v4376_v5  ;;  %v1269_v45 = vsel %vm671_vm2, 0.0, %v1253_v35  ;;  %vm692_vm2 = vcmp.eq.f32.partialorder %v4314_v10, 0.0 }
 0x1b7   : > { %v2988_v38 = vpop.eup %2987  ;;  %v4461_v42 = vsel %vm664_vm4, 0.0, %v2986_v15  ;;  %3007 = vrcp.f32 %v774_v7  ;;  %v1252_v21 = vmul.f32 %v2986_v15, %v2982_v59  ;;  %vm760_vm12 = vcmp.eq.f32.partialorder %v4387_v60, inf }
 0x1b8   : > { %v2990_v34 = vpop.eup %2989  ;;  %v1316_v17 = vmax.f32 %v4461_v42, 1e-15  ;;  %3009 = vrcp.f32 %v783_v61  ;;  %v4482_v20 = vmul.f32 %v2988_v38, %v4387_v60  ;;  %v5789_v61 = vld [vmem:[#allocation25_spill] sm:$0xff]  ;;  %v4505_v38 = vsel %vm767_vm14, %v4376_v5, %v766_v49 }
 0x1b9   : > { %v2992_v40 = vpop.eup %2991  ;;  %v4479_v9 = vsel %vm727_vm7, 0.0, %v2990_v34  ;;  %v825_v11 = vmul.f32 %v5789_v61, %v777_v6  ;;  %vm1300_vm5 = vcmp.gt.f32.partialorder %v4461_v42, 0.996  ;;  %vm706_vm14 = vcmp.eq.f32.partialorder %v4362_v33, 0.0 }
 0x1ba   : > { %v2994_v3 = vpop.eup %2993  ;;  %3011 = vrcp.f32 %v1316_v17  ;;  %v1325_v7 = vmax.f32 %v4479_v9, 1e-15  ;;  %v4490_v14 = vsel %vm720_vm9, 0.0, %v2992_v40  ;;  %vm1309_vm6 = vcmp.gt.f32.partialorder %v4479_v9, 0.996 }
 0x1bb   : > { %v2996_v16 = vpop.eup %2995  ;;  %3013 = vtanh.f32 %v1214_v41  ;;  %v1261_v55 = vmul.f32 %v2994_v3, %v2990_v34  ;;  %v1324_v24 = vmax.f32 %v4490_v14, 1e-15  ;;  %v1209_v15 = vmul.f32 %v4256_v63, %v825_v11 }
 0x1bc   : > { %v2998_v27 = vpop.eup %2997  ;;  %3015 = vrcp.f32 %v1325_v7  ;;  %v4499_v59 = vsel %vm685_vm11, 0.0, %v2996_v16  ;;  %v1268_v41 = vsel %vm664_vm4, 0.0, %v1252_v21  ;;  %v4521_v63 = vsel %vm692_vm2, %v693_v26, %v691_v22 }
 0x1bd   : > { %v3000_v36 = vpop.eup %2999  ;;  %v1260_v25 = vmul.f32 %v2998_v27, %v2992_v40  ;;  %3017 = vrcp.f32 %v782_v32  ;;  %v1319_v34 = vmax.f32 %v4499_v59, 1e-15  ;;  %v1277_v7 = vsel %vm727_vm7, 0.0, %v1261_v55  ;;  %v4550_v55 = vld [vmem:[%s5666_s2] ss:$0 sm:$0xff] }
 0x1be   : > { %v3002_v35 = vpop.eup %3001  ;;  %3019 = vrcp.f32 %v1324_v24  ;;  %v1255_v26 = vmul.f32 %v3000_v36, %v2996_v16  ;;  %v776_v11 = vmax.f32 %v4521_v63, 1e-15  ;;  %vm755_vm4 = vcmp.eq.f32.partialorder %v4329_v8, 0.0 }
 0x1bf   : > { %v4509_v17 = vpop.eup %3003  ;;  %v4515_v32 = vsel %vm678_vm13, 0.0, %v3002_v35  ;;  %3021 = vtanh.f32 %v1209_v15  ;;  %v1276_v21 = vsel %vm720_vm9, 0.0, %v1260_v25  ;;  %vm1308_vm8 = vcmp.gt.f32.partialorder %v4490_v14, 0.996  ;;  %v5790_v25 = vld [vmem:[#allocation24_spill] sm:$0xff] }
 0x1c0   : > { %v3006_v40 = vpop.eup %3005  ;;  %3023 = vrcp.f32 %v1319_v34  ;;  %v1318_v49 = vmax.f32 %v4515_v32, 1e-15  ;;  %v4528_v51 = vsel %vm741_vm15, 0.0, %v4509_v17  ;;  %v4545_v1 = vsel %vm755_vm4, %v756_v29, %v4452_v47 }
 0x1c1   : > { %v1349_v3 = vmul.f32 0.996, %v3006_v40  ;;  %v3008_v22 = vpop.eup %3007  ;;  %v1327_v61 = vmax.f32 %v4528_v51, 1e-15  ;;  %vm1303_vm7 = vcmp.gt.f32.partialorder %v4499_v59, 0.996  ;;  %v824_v15 = vmul.f32 %v5790_v25, %v776_v11 }
 0x1c2   : > { %3025 = vrcp.f32 %v1318_v49  ;;  %v3010_v27 = vpop.eup %3009  ;;  %v1254_v46 = vmul.f32 %v3008_v22, %v3002_v35  ;;  %v1271_v29 = vsel %vm685_vm11, 0.0, %v1255_v26  ;;  %v5685_v47 = vmax.f32 %v4545_v1, 1e-15 }
 0x1c3   : > { %v1365_v24 = vsel %vm1301_vm1, %v1349_v3, 1.0  ;;  %3027 = vrcp.f32 %v1327_v61  ;;  %vm1302_vm9 = vcmp.gt.f32.partialorder %v4515_v32, 0.996  ;;  %v1208_v22 = vmul.f32 %v4262_v23, %v824_v15  ;;  %v5792_v61 = vld [vmem:[#allocation31_spill] sm:$0xff] }
 0x1c4   : > { %v3012_v16 = vpop.eup %3011  ;;  %v1381_v36 = vmul.f32 %v1365_v24, %v1269_v45  ;;  %3029 = vrcp.f32 %v777_v6  ;;  %v5791_v45 = vld [vmem:[#allocation6_spill] sm:$0xff]  ;;  %v1270_v26 = vsel %vm678_vm13, 0.0, %v1254_v46  ;;  %v833_v24 = vmul.f32 %v5792_v61, %v5685_v47 }
 0x1c5   : > { %v4556_v35 = vpop.eup %3013  ;;  %v1348_v34 = vmul.f32 0.996, %v3012_v16  ;;  %vm1311_vm11 = vcmp.gt.f32.partialorder %v4528_v51, 0.996  ;;  %3031 = vtanh.f32 %v1208_v22  ;;  %vm748_vm13 = vcmp.eq.f32.partialorder %v4333_v58, 0.0  ;;  %v5807_v58 = vld [vmem:[#allocation17_spill] sm:$0xff] }
 0x1c6   : > { %v3016_v40 = vpop.eup %3015  ;;  %v4564_v49 = vmul.f32 %v5791_v45, %v1381_v36  ;;  %v4570_v3 = vsel %vm734_vm0, 0.0, %v4556_v35  ;;  %v1217_v46 = vmul.f32 %v4264_v12, %v833_v24  ;;  %v5793_v45 = vld [vmem:[#allocation8_spill] sm:$0xff]  ;;  %v5794_v24 = vld [vmem:[#allocation7_spill] sm:$0xff]  ;;  %vm762_vm1 = vcmp.eq.f32.partialorder %v4387_v60, 0.0 }
 0x1c7   : > { %v3018_v50 = vpop.eup %3017  ;;  %v1364_v43 = vsel %vm1300_vm5, %v1348_v34, 1.0  ;;  %v1357_v6 = vmul.f32 0.996, %v3016_v40  ;;  %v1326_v23 = vmax.f32 %v4570_v3, 1e-15 }
 0x1c8   : > { %v3020_v16 = vpop.eup %3019  ;;  %v1451_v36 = vmul.f32 %v4550_v55, %v4564_v49  ;;  %v1380_v25 = vmul.f32 %v1364_v43, %v1268_v41 }
 0x1c9   : > { %v4584_v15 = vpop.eup %3021  ;;  %v1373_v34 = vsel %vm1309_vm6, %v1357_v6, 1.0  ;;  %v1356_v57 = vmul.f32 0.996, %v3020_v16  ;;  %3033 = vrcp.f32 %v1326_v23 }
 0x1ca   : > { %v3024_v40 = vpop.eup %3023  ;;  %1468 = vadd.xlane.f32.xlu1 %v1451_v36  ;;  %v4590_v61 = vmul.f32 %v1380_v25, %v5793_v45  ;;  %v1389_v47 = vmul.f32 %v1373_v34, %v1277_v7  ;;  %v4598_v6 = vsel %vm699_vm3, 0.0, %v4584_v15  ;;  %3035 = vtanh.f32 %v1217_v46 }
 0x1cb   : > { %v1372_v41 = vsel %vm1308_vm8, %v1356_v57, 1.0  ;;  %v1351_v43 = vmul.f32 0.996, %v3024_v40  ;;  %v4610_v36 = vsel %vm748_vm13, %v749_v52, %v4457_v62  ;;  %v1263_v34 = vmul.f32 %v3010_v27, %v4509_v17 }
 0x1cc   : > { %v3026_v12 = vpop.eup %3025  ;;  %v1450_v22 = vmul.f32 %v4550_v55, %v4590_v61  ;;  %v4603_v16 = vmul.f32 %v5794_v24, %v1389_v47  ;;  %v1388_v7 = vmul.f32 %v1372_v41, %v1276_v21  ;;  %v5795_v47 = vld [vmem:[#allocation9_spill] sm:$0xff]  ;;  %v1321_v52 = vmax.f32 %v4598_v6, 1e-15 }
 0x1cd   : > { %v1367_v25 = vsel %vm1303_vm7, %v1351_v43, 1.0  ;;  %v1350_v23 = vmul.f32 0.996, %v3026_v12  ;;  %v3028_v57 = vpop.eup %3027  ;;  %v784_v27 = vmax.f32 %v4610_v36, 1e-15  ;;  %v4631_v41 = vsel %vm713_vm10, %v714_v4, %v4467_v54  ;;  %v5796_v43 = vld [vmem:[#allocation10_spill] sm:$0xff] }
 0x1ce   : > { %1466 = vadd.xlane.f32.xlu0 %v1450_v22  ;;  %v1459_v21 = vmul.f32 %v4550_v55, %v4603_v16  ;;  %v4619_v46 = vmul.f32 %v1388_v7, %v5795_v47  ;;  %v1383_v40 = vmul.f32 %v1367_v25, %v1271_v29  ;;  %v3030_v62 = vpop.eup %3029  ;;  %v1359_v17 = vmul.f32 0.996, %v3028_v57  ;;  %v5797_v25 = vld [vmem:[#allocation32_spill] sm:$0xff] }
 0x1cf   : > { %v1366_v45 = vsel %vm1302_vm9, %v1350_v23, 1.0  ;;  %3037 = vrcp.f32 %v1321_v52  ;;  %v1279_v24 = vsel %vm741_vm15, 0.0, %v1263_v34  ;;  %v832_v4 = vmul.f32 %v5797_v25, %v784_v27  ;;  %v5798_v57 = vld [vmem:[#allocation12_spill] sm:$0xff]  ;;  %v3032_v30 = vpop.eup %3031 }
 0x1d0   : > { %1484 = vadd.xlane.f32.xlu1 %v1459_v21  ;;  %v1458_v29 = vmul.f32 %v4550_v55, %v4619_v46  ;;  %v4636_v12 = vmul.f32 %v5796_v43, %v1383_v40  ;;  %v1382_v22 = vmul.f32 %v1366_v45, %v1270_v26  ;;  %v1375_v7 = vsel %vm1311_vm11, %v1359_v17, 1.0  ;;  %v5799_v40 = vld [vmem:[#allocation27_spill] sm:$0xff] }
 0x1d1   : > { %v779_v54 = vmax.f32 %v4631_v41, 1e-15  ;;  %v1391_v26 = vmul.f32 %v1375_v7, %v1279_v24  ;;  %3039 = vrcp.f32 %v776_v11  ;;  %v1262_v34 = vmul.f32 %v3018_v50, %v4556_v35 }
 0x1d2   : > { %1482 = vadd.xlane.f32.xlu0 %v1458_v29  ;;  %v1453_v23 = vmul.f32 %v4550_v55, %v4636_v12  ;;  %v4649_v21 = vmul.f32 %v1382_v22, %v5798_v57  ;;  %vm1310_vm15 = vcmp.gt.f32.partialorder %v4570_v3, 0.996  ;;  %v1216_v47 = vmul.f32 %v4266_v53, %v832_v4  ;;  %v5800_v29 = vld [vmem:[#allocation11_spill] sm:$0xff] }
 0x1d3   : > { %v827_v52 = vmul.f32 %v5799_v40, %v779_v54  ;;  %v3034_v45 = vpop.eup %3033  ;;  %v4662_v43 = vmul.f32 %v5800_v29, %v1391_v26  ;;  %v4666_v63 = vsel %vm692_vm2, 0.0, %v3032_v30  ;;  %v4675_v50 = vsel %vm706_vm14, %v707_v18, %v4474_v44 }
 0x1d4   : > { %1472 = vadd.xlane.f32.xlu1 %v1453_v23  ;;  %v1452_v17 = vmul.f32 %v4550_v55, %v4649_v21  ;;  %v3036_v11 = vpop.eup %3035  ;;  %v1358_v53 = vmul.f32 0.996, %v3034_v45  ;;  %v1320_v35 = vmax.f32 %v4666_v63, 1e-15  ;;  %3041 = vtanh.f32 %v1216_v47  ;;  %v5802_v47 = vld [vmem:[#allocation13_spill] sm:$0xff] }
 0x1d5   : > { %v1461_v22 = vmul.f32 %v4550_v55, %v4662_v43  ;;  %v5801_v24 = vmax.f32 %v4545_v1, 1e-15  ;;  %v4683_v7 = vsel %vm755_vm4, 0.0, %v3036_v11  ;;  %v1211_v25 = vmul.f32 %v4268_v28, %v827_v52  ;;  %v5803_v52 = vld [vmem:[#allocation26_spill] sm:$0xff] }
 0x1d6   : > { %1470 = vadd.xlane.f32.xlu0 %v1452_v17  ;;  %v1278_v4 = vsel %vm734_vm0, 0.0, %v1262_v34  ;;  %v1374_v18 = vsel %vm1310_vm15, %v1358_v53, 1.0  ;;  %v1329_v44 = vmax.f32 %v4683_v7, 1e-15  ;;  %v761_v1 = vsel %vm760_vm12, %v4387_v60, %v4482_v20 }
 0x1d7   : > { %3043 = vrcp.f32 %v5801_v24  ;;  %v1390_v23 = vmul.f32 %v1374_v18, %v1278_v4  ;;  %v778_v57 = vmax.f32 %v4675_v50, 1e-15  ;;  %v770_v28 = vand.u32 2147483648, %v4376_v5 }
 0x1d8   : > { %3045 = vrcp.f32 %v1320_v35  ;;  %1488 = vadd.xlane.f32.xlu1 %v1461_v22  ;;  %v1257_v26 = vmul.f32 %v3030_v62, %v4584_v15  ;;  %vm769_vm0 = vcmp.eq.f32.partialorder %v4376_v5, 0.0  ;;  %vm1305_vm5 = vcmp.gt.f32.partialorder %v4598_v6, 0.996 }
 0x1d9   : > { %3047 = vtanh.f32 %v1211_v25  ;;  %v3038_v34 = vpop.eup %3037  ;;  %v4700_v40 = vmul.f32 %v1390_v23, %v5802_v47  ;;  %v826_v20 = vmul.f32 %v5803_v52, %v778_v57  ;;  %v4711_v15 = vsel %vm769_vm0, %v770_v28, %v4505_v38  ;;  %v5804_v23 = vld [vmem:[#allocation14_spill] sm:$0xff] }
 0x1da   : > { %3049 = vrcp.f32 %v1329_v44  ;;  %v1353_v45 = vmul.f32 0.996, %v3038_v34  ;;  %v4715_v62 = vsel %vm762_vm1, %v763_v19, %v761_v1  ;;  %v787_v35 = vmax.f32 %v4711_v15, 1e-15 }
 0x1db   : > { %v3040_v17 = vpop.eup %3039  ;;  %v1460_v29 = vmul.f32 %v4550_v55, %v4700_v40  ;;  %v1210_v53 = vmul.f32 %v4299_v13, %v826_v20  ;;  %v786_v22 = vmax.f32 %v4715_v62, 1e-15  ;;  %v1273_v24 = vsel %vm699_vm3, 0.0, %v1257_v26 }
 0x1dc   : > { %v1369_v25 = vsel %vm1305_vm5, %v1353_v45, 1.0  ;;  %v1203_v38 = vmul.f32 0.5, %v4309_v39  ;;  %v835_v18 = vmul.f32 %v4031_v31, %v787_v35  ;;  %v1202_v1 = vmul.f32 0.5, %v4316_v48 }
 0x1dd   : > { %1486 = vadd.xlane.f32.xlu0 %v1460_v29  ;;  %v1385_v4 = vmul.f32 %v1369_v25, %v1273_v24  ;;  %3051 = vtanh.f32 %v1210_v53  ;;  %v834_v44 = vmul.f32 %v4052_v0, %v786_v22  ;;  %v1256_v39 = vmul.f32 %v3040_v17, %v3032_v30  ;;  %v5805_v24 = vld [vmem:[#allocation16_spill] sm:$0xff] }
 0x1de   : > { %v3042_v13 = vpop.eup %3041  ;;  %3053 = vrcp.f32 %v784_v27  ;;  %v1219_v31 = vmul.f32 %v1203_v38, %v835_v18  ;;  %vm1304_vm3 = vcmp.gt.f32.partialorder %v4666_v63, 0.996  ;;  %vm1313_vm6 = vcmp.gt.f32.partialorder %v4683_v7, 0.996 }
 0x1df   : > { %v4733_v28 = vmul.f32 %v5804_v23, %v1385_v4  ;;  %v4737_v19 = vsel %vm748_vm13, 0.0, %v3042_v13  ;;  %v1218_v0 = vmul.f32 %v1202_v1, %v834_v44  ;;  %v1272_v20 = vsel %vm692_vm2, 0.0, %v1256_v39  ;;  %v5806_v44 = vld [vmem:[#allocation15_spill] sm:$0xff] }
 0x1e0   : > { %v1328_v34 = vmax.f32 %v4737_v19, 1e-15  ;;  %3055 = vtanh.f32 %v1219_v31  ;;  %vm1312_vm2 = vcmp.gt.f32.partialorder %v4737_v19, 0.996  ;;  %v1413_v60 = vmin.f32 %v4433_v2, 0.996 }
 0x1e1   : > { %v3044_v37 = vpop.eup %3043  ;;  %v1455_v36 = vmul.f32 %v4550_v55, %v4733_v28  ;;  %v1415_v2 = vmin.f32 %v4499_v59, 0.996 }
 0x1e2   : > { %v3046_v26 = vpop.eup %3045  ;;  %v1265_v48 = vmul.f32 %v3044_v37, %v3036_v11  ;;  %3057 = vrcp.f32 %v1328_v34 }
 0x1e3   : > { %v3048_v47 = vpop.eup %3047  ;;  %v1352_v27 = vmul.f32 0.996, %v3046_v26  ;;  %1476 = vadd.xlane.f32.xlu1 %v1455_v36  ;;  %3059 = vtanh.f32 %v1218_v0 }
 0x1e4   : > { %v3050_v52 = vpop.eup %3049  ;;  %v4745_v30 = vsel %vm713_vm10, 0.0, %v3048_v47  ;;  %3061 = vrcp.f32 %v779_v54  ;;  %v1281_v29 = vsel %vm755_vm4, 0.0, %v1265_v48 }
 0x1e5   : > { %v1368_v45 = vsel %vm1304_vm3, %v1352_v27, 1.0  ;;  %v1361_v15 = vmul.f32 0.996, %v3050_v52  ;;  %v1323_v11 = vmax.f32 %v4745_v30, 1e-15 }
 0x1e6   : > { %v1384_v17 = vmul.f32 %v1368_v45, %v1272_v20  ;;  %vm1307_vm4 = vcmp.gt.f32.partialorder %v4745_v30, 0.996 }
 0x1e7   : > { %v1377_v53 = vsel %vm1313_vm6, %v1361_v15, 1.0  ;;  %3063 = vrcp.f32 %v1323_v11  ;;  %v3052_v38 = vpop.eup %3051 }
 0x1e8   : > { %v4756_v25 = vmul.f32 %v1384_v17, %v5805_v24  ;;  %v1393_v10 = vmul.f32 %v1377_v53, %v1281_v29  ;;  %v3054_v4 = vpop.eup %3053  ;;  %v4765_v41 = vsel %vm706_vm14, 0.0, %v3052_v38  ;;  %3065 = vrcp.f32 %v778_v57  ;;  %v5808_v53 = vld [vmem:[#allocation18_spill] sm:$0xff] }
 0x1e9   : > { %v1322_v8 = vmax.f32 %v4765_v41, 1e-15  ;;  %v1264_v37 = vmul.f32 %v3054_v4, %v3042_v13  ;;  %vm1306_vm8 = vcmp.gt.f32.partialorder %v4765_v41, 0.996 }
 0x1ea   : > { %v1454_v18 = vmul.f32 %v4550_v55, %v4756_v25  ;;  %v4761_v1 = vmul.f32 %v5806_v44, %v1393_v10  ;;  %v3056_v23 = vpop.eup %3055 }
 0x1eb   : > { %3067 = vrcp.f32 %v1322_v8  ;;  %v4774_v31 = vsel %vm769_vm0, 0.0, %v3056_v23  ;;  %v1280_v0 = vsel %vm748_vm13, 0.0, %v1264_v37 }
 0x1ec   : > { %1474 = vadd.xlane.f32.xlu0 %v1454_v18  ;;  %v1463_v54 = vmul.f32 %v4550_v55, %v4761_v1  ;;  %v3058_v39 = vpop.eup %3057  ;;  %3069 = vrcp.f32 %v787_v35  ;;  %v1331_v50 = vmax.f32 %v4774_v31, 1e-15  ;;  %vm1315_vm7 = vcmp.gt.f32.partialorder %v4774_v31, 0.996 }
 0x1ed   : > { %v3060_v26 = vpop.eup %3059  ;;  %v1360_v34 = vmul.f32 0.996, %v3058_v39  ;;  %3071 = vrcp.f32 %v786_v22 }
 0x1ee   : > { %1492 = vadd.xlane.f32.xlu1 %v1463_v54  ;;  %v3062_v57 = vpop.eup %3061  ;;  %v4784_v13 = vsel %vm762_vm1, 0.0, %v3060_v26  ;;  %3073 = vrcp.f32 %v1331_v50 }
 0x1ef   : > { %v1376_v36 = vsel %vm1312_vm2, %v1360_v34, 1.0  ;;  %v1259_v27 = vmul.f32 %v3062_v57, %v3048_v47  ;;  %v1330_v35 = vmax.f32 %v4784_v13, 1e-15  ;;  %v5809_v57 = vld [vmem:[#allocation20_spill] sm:$0xff]  ;;  %vm1314_vm9 = vcmp.gt.f32.partialorder %v4784_v13, 0.996 }
 0x1f0   : > { %v1392_v52 = vmul.f32 %v1376_v36, %v1280_v0 }
 0x1f1   : > { %v3064_v48 = vpop.eup %3063  ;;  %3075 = vrcp.f32 %v1330_v35  ;;  %v1275_v22 = vsel %vm713_vm10, 0.0, %v1259_v27 }
 0x1f2   : > { %v1355_v20 = vmul.f32 0.996, %v3064_v48  ;;  %v4788_v45 = vmul.f32 %v1392_v52, %v5807_v58  ;;  %v3066_v62 = vpop.eup %3065  ;;  %v5810_v52 = vld [vmem:[#allocation19_spill] sm:$0xff] }
 0x1f3   : > { %v1258_v11 = vmul.f32 %v3066_v62, %v3052_v38  ;;  %v5811_v62 = vld [vmem:[#allocation21_spill] sm:$0xff] }
 0x1f4   : > { %v1371_v15 = vsel %vm1307_vm4, %v1355_v20, 1.0  ;;  %v1462_v47 = vmul.f32 %v4550_v55, %v4788_v45 }
 0x1f5   : > { %v1387_v17 = vmul.f32 %v1371_v15, %v1275_v22  ;;  %v3068_v29 = vpop.eup %3067  ;;  %v1274_v44 = vsel %vm706_vm14, 0.0, %v1258_v11  ;;  %v4828_v11 = vstv %s225_s7 }
 0x1f6   : > { %1490 = vadd.xlane.f32.xlu0 %v1462_v47  ;;  %v1354_v10 = vmul.f32 0.996, %v3068_v29  ;;  %v3070_v4 = vpop.eup %3069  ;;  %v1412_v47 = vmin.f32 %v4461_v42, 0.996 }
 0x1f7   : > { %v4796_v24 = vmul.f32 %v5808_v53, %v1387_v17  ;;  %v3072_v18 = vpop.eup %3071  ;;  %v1267_v54 = vmul.f32 %v3070_v4, %v3056_v23  ;;  %v4826_v17 = vmul.f32 %v1413_v60, %v1413_v60 }
 0x1f8   : > { %v1370_v8 = vsel %vm1306_vm8, %v1354_v10, 1.0  ;;  %v3074_v37 = vpop.eup %3073  ;;  %v1266_v34 = vmul.f32 %v3072_v18, %v3060_v26  ;;  %v1421_v10 = vmin.f32 %v4479_v9, 0.996  ;;  %v4831_v4 = vmul.f32 %v1412_v47, %v1412_v47 }
 0x1f9   : > { %v1457_v56 = vmul.f32 %v4550_v55, %v4796_v24  ;;  %v1386_v38 = vmul.f32 %v1370_v8, %v1274_v44  ;;  %v1363_v39 = vmul.f32 0.996, %v3074_v37  ;;  %v1283_v36 = vsel %vm769_vm0, 0.0, %v1267_v54 }
 0x1fa   : > { %v1282_v26 = vsel %vm762_vm1, 0.0, %v1266_v34  ;;  %v1532_v18 = vmul.f32 %v4828_v11, %v4826_v17  ;;  %v1420_v8 = vmin.f32 %v4490_v14, 0.996  ;;  %v4837_v37 = vmul.f32 %v1421_v10, %v1421_v10 }
 0x1fb   : > { %1480 = vadd.xlane.f32.xlu1 %v1457_v56  ;;  %v3076_v50 = vpop.eup %3075  ;;  %v4804_v0 = vmul.f32 %v1386_v38, %v5809_v57  ;;  %v1379_v27 = vsel %vm1315_vm7, %v1363_v39, 1.0  ;;  %v1531_v38 = vmul.f32 %v4828_v11, %v4831_v4  ;;  %v1414_v57 = vmin.f32 %v4515_v32, 0.996 }
 0x1fc   : > { %v1362_v35 = vmul.f32 0.996, %v3076_v50  ;;  %v1395_v23 = vmul.f32 %v1379_v27, %v1283_v36  ;;  %v4842_v36 = vmul.f32 %v1420_v8, %v1420_v8  ;;  %v1540_v59 = vmul.f32 %v4828_v11, %v4837_v37 }
 0x1fd   : > { %v1456_v33 = vmul.f32 %v4550_v55, %v4804_v0  ;;  %v1628_v32 = vsub.f32 1.0, %v4826_v17 }
 0x1fe   : > { %v1378_v48 = vsel %vm1314_vm9, %v1362_v35, 1.0  ;;  %v4815_v20 = vmul.f32 %v5810_v52, %v1395_v23  ;;  %v4844_v35 = vmul.f32 %v1415_v2, %v1415_v2  ;;  %v1422_v2 = vmin.f32 %v4570_v3, 0.996 }
 0x1ff   : > { %1478 = vadd.xlane.f32.xlu0 %v1456_v33  ;;  %v1394_v58 = vmul.f32 %v1378_v48, %v1282_v26  ;;  %v1423_v48 = vmin.f32 %v4528_v51, 0.996 }
 0x200   : > { %v1465_v5 = vmul.f32 %v4550_v55, %v4815_v20  ;;  %v1534_v47 = vmul.f32 %v4828_v11, %v4844_v35 }
 0x201   : > { %v4820_v22 = vmul.f32 %v1394_v58, %v5811_v62  ;;  %v4849_v62 = vmul.f32 %v1414_v57, %v1414_v57  ;;  %v4862_v8 = vmul.f32 %v1423_v48, %v1423_v48  ;;  %v1630_v57 = vsub.f32 1.0, %v4844_v35 }
 0x202   : > { %1496 = vadd.xlane.f32.xlu1 %v1465_v5 }
 0x203   : > { %v1464_v15 = vmul.f32 %v4550_v55, %v4820_v22 }
 0x205   : > { %1494 = vadd.xlane.f32.xlu0 %v1464_v15  ;;  %v1539_v15 = vmul.f32 %v4828_v11, %v4842_v36 }
 0x257   : > { %v1469_v29 = vpop.xlane.xlu1 %1468 }
 0x258   : > { %v1499_v53 = vmul.f32 2.0, %v1469_v29 }
 0x25a   : > { %v1515_v56 = vadd.f32 1.0, %v1499_v53 }
 0x25b   : > { %v1467_v44 = vpop.xlane.xlu0 %1466 }
 0x25c   : > { %v1548_v42 = vadd.f32 %v1532_v18, %v1515_v56  ;;  %v1498_v54 = vmul.f32 2.0, %v1467_v44  ;;  %v1627_v18 = vsub.f32 1.0, %v4831_v4  ;;  %v1596_v3 = vadd.f32 %v4828_v11, %v1515_v56 }
 0x25d   : > { %v1485_v39 = vpop.xlane.xlu1 %1484 }
 0x25e   : > { %v1564_v9 = vmax.f32 %v1548_v42, 1e-15  ;;  %v1514_v34 = vadd.f32 1.0, %v1498_v54  ;;  %v1507_v50 = vmul.f32 2.0, %v1485_v39  ;;  %v1533_v54 = vmul.f32 %v4828_v11, %v4849_v62 }
 0x25f   : > { %v1483_v27 = vpop.xlane.xlu0 %1482  ;;  %v1636_v39 = vsub.f32 1.0, %v4837_v37  ;;  %v1629_v37 = vsub.f32 1.0, %v4849_v62 }
 0x260   : > { %3077 = vrcp.f32 %v1564_v9  ;;  %v1547_v14 = vadd.f32 %v1531_v38, %v1514_v34  ;;  %v1523_v33 = vadd.f32 1.0, %v1507_v50  ;;  %v1506_v23 = vmul.f32 2.0, %v1483_v27 }
 0x261   : > { %v1473_v26 = vpop.xlane.xlu1 %1472  ;;  %v1635_v9 = vsub.f32 1.0, %v4842_v36 }
 0x262   : > { %v1563_v52 = vmax.f32 %v1547_v14, 1e-15  ;;  %v1556_v58 = vadd.f32 %v1540_v59, %v1523_v33  ;;  %v1501_v5 = vmul.f32 2.0, %v1473_v26  ;;  %v4854_v60 = vadd.f32 1.0, %v1506_v23 }
 0x263   : > { %v1471_v29 = vpop.xlane.xlu0 %1470  ;;  %v1417_v59 = vmin.f32 %v4598_v6, 0.996  ;;  %v1542_v23 = vmul.f32 %v4828_v11, %v4862_v8  ;;  %v1416_v6 = vmin.f32 %v4666_v63, 0.996 }
 0x264   : > { %3079 = vrcp.f32 %v1563_v52  ;;  %v1572_v53 = vmax.f32 %v1556_v58, 1e-15  ;;  %v4858_v10 = vadd.f32 1.0, %v1501_v5  ;;  %v1500_v51 = vmul.f32 2.0, %v1471_v29 }
 0x265   : > { %v1555_v44 = vadd.f32 %v1539_v15, %v4854_v60  ;;  %v1489_v17 = vpop.xlane.xlu1 %1488  ;;  %v4878_v58 = vmul.f32 %v1422_v2, %v1422_v2 }
 0x266   : > { %3081 = vrcp.f32 %v1572_v53  ;;  %v1550_v42 = vadd.f32 %v1534_v47, %v4858_v10  ;;  %v1516_v38 = vadd.f32 1.0, %v1500_v51  ;;  %v1509_v4 = vmul.f32 2.0, %v1489_v17 }
 0x267   : > { %v1571_v50 = vmax.f32 %v1555_v44, 1e-15  ;;  %v4882_v53 = vmul.f32 %v1417_v59, %v1417_v59  ;;  %v1425_v51 = vmin.f32 %v4683_v7, 0.996  ;;  %v1595_v44 = vadd.f32 %v4828_v11, %v1514_v34 }
 0x268   : > { %v1566_v27 = vmax.f32 %v1550_v42, 1e-15  ;;  %v1549_v14 = vadd.f32 %v1533_v54, %v1516_v38  ;;  %v4875_v26 = vadd.f32 1.0, %v1509_v4  ;;  %v1638_v4 = vsub.f32 1.0, %v4862_v8 }
 0x269   : > { %3083 = vrcp.f32 %v1571_v50  ;;  %v1604_v50 = vadd.f32 %v4828_v11, %v1523_v33  ;;  %v1541_v63 = vmul.f32 %v4828_v11, %v4878_v58  ;;  %v1536_v59 = vmul.f32 %v4828_v11, %v4882_v53 }
 0x26a   : > { %v3078_v48 = vpop.eup %3077  ;;  %3085 = vrcp.f32 %v1566_v27  ;;  %v1565_v52 = vmax.f32 %v1549_v14, 1e-15  ;;  %v1558_v15 = vadd.f32 %v1542_v23, %v4875_v26  ;;  %v1487_v47 = vpop.xlane.xlu0 %1486  ;;  %v4901_v33 = vmul.f32 %v1425_v51, %v1425_v51 }
 0x26b   : > { %v1612_v5 = vmul.f32 %v3078_v48, %v1596_v3  ;;  %v1644_v56 = vmul.f32 %v3078_v48, %v1628_v32  ;;  %v1508_v29 = vmul.f32 2.0, %v1487_v47  ;;  %v4899_v3 = vmul.f32 %v1416_v6, %v1416_v6 }
 0x26c   : > { %3087 = vrcp.f32 %v1565_v52  ;;  %v1574_v17 = vmax.f32 %v1558_v15, 1e-15  ;;  %v1598_v6 = vadd.f32 %v4828_v11, %v4858_v10  ;;  %v1597_v51 = vadd.f32 %v4828_v11, %v1516_v38 }
 0x26d   : > { %v1660_v42 = vmul.f32 %v1612_v5, %v4564_v49  ;;  %v1676_v2 = vmul.f32 %v4550_v55, %v1644_v56  ;;  %v4892_v32 = vadd.f32 1.0, %v1508_v29  ;;  %v1606_v35 = vadd.f32 %v4828_v11, %v4875_v26 }
 0x26e   : > { %v3080_v54 = vpop.eup %3079  ;;  %3089 = vrcp.f32 %v1574_v17 }
 0x26f   : > { %v1611_v27 = vmul.f32 %v3080_v54, %v1595_v44  ;;  %v4894_v7 = vadd.f32 %v1676_v2, %v1660_v42  ;;  %v1643_v34 = vmul.f32 %v3080_v54, %v1627_v18  ;;  %v1557_v49 = vadd.f32 %v1541_v63, %v4892_v32 }
 0x270   : > { %v3082_v14 = vpop.eup %3081  ;;  %v1477_v23 = vpop.xlane.xlu1 %1476  ;;  %v1603_v18 = vadd.f32 %v4828_v11, %v4854_v60  ;;  %v1535_v63 = vmul.f32 %v4828_v11, %v4899_v3 }
 0x271   : > { %v1620_v8 = vmul.f32 %v3082_v14, %v1604_v50  ;;  %v1708_v48 = vmul.f32 %v4894_v7, %v4894_v7  ;;  %v1659_v52 = vmul.f32 %v1611_v27, %v4590_v61  ;;  %v1675_v5 = vmul.f32 %v4550_v55, %v1643_v34 }
 0x272   : > { %v1573_v15 = vmax.f32 %v1557_v49, 1e-15  ;;  %v1503_v47 = vmul.f32 2.0, %v1477_v23  ;;  %v1652_v56 = vmul.f32 %v3082_v14, %v1636_v39 }
 0x273   : > { %v3084_v29 = vpop.eup %3083  ;;  %1725 = vadd.xlane.f32.xlu1 %v1708_v48  ;;  %v4912_v44 = vadd.f32 %v1675_v5, %v1659_v52  ;;  %v1668_v17 = vmul.f32 %v1620_v8, %v4603_v16 }
 0x274   : > { %v3086_v61 = vpop.eup %3085  ;;  %v1619_v42 = vmul.f32 %v3084_v29, %v1603_v18  ;;  %3091 = vrcp.f32 %v1573_v15  ;;  %v4915_v2 = vadd.f32 1.0, %v1503_v47  ;;  %v1684_v60 = vmul.f32 %v4550_v55, %v1652_v56 }
 0x275   : > { %v1614_v54 = vmul.f32 %v3086_v61, %v1598_v6  ;;  %v1707_v39 = vmul.f32 %v4912_v44, %v4912_v44  ;;  %v1651_v10 = vmul.f32 %v3084_v29, %v1635_v9  ;;  %v1646_v38 = vmul.f32 %v3086_v61, %v1630_v57 }
 0x276   : > { %v3088_v50 = vpop.eup %3087  ;;  %v1552_v16 = vadd.f32 %v1536_v59, %v4915_v2  ;;  %v4927_v27 = vadd.f32 %v1684_v60, %v1668_v17  ;;  %v1667_v34 = vmul.f32 %v1619_v42, %v4619_v46  ;;  %v1605_v17 = vadd.f32 %v4828_v11, %v4892_v32 }
 0x277   : > { %v1613_v14 = vmul.f32 %v3088_v50, %v1597_v51  ;;  %1723 = vadd.xlane.f32.xlu0 %v1707_v39  ;;  %v1683_v49 = vmul.f32 %v4550_v55, %v1651_v10  ;;  %v1662_v36 = vmul.f32 %v1614_v54, %v4636_v12  ;;  %v1678_v9 = vmul.f32 %v4550_v55, %v1646_v38 }
 0x278   : > { %v1568_v57 = vmax.f32 %v1552_v16, 1e-15  ;;  %v1716_v8 = vmul.f32 %v4927_v27, %v4927_v27  ;;  %v1645_v23 = vmul.f32 %v3088_v50, %v1629_v37  ;;  %v3090_v46 = vpop.eup %3089  ;;  %v1637_v54 = vsub.f32 1.0, %v4878_v58 }
 0x279   : > { %v1475_v59 = vpop.xlane.xlu0 %1474  ;;  %v4939_v52 = vadd.f32 %v1683_v49, %v1667_v34  ;;  %v4941_v5 = vadd.f32 %v1678_v9, %v1662_v36  ;;  %v1661_v12 = vmul.f32 %v1613_v14, %v4649_v21  ;;  %v1622_v18 = vmul.f32 %v3090_v46, %v1606_v35 }
 0x27a   : > { %v1502_v48 = vmul.f32 2.0, %v1475_v59  ;;  %3093 = vrcp.f32 %v1568_v57  ;;  %1741 = vadd.xlane.f32.xlu1 %v1716_v8  ;;  %v1677_v26 = vmul.f32 %v4550_v55, %v1645_v23  ;;  %v1654_v47 = vmul.f32 %v3090_v46, %v1638_v4 }
 0x27b   : > { %v1493_v15 = vpop.xlane.xlu1 %1492  ;;  %v1715_v62 = vmul.f32 %v4939_v52, %v4939_v52  ;;  %v1710_v37 = vmul.f32 %v4941_v5, %v4941_v5  ;;  %v1670_v51 = vmul.f32 %v1622_v18, %v4662_v43  ;;  %v1544_v4 = vmul.f32 %v4828_v11, %v4901_v33 }
 0x27c   : > { %v1518_v56 = vadd.f32 1.0, %v1502_v48  ;;  %v1511_v29 = vmul.f32 2.0, %v1493_v15  ;;  %v4949_v6 = vadd.f32 %v1677_v26, %v1661_v12  ;;  %v1686_v21 = vmul.f32 %v4550_v55, %v1654_v47 }
 0x27d   : > { %1739 = vadd.xlane.f32.xlu0 %v1715_v62  ;;  %v1424_v32 = vmin.f32 %v4737_v19, 0.996  ;;  %v1419_v14 = vmin.f32 %v4745_v30, 0.996  ;;  %v1632_v36 = vsub.f32 1.0, %v4882_v53  ;;  %v1600_v9 = vadd.f32 %v4828_v11, %v4915_v2 }
 0x27e   : > { %v1551_v61 = vadd.f32 %v1535_v63, %v1518_v56  ;;  %v1527_v42 = vadd.f32 1.0, %v1511_v29  ;;  %v3092_v60 = vpop.eup %3091  ;;  %1729 = vadd.xlane.f32.xlu1 %v1710_v37  ;;  %v1709_v39 = vmul.f32 %v4949_v6, %v4949_v6  ;;  %v4960_v10 = vadd.f32 %v1686_v21, %v1670_v51 }
 0x27f   : > { %v1621_v43 = vmul.f32 %v3092_v60, %v1605_v17  ;;  %v1653_v63 = vmul.f32 %v3092_v60, %v1637_v54  ;;  %v4971_v19 = vmul.f32 %v1424_v32, %v1424_v32  ;;  %v4975_v46 = vmul.f32 %v1419_v14, %v1419_v14 }
 0x280   : > { %v1567_v38 = vmax.f32 %v1551_v61, 1e-15  ;;  %v1560_v50 = vadd.f32 %v1544_v4, %v1527_v42  ;;  %v1718_v16 = vmul.f32 %v4960_v10, %v4960_v10  ;;  %v1418_v30 = vmin.f32 %v4765_v41, 0.996 }
 0x281   : > { %1727 = vadd.xlane.f32.xlu0 %v1709_v39  ;;  %v1669_v58 = vmul.f32 %v1621_v43, %v4700_v40  ;;  %v1685_v49 = vmul.f32 %v4550_v55, %v1653_v63  ;;  %v1543_v2 = vmul.f32 %v4828_v11, %v4971_v19  ;;  %v1631_v62 = vsub.f32 1.0, %v4899_v3 }
 0x282   : > { %3095 = vrcp.f32 %v1567_v38  ;;  %v1576_v34 = vmax.f32 %v1560_v50, 1e-15  ;;  %1745 = vadd.xlane.f32.xlu1 %v1718_v16  ;;  %v1599_v41 = vadd.f32 %v4828_v11, %v1518_v56  ;;  %v1538_v37 = vmul.f32 %v4828_v11, %v4975_v46 }
 0x283   : > { %v1491_v57 = vpop.xlane.xlu0 %1490  ;;  %v4973_v59 = vadd.f32 %v1685_v49, %v1669_v58  ;;  %v4990_v61 = vmul.f32 %v1418_v30, %v1418_v30  ;;  %v1608_v60 = vadd.f32 %v4828_v11, %v1527_v42  ;;  %v1427_v54 = vmin.f32 %v4774_v31, 0.996 }
 0x284   : > { %3097 = vrcp.f32 %v1576_v34  ;;  %v3094_v35 = vpop.eup %3093  ;;  %v1510_v23 = vmul.f32 2.0, %v1491_v57  ;;  %v1640_v56 = vsub.f32 1.0, %v4901_v33  ;;  %v1426_v50 = vmin.f32 %v4784_v13, 0.996 }
 0x285   : > { %v1616_v8 = vmul.f32 %v3094_v35, %v1600_v9  ;;  %v1648_v40 = vmul.f32 %v3094_v35, %v1632_v36  ;;  %v1717_v53 = vmul.f32 %v4973_v59, %v4973_v59  ;;  %v1537_v31 = vmul.f32 %v4828_v11, %v4990_v61 }
 0x286   : > { %v1526_v48 = vadd.f32 1.0, %v1510_v23  ;;  %v5002_v49 = vmul.f32 %v1427_v54, %v1427_v54  ;;  %v5007_v9 = vmul.f32 %v1426_v50, %v1426_v50 }
 0x287   : > { %v1664_v12 = vmul.f32 %v1616_v8, %v4733_v28  ;;  %v1680_v18 = vmul.f32 %v4550_v55, %v1648_v40  ;;  %1743 = vadd.xlane.f32.xlu0 %v1717_v53 }
 0x288   : > { %v1481_v15 = vpop.xlane.xlu1 %1480  ;;  %v1559_v26 = vadd.f32 %v1543_v2, %v1526_v48  ;;  %v1546_v53 = vmul.f32 %v4828_v11, %v5002_v49 }
 0x289   : > { %v1505_v47 = vmul.f32 2.0, %v1481_v15  ;;  %v4984_v29 = vadd.f32 %v1680_v18, %v1664_v12  ;;  %v1545_v12 = vmul.f32 %v4828_v11, %v5007_v9  ;;  %v1607_v15 = vadd.f32 %v4828_v11, %v1526_v48 }
 0x28a   : > { %v1575_v21 = vmax.f32 %v1559_v26, 1e-15 }
 0x28b   : > { %v1521_v17 = vadd.f32 1.0, %v1505_v47  ;;  %v1712_v28 = vmul.f32 %v4984_v29, %v4984_v29 }
 0x28c   : > { %v3096_v51 = vpop.eup %3095  ;;  %3099 = vrcp.f32 %v1575_v21  ;;  %v1479_v38 = vpop.xlane.xlu0 %1478 }
 0x28d   : > { %v1615_v4 = vmul.f32 %v3096_v51, %v1599_v41  ;;  %v1647_v39 = vmul.f32 %v3096_v51, %v1631_v62  ;;  %v1554_v43 = vadd.f32 %v1538_v37, %v1521_v17  ;;  %1733 = vadd.xlane.f32.xlu1 %v1712_v28  ;;  %v1504_v16 = vmul.f32 2.0, %v1479_v38 }
 0x28e   : > { %v3098_v3 = vpop.eup %3097  ;;  %v1639_v41 = vsub.f32 1.0, %v4971_v19  ;;  %v1634_v28 = vsub.f32 1.0, %v4975_v46  ;;  %v1633_v46 = vsub.f32 1.0, %v4990_v61 }
 0x28f   : > { %v1624_v32 = vmul.f32 %v3098_v3, %v1608_v60  ;;  %v1663_v63 = vmul.f32 %v1615_v4, %v4756_v25  ;;  %v1679_v34 = vmul.f32 %v4550_v55, %v1647_v39  ;;  %v1570_v58 = vmax.f32 %v1554_v43, 1e-15  ;;  %v1497_v13 = vpop.xlane.xlu1 %1496 }
 0x290   : > { %v1656_v42 = vmul.f32 %v3098_v3, %v1640_v56  ;;  %v1520_v14 = vadd.f32 1.0, %v1504_v16  ;;  %v1513_v57 = vmul.f32 2.0, %v1497_v13  ;;  %v1602_v60 = vadd.f32 %v4828_v11, %v1521_v17 }
 0x291   : > { %v5004_v33 = vadd.f32 %v1679_v34, %v1663_v63  ;;  %v1672_v36 = vmul.f32 %v1624_v32, %v4761_v1  ;;  %3101 = vrcp.f32 %v1570_v58 }
 0x292   : > { %v1688_v25 = vmul.f32 %v4550_v55, %v1656_v42  ;;  %v1553_v35 = vadd.f32 %v1537_v31, %v1520_v14  ;;  %v1495_v23 = vpop.xlane.xlu0 %1494  ;;  %v1529_v2 = vadd.f32 1.0, %v1513_v57  ;;  %v1601_v17 = vadd.f32 %v4828_v11, %v1520_v14  ;;  %v3269_v31 = vld [vmem:[%s5666_s2] ss:$0 sm:$0xff] }
 0x293   : > { %v1711_v8 = vmul.f32 %v5004_v33, %v5004_v33  ;;  %v1512_v1 = vmul.f32 2.0, %v1495_v23 }
 0x294   : > { %v5012_v40 = vadd.f32 %v1688_v25, %v1672_v36  ;;  %v1569_v30 = vmax.f32 %v1553_v35, 1e-15  ;;  %v1562_v26 = vadd.f32 %v1546_v53, %v1529_v2 }
 0x295   : > { %1731 = vadd.xlane.f32.xlu0 %v1711_v8  ;;  %v1528_v47 = vadd.f32 1.0, %v1512_v1 }
 0x296   : > { %v1720_v18 = vmul.f32 %v5012_v40, %v5012_v40  ;;  %3103 = vrcp.f32 %v1569_v30  ;;  %v3100_v62 = vpop.eup %3099  ;;  %v1578_v51 = vmax.f32 %v1562_v26, 1e-15 }
 0x297   : > { %v1623_v37 = vmul.f32 %v3100_v62, %v1607_v15  ;;  %v1561_v21 = vadd.f32 %v1545_v12, %v1528_v47  ;;  %v1655_v4 = vmul.f32 %v3100_v62, %v1639_v41  ;;  %v1609_v13 = vadd.f32 %v4828_v11, %v1528_v47 }
 0x298   : > { %1749 = vadd.xlane.f32.xlu1 %v1720_v18  ;;  %3105 = vrcp.f32 %v1578_v51 }
 0x299   : > { %v1577_v54 = vmax.f32 %v1561_v21, 1e-15  ;;  %v1671_v39 = vmul.f32 %v1623_v37, %v4788_v45  ;;  %v1687_v3 = vmul.f32 %v4550_v55, %v1655_v4 }
 0x29b   : > { %v3102_v48 = vpop.eup %3101  ;;  %3107 = vrcp.f32 %v1577_v54  ;;  %v5026_v19 = vadd.f32 %v1687_v3, %v1671_v39 }
 0x29c   : > { %v1618_v56 = vmul.f32 %v3102_v48, %v1602_v60  ;;  %v1650_v43 = vmul.f32 %v3102_v48, %v1634_v28 }
 0x29d   : > { %v1719_v32 = vmul.f32 %v5026_v19, %v5026_v19 }
 0x29e   : > { %v1666_v38 = vmul.f32 %v1618_v56, %v4796_v24  ;;  %v1682_v50 = vmul.f32 %v4550_v55, %v1650_v43  ;;  %v1642_v24 = vsub.f32 1.0, %v5002_v49  ;;  %v1610_v55 = vadd.f32 %v4828_v11, %v1529_v2 }
 0x29f   : > { %1747 = vadd.xlane.f32.xlu0 %v1719_v32  ;;  %v1641_v49 = vsub.f32 1.0, %v5007_v9 }
 0x2a0   : > { %v3104_v45 = vpop.eup %3103  ;;  %v5034_v16 = vadd.f32 %v1682_v50, %v1666_v38 }
 0x2a1   : > { %v1617_v63 = vmul.f32 %v3104_v45, %v1601_v17  ;;  %v1649_v34 = vmul.f32 %v3104_v45, %v1633_v46 }
 0x2a2   : > { %v1714_v58 = vmul.f32 %v5034_v16, %v5034_v16  ;;  %v3106_v14 = vpop.eup %3105 }
 0x2a3   : > { %v1665_v61 = vmul.f32 %v1617_v63, %v4804_v0  ;;  %v1681_v42 = vmul.f32 %v3269_v31, %v1649_v34  ;;  %v1626_v36 = vmul.f32 %v3106_v14, %v1610_v55  ;;  %v1658_v35 = vmul.f32 %v3106_v14, %v1642_v24 }
 0x2a4   : > { %1737 = vadd.xlane.f32.xlu1 %v1714_v58 }
 0x2a5   : > { %v5045_v25 = vadd.f32 %v1681_v42, %v1665_v61  ;;  %v3108_v57 = vpop.eup %3107  ;;  %v1674_v23 = vmul.f32 %v1626_v36, %v4815_v20  ;;  %v1690_v30 = vmul.f32 %v3269_v31, %v1658_v35 }
 0x2a6   : > { %v1625_v8 = vmul.f32 %v3108_v57, %v1609_v13  ;;  %v1657_v53 = vmul.f32 %v3108_v57, %v1641_v49 }
 0x2a7   : > { %v1713_v0 = vmul.f32 %v5045_v25, %v5045_v25  ;;  %v5051_v2 = vadd.f32 %v1690_v30, %v1674_v23 }
 0x2a8   : > { %v1673_v1 = vmul.f32 %v1625_v8, %v4820_v22  ;;  %v1689_v11 = vmul.f32 %v3269_v31, %v1657_v53 }
 0x2a9   : > { %1735 = vadd.xlane.f32.xlu0 %v1713_v0  ;;  %v1722_v12 = vmul.f32 %v5051_v2, %v5051_v2 }
 0x2aa   : > { %v5056_v18 = vadd.f32 %v1689_v11, %v1673_v1 }
 0x2ab   : > { %1753 = vadd.xlane.f32.xlu1 %v1722_v12 }
 0x2ac   : > { %v1721_v9 = vmul.f32 %v5056_v18, %v5056_v18 }
 0x2ae   : > { %1751 = vadd.xlane.f32.xlu0 %v1721_v9 }
 0x300   : > { %v1726_v15 = vpop.xlane.xlu1 %1725 }
 0x301   : > { %3109 = vrsqrt.f32 %v1726_v15  ;;  %vm1764_vm11 = vcmp.eq.f32.partialorder %v1726_v15, inf  ;;  %v1767_v41 = vand.u32 2147483648, %v1726_v15  ;;  %vm1766_vm13 = vcmp.eq.f32.partialorder %v1726_v15, 0.0 }
 0x304   : > { %v1724_v20 = vpop.xlane.xlu0 %1723 }
 0x305   : > { %3111 = vrsqrt.f32 %v1724_v20  ;;  %vm1757_vm10 = vcmp.eq.f32.partialorder %v1724_v20, inf  ;;  %v1760_v60 = vand.u32 2147483648, %v1724_v20  ;;  %vm1759_vm12 = vcmp.eq.f32.partialorder %v1724_v20, 0.0 }
 0x307   : > { %v1742_v26 = vpop.xlane.xlu1 %1741 }
 0x308   : > { %3113 = vrsqrt.f32 %v1742_v26  ;;  %vm1820_vm15 = vcmp.eq.f32.partialorder %v1742_v26, inf  ;;  %v1823_v45 = vand.u32 2147483648, %v1742_v26  ;;  %vm1822_vm14 = vcmp.eq.f32.partialorder %v1742_v26, 0.0 }
 0x30a   : > { %v5060_v22 = vpop.xlane.xlu0 %1739 }
 0x30b   : > { %v3110_v47 = vpop.eup %3109  ;;  %3115 = vrsqrt.f32 %v5060_v22  ;;  %v5066_v3 = vpop.xlane.xlu1 %1729  ;;  %vm1813_vm0 = vcmp.eq.f32.partialorder %v5060_v22, inf  ;;  %vm1815_vm1 = vcmp.eq.f32.partialorder %v5060_v22, 0.0  ;;  %v1816_v35 = vand.u32 2147483648, %v5060_v22 }
 0x30c   : > { %v1763_v62 = vmul.f32 %v3110_v47, %v1726_v15  ;;  %v1781_v30 = vand.u32 2147483648, %v5066_v3  ;;  %vm1778_vm3 = vcmp.eq.f32.partialorder %v5066_v3, inf  ;;  %vm1780_vm4 = vcmp.eq.f32.partialorder %v5066_v3, 0.0 }
 0x30e   : > { %v1765_v37 = vsel %vm1764_vm11, %v1726_v15, %v1763_v62  ;;  %v5072_v63 = vpop.xlane.xlu0 %1727 }
 0x30f   : > { %v3112_v51 = vpop.eup %3111  ;;  %v1768_v21 = vsel %vm1766_vm13, %v1767_v41, %v1765_v37  ;;  %v5077_v24 = vpop.xlane.xlu1 %1745  ;;  %v1774_v15 = vand.u32 2147483648, %v5072_v63  ;;  %vm1771_vm7 = vcmp.eq.f32.partialorder %v5072_v63, inf  ;;  %vm1773_vm13 = vcmp.eq.f32.partialorder %v5072_v63, 0.0 }
 0x310   : > { %v5063_v28 = vmax.f32 %v1768_v21, 1e-15  ;;  %v1756_v4 = vmul.f32 %v3112_v51, %v1724_v20 }
 0x312   : > { %v3114_v54 = vpop.eup %3113  ;;  %v1948_v39 = vmin.f32 %v5063_v28, 0.996  ;;  %v1758_v48 = vsel %vm1757_vm10, %v1724_v20, %v1756_v4  ;;  %3117 = vrcp.f32 %v5063_v28  ;;  %vm1884_vm5 = vcmp.gt.f32.partialorder %v5063_v28, 0.996 }
 0x313   : > { %v1761_v56 = vsel %vm1759_vm12, %v1760_v60, %v1758_v48  ;;  %v1819_v43 = vmul.f32 %v3114_v54, %v1742_v26 }
 0x314   : > { %v2004_v38 = vadd.f32 1.0, %v1948_v39  ;;  %v2140_v50 = vsub.f32 0.0, %v1948_v39  ;;  %v5069_v46 = vmax.f32 %v1761_v56, 1e-15  ;;  %v2007_v61 = vmul.f32 -0.5, %v1948_v39 }
 0x315   : > { %v1821_v17 = vsel %vm1820_vm15, %v1742_v26, %v1819_v43  ;;  %v3116_v55 = vpop.eup %3115  ;;  %v2010_v57 = vand.u32 2147483647, %v1948_v39  ;;  %vm1834_vm15 = vcmp.eq.f32.partialorder %v5077_v24, inf }
 0x316   : > { %3119 = vlog2.f32 %v2004_v38  ;;  %v2164_v32 = vadd.f32 1.0, %v2140_v50  ;;  %v5075_v34 = vmin.f32 %v5069_v46, 0.996  ;;  %v1824_v58 = vsel %vm1822_vm14, %v1823_v45, %v1821_v17 }
 0x317   : > { %3121 = vrsqrt.f32 %v5066_v3  ;;  %v5079_v31 = vmax.f32 %v1824_v58, 1e-15  ;;  %v2167_v42 = vmul.f32 -0.5, %v2140_v50  ;;  %v1812_v8 = vmul.f32 %v3116_v55, %v5060_v22 }
 0x318   : > { %3123 = vlog2.f32 %v2164_v32  ;;  %v1995_v14 = vadd.f32 1.0, %v5075_v34  ;;  %v5084_v36 = vsub.f32 0.0, %v5075_v34  ;;  %v2008_v0 = vadd.f32 1.0, %v2007_v61 }
 0x319   : > { %3125 = vrsqrt.f32 %v5072_v63  ;;  %v5088_v13 = vmin.f32 %v5079_v31, 0.996  ;;  %v2170_v23 = vand.u32 2147483647, %v2140_v50  ;;  %v2168_v53 = vadd.f32 1.0, %v2167_v42 }
 0x31a   : > { %3127 = vrsqrt.f32 %v5077_v24  ;;  %v2155_v49 = vadd.f32 1.0, %v5084_v36  ;;  %v1998_v1 = vmul.f32 -0.5, %v5075_v34  ;;  %v2001_v9 = vand.u32 2147483647, %v5075_v34 }
 0x31b   : > { %3129 = vlog2.f32 %v1995_v14  ;;  %v2076_v11 = vadd.f32 1.0, %v5088_v13  ;;  %vm5103_vm6 = vcmp.lt.f32.partialorder %v2010_v57, 0.0004427343  ;;  %v5108_v47 = vsub.f32 0.0, %v5088_v13 }
 0x31c   : > { %3131 = vrcp.f32 %v1948_v39  ;;  %v3118_v12 = vpop.eup %3117  ;;  %v1814_v62 = vsel %vm1813_vm0, %v5060_v22, %v1812_v8  ;;  %v2009_v51 = vmul.f32 %v2008_v0, %v1948_v39  ;;  %vm5113_vm2 = vcmp.lt.f32.partialorder %v2170_v23, 0.0004427343 }
 0x31d   : > { %3133 = vlog2.f32 %v2155_v49  ;;  %v2158_v4 = vmul.f32 -0.5, %v5084_v36  ;;  %v2169_v54 = vmul.f32 %v2168_v53, %v2140_v50  ;;  %v1999_v48 = vadd.f32 1.0, %v1998_v1 }
 0x31e   : > { %3135 = vrcp.f32 %v5069_v46  ;;  %v2236_v56 = vadd.f32 1.0, %v5108_v47  ;;  %v1916_v43 = vmul.f32 0.996, %v3118_v12  ;;  %vm5121_vm8 = vcmp.lt.f32.partialorder %v2001_v9, 0.0004427343 }
 0x31f   : > { %3137 = vlog2.f32 %v2076_v11  ;;  %v1817_v39 = vsel %vm1815_vm1, %v1816_v35, %v1814_v62  ;;  %v2161_v45 = vand.u32 2147483647, %v5084_v36  ;;  %v2079_v50 = vmul.f32 -0.5, %v5088_v13 }
 0x320   : > { %v3120_v20 = vpop.eup %3119  ;;  %3139 = vrcp.f32 %v5075_v34  ;;  %v5129_v58 = vmax.f32 %v1817_v39, 1e-15  ;;  %v2159_v22 = vadd.f32 1.0, %v2158_v4  ;;  %v2082_v49 = vand.u32 2147483647, %v5088_v13 }
 0x321   : > { %v3122_v41 = vpop.eup %3121  ;;  %v2006_v37 = vmul.f32 0.6931472, %v3120_v20  ;;  %3141 = vlog2.f32 %v2236_v56  ;;  %v2239_v8 = vmul.f32 -0.5, %v5108_v47  ;;  %v1932_v23 = vsel %vm1884_vm5, %v1916_v43, 1.0 }
 0x322   : > { %v3124_v60 = vpop.eup %3123  ;;  %v1777_v14 = vmul.f32 %v3122_v41, %v5066_v3  ;;  %3143 = vrcp.f32 %v5079_v31  ;;  %v2000_v1 = vmul.f32 %v1999_v48, %v5075_v34  ;;  %v5146_v11 = vmin.f32 %v5129_v58, 0.996 }
 0x323   : > { %v2166_v38 = vmul.f32 0.6931472, %v3124_v60  ;;  %v3126_v32 = vpop.eup %3125  ;;  %v2012_v61 = vsel %vm5103_vm6, %v2009_v51, %v2006_v37  ;;  %vm1883_vm9 = vcmp.gt.f32.partialorder %v5069_v46, 0.996  ;;  %vm5149_vm11 = vcmp.lt.f32.partialorder %v2161_v45, 0.0004427343 }
 0x324   : > { %v5132_v55 = vpop.eup %3127  ;;  %v2080_v26 = vadd.f32 1.0, %v2079_v50  ;;  %v1779_v28 = vsel %vm1778_vm3, %v5066_v3, %v1777_v14  ;;  %v2160_v41 = vmul.f32 %v2159_v22, %v5084_v36  ;;  %v2067_v37 = vadd.f32 1.0, %v5146_v11 }
 0x325   : > { %v2172_v42 = vsel %vm5113_vm2, %v2169_v54, %v2166_v38  ;;  %v3130_v35 = vpop.eup %3129  ;;  %v1770_v51 = vmul.f32 %v3126_v32, %v5072_v63  ;;  %vm5160_vm10 = vcmp.lt.f32.partialorder %v2082_v49, 0.0004427343  ;;  %v2240_v54 = vadd.f32 1.0, %v2239_v8 }
 0x326   : > { %v2300_v57 = vsub.f32 %v2012_v61, %v2172_v42  ;;  %v3132_v0 = vpop.eup %3131  ;;  %v1997_v53 = vmul.f32 0.6931472, %v3130_v35  ;;  %v5165_v48 = vsub.f32 0.0, %v5146_v11  ;;  %3145 = vlog2.f32 %v2067_v37 }
 0x327   : > { %v3134_v12 = vpop.eup %3133  ;;  %v1782_v43 = vsel %vm1780_vm4, %v1781_v30, %v1779_v28  ;;  %v2242_v32 = vand.u32 2147483647, %v5108_v47  ;;  %3147 = vrcp.f32 %v5088_v13  ;;  %v1772_v61 = vsel %vm1771_vm7, %v5072_v63, %v1770_v51 }
 0x328   : > { %v2316_v9 = vmul.f32 0.5, %v2300_v57  ;;  %v3136_v62 = vpop.eup %3135  ;;  %v2157_v34 = vmul.f32 0.6931472, %v3134_v12  ;;  %v2003_v56 = vsel %vm5121_vm8, %v2000_v1, %v1997_v53  ;;  %v2227_v45 = vadd.f32 1.0, %v5165_v48 }
 0x329   : > { %v3138_v21 = vpop.eup %3137  ;;  %v1915_v17 = vmul.f32 0.996, %v3136_v62  ;;  %3149 = vrcp.f32 %v5129_v58  ;;  %v5182_v30 = vmax.f32 %v1782_v43, 1e-15  ;;  %v2081_v14 = vmul.f32 %v2080_v26, %v5088_v13 }
 0x32a   : > { %v2348_v4 = vmul.f32 %v3132_v0, %v2316_v9  ;;  %v2163_v36 = vsel %vm5149_vm11, %v2160_v41, %v2157_v34  ;;  %v3140_v38 = vpop.eup %3139  ;;  %v2078_v50 = vmul.f32 0.6931472, %v3138_v21  ;;  %3151 = vlog2.f32 %v2227_v45 }
 0x32b   : > { %v2299_v39 = vsub.f32 %v2003_v56, %v2163_v36  ;;  %v3142_v42 = vpop.eup %3141  ;;  %v2241_v57 = vmul.f32 %v2240_v54, %v5108_v47  ;;  %v2070_v49 = vmul.f32 -0.5, %v5146_v11  ;;  %vm2243_vm12 = vcmp.lt.f32.partialorder %v2242_v32, 0.0004427343 }
 0x32c   : > { %v2364_v3 = vmul.f32 %v2348_v4, %v1932_v23  ;;  %v2238_v35 = vmul.f32 0.6931472, %v3142_v42  ;;  %v3144_v8 = vpop.eup %3143  ;;  %v2230_v53 = vmul.f32 -0.5, %v5165_v48  ;;  %v5190_v23 = vmin.f32 %v5182_v30, 0.996 }
 0x32d   : > { %v2315_v22 = vmul.f32 0.5, %v2299_v39  ;;  %v1931_v1 = vsel %vm1883_vm9, %v1915_v17, 1.0  ;;  %v2084_v12 = vsel %vm5160_vm10, %v2081_v14, %v2078_v50  ;;  %v1775_v47 = vsel %vm1773_vm13, %v1774_v15, %v1772_v61 }
 0x32e   : > { %v2244_v13 = vsel %vm2243_vm12, %v2241_v57, %v2238_v35  ;;  %v2380_v9 = vmul.f32 %v2364_v3, %v4894_v7  ;;  %v2022_v28 = vadd.f32 1.0, %v5190_v23  ;;  %v2071_v62 = vadd.f32 1.0, %v2070_v49 }
 0x32f   : > { %v2347_v0 = vmul.f32 %v3140_v38, %v2315_v22  ;;  %v2308_v26 = vsub.f32 %v2084_v12, %v2244_v13  ;;  %v2073_v46 = vand.u32 2147483647, %v5146_v11  ;;  %v2233_v34 = vand.u32 2147483647, %v5165_v48 }
 0x330   : > { %v5207_v41 = vsub.f32 0.0, %v5190_v23  ;;  %v2231_v63 = vadd.f32 1.0, %v2230_v53  ;;  %3153 = vlog2.f32 %v2022_v28  ;;  %v5210_v15 = vmax.f32 %v1775_v47, 1e-15  ;;  %v3146_v7 = vpop.eup %3145 }
 0x331   : > { %v2363_v20 = vmul.f32 %v2347_v0, %v1931_v1  ;;  %3155 = vrcp.f32 %v5146_v11  ;;  %v1837_v21 = vand.u32 2147483648, %v5077_v24  ;;  %v3148_v4 = vpop.eup %3147  ;;  %vm1892_vm14 = vcmp.gt.f32.partialorder %v5079_v31, 0.996 }
 0x332   : > { %v2182_v51 = vadd.f32 1.0, %v5207_v41  ;;  %v1924_v54 = vmul.f32 0.996, %v3144_v8  ;;  %v2324_v56 = vmul.f32 0.5, %v2308_v26  ;;  %v2069_v43 = vmul.f32 0.6931472, %v3146_v7 }
 0x333   : > { %v2379_v37 = vmul.f32 %v2363_v20, %v4912_v44  ;;  %v5217_v44 = vpop.xlane.xlu0 %1743  ;;  %v3150_v36 = vpop.eup %3149  ;;  %v2072_v38 = vmul.f32 %v2071_v62, %v5146_v11  ;;  %vm5220_vm0 = vcmp.lt.f32.partialorder %v2073_v46, 0.0004427343  ;;  %vm1836_vm1 = vcmp.eq.f32.partialorder %v5077_v24, 0.0 }
 0x334   : > { %3157 = vlog2.f32 %v2182_v51  ;;  %v3152_v32 = vpop.eup %3151  ;;  %v2232_v45 = vmul.f32 %v2231_v63, %v5165_v48  ;;  %vm5229_vm5 = vcmp.lt.f32.partialorder %v2233_v34, 0.0004427343  ;;  %v5235_v11 = vmin.f32 %v5210_v15, 0.996  ;;  %v5260_v20 = vpop.xlane.xlu1 %1733 }
 0x335   : > { %v2648_v60 = vpack.c.bf16 %v2380_v9, %v2379_v37  ;;  %3159 = vrcp.f32 %v5182_v30  ;;  %v2229_v50 = vmul.f32 0.6931472, %v3152_v32  ;;  %v2025_v61 = vmul.f32 -0.5, %v5190_v23 }
 0x336   : > { %v2185_v42 = vmul.f32 -0.5, %v5207_v41  ;;  %3161 = vrsqrt.f32 %v5217_v44  ;;  %v2356_v3 = vmul.f32 %v3148_v4, %v2324_v56  ;;  %v1923_v22 = vmul.f32 0.996, %v3150_v36 }
 0x337   : > { %2649 = vst [vmem:[%s5225_s12] sm:$0xff] %v2648_v60   ;;  %v2013_v48 = vadd.f32 1.0, %v5235_v11  ;;  %v1833_v14 = vmul.f32 %v5132_v55, %v5077_v24  ;;  %v2075_v35 = vsel %vm5220_vm0, %v2072_v38, %v2069_v43  ;;  %v2235_v57 = vsel %vm5229_vm5, %v2232_v45, %v2229_v50 }
 0x338   : > { %v2028_v49 = vand.u32 2147483647, %v5190_v23  ;;  %v5249_v8 = vsub.f32 0.0, %v5235_v11  ;;  %v1940_v0 = vsel %vm1892_vm14, %v1924_v54, 1.0  ;;  %vm1891_vm3 = vcmp.gt.f32.partialorder %v5129_v58, 0.996 }
 0x339   : > { %v2307_v53 = vsub.f32 %v2075_v35, %v2235_v57  ;;  %3163 = vlog2.f32 %v2013_v48  ;;  %v2026_v1 = vadd.f32 1.0, %v2025_v61  ;;  %v2186_v55 = vadd.f32 1.0, %v2185_v42 }
 0x33a   : > { %3165 = vrcp.f32 %v5190_v23  ;;  %v2173_v12 = vadd.f32 1.0, %v5249_v8  ;;  %v3154_v13 = vpop.eup %3153  ;;  %v2372_v47 = vmul.f32 %v2356_v3, %v1940_v0  ;;  %v1835_v31 = vsel %vm1834_vm15, %v5077_v24, %v1833_v14 }
 0x33b   : > { %v2323_v9 = vmul.f32 0.5, %v2307_v53  ;;  %3167 = vrcp.f32 %v5210_v15  ;;  %v3156_v58 = vpop.eup %3155  ;;  %v1939_v26 = vsel %vm1891_vm3, %v1923_v22, 1.0  ;;  %vm5262_vm6 = vcmp.lt.f32.partialorder %v2028_v49, 0.0004427343 }
 0x33c   : > { %v2188_v62 = vand.u32 2147483647, %v5207_v41  ;;  %3169 = vlog2.f32 %v2173_v12  ;;  %v2024_v34 = vmul.f32 0.6931472, %v3154_v13  ;;  %v2016_v37 = vmul.f32 -0.5, %v5235_v11 }
 0x33d   : > { %v2355_v46 = vmul.f32 %v3156_v58, %v2323_v9  ;;  %v1838_v63 = vsel %vm1836_vm1, %v1837_v21, %v1835_v31  ;;  %v2027_v51 = vmul.f32 %v2026_v1, %v5190_v23  ;;  %v2187_v4 = vmul.f32 %v2186_v55, %v5207_v41  ;;  %v5300_v1 = vpop.xlane.xlu0 %1731 }
 0x33e   : > { %v3158_v7 = vpop.eup %3157  ;;  %v5272_v60 = vmax.f32 %v1838_v63, 1e-15  ;;  %3171 = vrsqrt.f32 %v5260_v20  ;;  %v2388_v56 = vmul.f32 %v2372_v47, %v4927_v27  ;;  %v2176_v38 = vmul.f32 -0.5, %v5249_v8 }
 0x33f   : > { %v3160_v54 = vpop.eup %3159  ;;  %v2371_v36 = vmul.f32 %v2355_v46, %v1939_v26  ;;  %v2184_v43 = vmul.f32 0.6931472, %v3158_v7  ;;  %vm2189_vm2 = vcmp.lt.f32.partialorder %v2188_v62, 0.0004427343  ;;  %v2019_v24 = vand.u32 2147483647, %v5235_v11 }
 0x340   : > { %v3162_v39 = vpop.eup %3161  ;;  %v5279_v21 = vmin.f32 %v5272_v60, 0.996  ;;  %vm1886_vm4 = vcmp.gt.f32.partialorder %v5182_v30, 0.996  ;;  %v2030_v41 = vsel %vm5262_vm6, %v2027_v51, %v2024_v34  ;;  %v2017_v27 = vadd.f32 1.0, %v2016_v37 }
 0x341   : > { %v2387_v23 = vmul.f32 %v2371_v36, %v4939_v52  ;;  %v2190_v32 = vsel %vm2189_vm2, %v2187_v4, %v2184_v43  ;;  %v2179_v17 = vand.u32 2147483647, %v5249_v8  ;;  %v1826_v61 = vmul.f32 %v3162_v39, %v5217_v44 }
 0x342   : > { %v2302_v45 = vsub.f32 %v2030_v41, %v2190_v32  ;;  %v2094_v50 = vadd.f32 1.0, %v5279_v21  ;;  %v2177_v22 = vadd.f32 1.0, %v2176_v38  ;;  %3173 = vrcp.f32 %v5235_v11 }
 0x343   : > { %v3164_v42 = vpop.eup %3163  ;;  %v2668_v3 = vpack.c.bf16 %v2388_v56, %v2387_v23  ;;  %v5290_v52 = vsub.f32 0.0, %v5279_v21  ;;  %v1918_v14 = vmul.f32 0.996, %v3160_v54  ;;  %vm1885_vm8 = vcmp.gt.f32.partialorder %v5210_v15, 0.996 }
 0x344   : > { %v3166_v48 = vpop.eup %3165  ;;  %v2318_v35 = vmul.f32 0.5, %v2302_v45  ;;  %3175 = vlog2.f32 %v2094_v50  ;;  %v2015_v49 = vmul.f32 0.6931472, %v3164_v42  ;;  %vm5294_vm7 = vcmp.lt.f32.partialorder %v2019_v24, 0.0004427343 }
 0x345   : > { %v3168_v57 = vpop.eup %3167  ;;  %2688 = vst [vmem:[%s5225_s12 + $0x20] sm:$0xff] %v2668_v3   ;;  %v2254_v53 = vadd.f32 1.0, %v5290_v52  ;;  %vm1827_vm9 = vcmp.eq.f32.partialorder %v5217_v44, inf  ;;  %v2018_v12 = vmul.f32 %v2017_v27, %v5235_v11  ;;  %vm5303_vm11 = vcmp.lt.f32.partialorder %v2179_v17, 0.0004427343 }
 0x346   : > { %v3170_v55 = vpop.eup %3169  ;;  %v1828_v47 = vsel %vm1827_vm9, %v5217_v44, %v1826_v61  ;;  %v1830_v9 = vand.u32 2147483648, %v5217_v44  ;;  %v2178_v58 = vmul.f32 %v2177_v22, %v5249_v8  ;;  %vm1829_vm13 = vcmp.eq.f32.partialorder %v5217_v44, 0.0  ;;  %v5319_v8 = vpop.xlane.xlu1 %1749 }
 0x347   : > { %v2175_v31 = vmul.f32 0.6931472, %v3170_v55  ;;  %3177 = vlog2.f32 %v2254_v53  ;;  %v2350_v28 = vmul.f32 %v3166_v48, %v2318_v35  ;;  %v1917_v62 = vmul.f32 0.996, %v3168_v57 }
 0x348   : > { %v3172_v26 = vpop.eup %3171  ;;  %v1831_v46 = vsel %vm1829_vm13, %v1830_v9, %v1828_v47  ;;  %3179 = vrsqrt.f32 %v5300_v1  ;;  %v2021_v11 = vsel %vm5294_vm7, %v2018_v12, %v2015_v49  ;;  %v1934_v44 = vsel %vm1886_vm4, %v1918_v14, 1.0 }
 0x349   : > { %v2181_v34 = vsel %vm5303_vm11, %v2178_v58, %v2175_v31  ;;  %v5316_v37 = vmax.f32 %v1831_v46, 1e-15  ;;  %v1791_v63 = vmul.f32 %v3172_v26, %v5260_v20  ;;  %v2257_v51 = vmul.f32 -0.5, %v5290_v52 }
 0x34a   : > { %v2301_v7 = vsub.f32 %v2021_v11, %v2181_v34  ;;  %vm1792_vm10 = vcmp.eq.f32.partialorder %v5260_v20, inf  ;;  %3181 = vrcp.f32 %v5272_v60  ;;  %v2097_v4 = vmul.f32 -0.5, %v5279_v21 }
 0x34b   : > { %v5328_v54 = vmin.f32 %v5316_v37, 0.996  ;;  %v1795_v56 = vand.u32 2147483648, %v5260_v20  ;;  %v2366_v36 = vmul.f32 %v2350_v28, %v1934_v44  ;;  %v1793_v38 = vsel %vm1792_vm10, %v5260_v20, %v1791_v63 }
 0x34c   : > { %v2317_v43 = vmul.f32 0.5, %v2301_v7  ;;  %3183 = vrsqrt.f32 %v5319_v8  ;;  %v3174_v30 = vpop.eup %3173  ;;  %v1933_v39 = vsel %vm1885_vm8, %v1917_v62, 1.0  ;;  %vm1794_vm12 = vcmp.eq.f32.partialorder %v5260_v20, 0.0 }
 0x34d   : > { %v2085_v24 = vadd.f32 1.0, %v5328_v54  ;;  %v2258_v32 = vadd.f32 1.0, %v2257_v51  ;;  %v5338_v27 = vsub.f32 0.0, %v5328_v54  ;;  %v1796_v45 = vsel %vm1794_vm12, %v1795_v56, %v1793_v38 }
 0x34e   : > { %v3176_v23 = vpop.eup %3175  ;;  %v2349_v41 = vmul.f32 %v3174_v30, %v2317_v43  ;;  %v2098_v17 = vadd.f32 1.0, %v2097_v4  ;;  %v2100_v50 = vand.u32 2147483647, %v5279_v21  ;;  %v2260_v61 = vand.u32 2147483647, %v5290_v52  ;;  %v5372_v4 = vpop.xlane.xlu0 %1747 }
 0x34f   : > { %3185 = vlog2.f32 %v2085_v24  ;;  %v2382_v15 = vmul.f32 %v2366_v36, %v4941_v5  ;;  %v2245_v20 = vadd.f32 1.0, %v5338_v27  ;;  %v2096_v22 = vmul.f32 0.6931472, %v3176_v23 }
 0x350   : > { %v2365_v42 = vmul.f32 %v2349_v41, %v1933_v39  ;;  %3187 = vrcp.f32 %v5279_v21  ;;  %v5346_v48 = vmax.f32 %v1796_v45, 1e-15  ;;  %v2259_v49 = vmul.f32 %v2258_v32, %v5290_v52  ;;  %v5389_v45 = vpop.xlane.xlu1 %1737 }
 0x351   : > { %v3178_v3 = vpop.eup %3177  ;;  %3189 = vrcp.f32 %v5316_v37  ;;  %v2099_v5 = vmul.f32 %v2098_v17, %v5279_v21  ;;  %vm2261_vm15 = vcmp.lt.f32.partialorder %v2260_v61, 0.0004427343  ;;  %v2088_v0 = vmul.f32 -0.5, %v5328_v54 }
 0x352   : > { %v3180_v14 = vpop.eup %3179  ;;  %v2381_v35 = vmul.f32 %v2365_v42, %v4949_v6  ;;  %v2256_v57 = vmul.f32 0.6931472, %v3178_v3  ;;  %3191 = vlog2.f32 %v2245_v20  ;;  %v5353_v53 = vmin.f32 %v5346_v48, 0.996 }
 0x353   : > { %vm2101_vm14 = vcmp.lt.f32.partialorder %v2100_v50, 0.0004427343  ;;  %v1784_v13 = vmul.f32 %v3180_v14, %v5300_v1  ;;  %v2248_v9 = vmul.f32 -0.5, %v5338_v27  ;;  %vm1785_vm0 = vcmp.eq.f32.partialorder %v5300_v1, inf }
 0x354   : > { %v2653_v55 = vpack.c.bf16 %v2382_v15, %v2381_v35  ;;  %v2262_v12 = vsel %vm2261_vm15, %v2259_v49, %v2256_v57  ;;  %v3182_v47 = vpop.eup %3181  ;;  %v2102_v6 = vsel %vm2101_vm14, %v2099_v5, %v2096_v22  ;;  %v2040_v52 = vadd.f32 1.0, %v5353_v53 }
 0x355   : > { %v2310_v31 = vsub.f32 %v2102_v6, %v2262_v12  ;;  %v2091_v58 = vand.u32 2147483647, %v5328_v54  ;;  %v5362_v26 = vsub.f32 0.0, %v5353_v53  ;;  %v1786_v28 = vsel %vm1785_vm0, %v5300_v1, %v1784_v13 }
 0x356   : > { %v3184_v21 = vpop.eup %3183  ;;  %2685 = vst [vmem:[%s5225_s12 + $0x8] sm:$0xff] %v2653_v55   ;;  %v2089_v62 = vadd.f32 1.0, %v2088_v0  ;;  %3193 = vlog2.f32 %v2040_v52  ;;  %v1788_v46 = vand.u32 2147483648, %v5300_v1  ;;  %vm1894_vm1 = vcmp.gt.f32.partialorder %v5272_v60, 0.996 }
 0x357   : > { %v1926_v11 = vmul.f32 0.996, %v3182_v47  ;;  %v2200_v34 = vadd.f32 1.0, %v5362_v26  ;;  %vm1787_vm5 = vcmp.eq.f32.partialorder %v5300_v1, 0.0  ;;  %vm1848_vm3 = vcmp.eq.f32.partialorder %v5319_v8, inf }
 0x358   : > { %v2249_v44 = vadd.f32 1.0, %v2248_v9  ;;  %3195 = vrcp.f32 %v5328_v54  ;;  %v1789_v7 = vsel %vm1787_vm5, %v1788_v46, %v1786_v28  ;;  %v1847_v51 = vmul.f32 %v3184_v21, %v5319_v8 }
 0x359   : > { %v3186_v63 = vpop.eup %3185  ;;  %v2326_v36 = vmul.f32 0.5, %v2310_v31  ;;  %vm5374_vm6 = vcmp.lt.f32.partialorder %v2091_v58, 0.0004427343  ;;  %v2251_v38 = vand.u32 2147483647, %v5338_v27  ;;  %3197 = vlog2.f32 %v2200_v34 }
 0x35a   : > { %v3188_v56 = vpop.eup %3187  ;;  %v2087_v30 = vmul.f32 0.6931472, %v3186_v63  ;;  %v2090_v39 = vmul.f32 %v2089_v62, %v5328_v54  ;;  %3199 = vrcp.f32 %v5346_v48  ;;  %v5381_v24 = vmax.f32 %v1789_v7, 1e-15 }
 0x35b   : > { %v3190_v1 = vpop.eup %3189  ;;  %v2043_v41 = vmul.f32 -0.5, %v5353_v53  ;;  %v1849_v32 = vsel %vm1848_vm3, %v5319_v8, %v1847_v51  ;;  %vm1850_vm2 = vcmp.eq.f32.partialorder %v5319_v8, 0.0  ;;  %3201 = vrsqrt.f32 %v5372_v4 }
 0x35c   : > { %v3192_v23 = vpop.eup %3191  ;;  %v2250_v54 = vmul.f32 %v2249_v44, %v5338_v27  ;;  %v2203_v50 = vmul.f32 -0.5, %v5362_v26  ;;  %v1851_v61 = vand.u32 2147483648, %v5319_v8  ;;  %v2358_v15 = vmul.f32 %v3188_v56, %v2326_v36 }
 0x35d   : > { %v2247_v17 = vmul.f32 0.6931472, %v3192_v23  ;;  %v1925_v42 = vmul.f32 0.996, %v3190_v1  ;;  %vm2252_vm4 = vcmp.lt.f32.partialorder %v2251_v38, 0.0004427343  ;;  %v2093_v3 = vsel %vm5374_vm6, %v2090_v39, %v2087_v30 }
 0x35e   : > { %v5395_v20 = vmin.f32 %v5381_v24, 0.996  ;;  %v1852_v14 = vsel %vm1850_vm2, %v1851_v61, %v1849_v32  ;;  %3203 = vrsqrt.f32 %v5389_v45  ;;  %vm1893_vm8 = vcmp.gt.f32.partialorder %v5316_v37, 0.996 }
 0x35f   : > { %v2253_v22 = vsel %vm2252_vm4, %v2250_v54, %v2247_v17  ;;  %v2044_v35 = vadd.f32 1.0, %v2043_v41  ;;  %v1942_v49 = vsel %vm1894_vm1, %v1926_v11, 1.0  ;;  %v2204_v5 = vadd.f32 1.0, %v2203_v50 }
 0x360   : > { %v2309_v27 = vsub.f32 %v2093_v3, %v2253_v22  ;;  %v2031_v57 = vadd.f32 1.0, %v5395_v20  ;;  %v3194_v8 = vpop.eup %3193  ;;  %v2206_v0 = vand.u32 2147483647, %v5362_v26  ;;  %v5406_v55 = vsub.f32 0.0, %v5395_v20 }
 0x361   : > { %v2374_v12 = vmul.f32 %v2358_v15, %v1942_v49  ;;  %v5408_v47 = vmax.f32 %v1852_v14, 1e-15  ;;  %v1941_v6 = vsel %vm1893_vm8, %v1925_v42, 1.0  ;;  %v2046_v9 = vand.u32 2147483647, %v5353_v53 }
 0x362   : > { %v2325_v13 = vmul.f32 0.5, %v2309_v27  ;;  %3205 = vlog2.f32 %v2031_v57  ;;  %v3196_v37 = vpop.eup %3195  ;;  %v2191_v60 = vadd.f32 1.0, %v5406_v55  ;;  %v2042_v31 = vmul.f32 0.6931472, %v3194_v8 }
 0x363   : > { %3207 = vrcp.f32 %v5353_v53  ;;  %v3198_v52 = vpop.eup %3197  ;;  %v2045_v58 = vmul.f32 %v2044_v35, %v5353_v53  ;;  %v2205_v46 = vmul.f32 %v2204_v5, %v5362_v26  ;;  %v2034_v11 = vmul.f32 -0.5, %v5395_v20  ;;  %v5450_v5 = vpop.xlane.xlu0 %1735 }
 0x364   : > { %v2357_v21 = vmul.f32 %v3196_v37, %v2325_v13  ;;  %3209 = vrcp.f32 %v5381_v24  ;;  %v3200_v28 = vpop.eup %3199  ;;  %v2202_v62 = vmul.f32 0.6931472, %v3198_v52  ;;  %v2390_v63 = vmul.f32 %v2374_v12, %v4960_v10 }
 0x365   : > { %3211 = vlog2.f32 %v2191_v60  ;;  %v3202_v34 = vpop.eup %3201  ;;  %vm2207_vm7 = vcmp.lt.f32.partialorder %v2206_v0, 0.0004427343  ;;  %v5419_v7 = vmin.f32 %v5408_v47, 0.996  ;;  %vm2047_vm9 = vcmp.lt.f32.partialorder %v2046_v9, 0.0004427343 }
 0x366   : > { %v2373_v44 = vmul.f32 %v2357_v21, %v1941_v6  ;;  %v2208_v51 = vsel %vm2207_vm7, %v2205_v46, %v2202_v62  ;;  %v2037_v53 = vand.u32 2147483647, %v5395_v20  ;;  %v2194_v56 = vmul.f32 -0.5, %v5406_v55 }
 0x367   : > { %v2048_v26 = vsel %vm2047_vm9, %v2045_v58, %v2042_v31  ;;  %v2112_v43 = vadd.f32 1.0, %v5419_v7  ;;  %v1840_v38 = vmul.f32 %v3202_v34, %v5372_v4  ;;  %v2035_v30 = vadd.f32 1.0, %v2034_v11 }
 0x368   : > { %v2389_v36 = vmul.f32 %v2373_v44, %v4973_v59  ;;  %v3204_v10 = vpop.eup %3203  ;;  %v2304_v1 = vsub.f32 %v2048_v26, %v2208_v51  ;;  %v5427_v39 = vsub.f32 0.0, %v5419_v7  ;;  %vm1841_vm11 = vcmp.eq.f32.partialorder %v5372_v4, inf }
 0x369   : > { %v1920_v41 = vmul.f32 0.996, %v3200_v28  ;;  %3213 = vlog2.f32 %v2112_v43  ;;  %vm1843_vm13 = vcmp.eq.f32.partialorder %v5372_v4, 0.0  ;;  %vm1888_vm10 = vcmp.gt.f32.partialorder %v5346_v48, 0.996 }
 0x36a   : > { %v2673_v23 = vpack.c.bf16 %v2390_v63, %v2389_v36  ;;  %vm5432_vm12 = vcmp.lt.f32.partialorder %v2037_v53, 0.0004427343  ;;  %3215 = vrcp.f32 %v5395_v20  ;;  %v2272_v32 = vadd.f32 1.0, %v5427_v39 }
 0x36b   : > { %v1844_v17 = vand.u32 2147483648, %v5372_v4  ;;  %v2195_v50 = vadd.f32 1.0, %v2194_v56  ;;  %v2197_v61 = vand.u32 2147483647, %v5406_v55  ;;  %v1842_v15 = vsel %vm1841_vm11, %v5372_v4, %v1840_v38 }
 0x36c   : > { %v3206_v54 = vpop.eup %3205  ;;  %2689 = vst [vmem:[%s5225_s12 + $0x28] sm:$0xff] %v2673_v23   ;;  %v1805_v42 = vmul.f32 %v3204_v10, %v5389_v45  ;;  %v2320_v22 = vmul.f32 0.5, %v2304_v1  ;;  %vm1887_vm15 = vcmp.gt.f32.partialorder %v5381_v24, 0.996  ;;  %v2036_v14 = vmul.f32 %v2035_v30, %v5395_v20 }
 0x36d   : > { %v3208_v3 = vpop.eup %3207  ;;  %3217 = vlog2.f32 %v2272_v32  ;;  %vm1806_vm14 = vcmp.eq.f32.partialorder %v5389_v45, inf  ;;  %v2033_v35 = vmul.f32 0.6931472, %v3206_v54  ;;  %v1845_v57 = vsel %vm1843_vm13, %v1844_v17, %v1842_v15 }
 0x36e   : > { %v3210_v27 = vpop.eup %3209  ;;  %v1807_v8 = vsel %vm1806_vm14, %v5389_v45, %v1805_v42  ;;  %v1809_v49 = vand.u32 2147483648, %v5389_v45  ;;  %3219 = vrcp.f32 %v5408_v47  ;;  %v2115_v12 = vmul.f32 -0.5, %v5419_v7 }
 0x36f   : > { %v3212_v0 = vpop.eup %3211  ;;  %v5454_v20 = vmax.f32 %v1845_v57, 1e-15  ;;  %vm1808_vm0 = vcmp.eq.f32.partialorder %v5389_v45, 0.0  ;;  %v2196_v37 = vmul.f32 %v2195_v50, %v5406_v55  ;;  %v2275_v4 = vmul.f32 -0.5, %v5427_v39 }
 0x370   : > { %v2193_v13 = vmul.f32 0.6931472, %v3212_v0  ;;  %v1810_v6 = vsel %vm1808_vm0, %v1809_v49, %v1807_v8  ;;  %v2352_v9 = vmul.f32 %v3208_v3, %v2320_v22  ;;  %vm2198_vm1 = vcmp.lt.f32.partialorder %v2197_v61, 0.0004427343 }
 0x371   : > { %v5460_v60 = vmin.f32 %v5454_v20, 0.996  ;;  %3221 = vrsqrt.f32 %v5450_v5  ;;  %v1919_v52 = vmul.f32 0.996, %v3210_v27  ;;  %v2039_v21 = vsel %vm5432_vm12, %v2036_v14, %v2033_v35  ;;  %v5502_v27 = vpop.xlane.xlu1 %1753 }
 0x372   : > { %v2199_v31 = vsel %vm2198_vm1, %v2196_v37, %v2193_v13  ;;  %v5465_v58 = vmax.f32 %v1810_v6, 1e-15  ;;  %v2116_v28 = vadd.f32 1.0, %v2115_v12  ;;  %v2118_v55 = vand.u32 2147483647, %v5419_v7 }
 0x373   : > { %v2303_v45 = vsub.f32 %v2039_v21, %v2199_v31  ;;  %v2103_v62 = vadd.f32 1.0, %v5460_v60  ;;  %v3214_v46 = vpop.eup %3213  ;;  %v1936_v11 = vsel %vm1888_vm10, %v1920_v41, 1.0  ;;  %v2276_v34 = vadd.f32 1.0, %v2275_v4  ;;  %v5512_v4 = vpop.xlane.xlu0 %1751 }
 0x374   : > { %v2278_v63 = vand.u32 2147483647, %v5427_v39  ;;  %v5473_v44 = vsub.f32 0.0, %v5460_v60  ;;  %v3216_v51 = vpop.eup %3215  ;;  %v2368_v53 = vmul.f32 %v2352_v9, %v1936_v11  ;;  %v5476_v36 = vmin.f32 %v5465_v58, 0.996 }
 0x375   : > { %v2319_v56 = vmul.f32 0.5, %v2303_v45  ;;  %3223 = vlog2.f32 %v2103_v62  ;;  %v1935_v26 = vsel %vm1887_vm15, %v1919_v52, 1.0  ;;  %v2114_v43 = vmul.f32 0.6931472, %v3214_v46 }
 0x376   : > { %3225 = vrcp.f32 %v5419_v7  ;;  %v2263_v48 = vadd.f32 1.0, %v5473_v44  ;;  %v2117_v1 = vmul.f32 %v2116_v28, %v5419_v7  ;;  %vm5483_vm5 = vcmp.lt.f32.partialorder %v2118_v55, 0.0004427343 }
 0x377   : > { %v3218_v38 = vpop.eup %3217  ;;  %v2351_v10 = vmul.f32 %v3216_v51, %v2319_v56  ;;  %3227 = vrcp.f32 %v5454_v20  ;;  %v2277_v41 = vmul.f32 %v2276_v34, %v5427_v39  ;;  %vm2279_vm3 = vcmp.lt.f32.partialorder %v2278_v63, 0.0004427343 }
 0x378   : > { %v2274_v23 = vmul.f32 0.6931472, %v3218_v38  ;;  %3229 = vlog2.f32 %v2263_v48  ;;  %v3220_v24 = vpop.eup %3219  ;;  %v2384_v59 = vmul.f32 %v2368_v53, %v4984_v29  ;;  %v2106_v17 = vmul.f32 -0.5, %v5460_v60 }
 0x379   : > { %v2367_v32 = vmul.f32 %v2351_v10, %v1935_v26  ;;  %v2058_v54 = vadd.f32 1.0, %v5476_v36  ;;  %v2120_v7 = vsel %vm5483_vm5, %v2117_v1, %v2114_v43  ;;  %v2266_v61 = vmul.f32 -0.5, %v5473_v44 }
 0x37a   : > { %v2280_v50 = vsel %vm2279_vm3, %v2277_v41, %v2274_v23  ;;  %v5496_v15 = vsub.f32 0.0, %v5476_v36  ;;  %vm1896_vm6 = vcmp.gt.f32.partialorder %v5408_v47, 0.996  ;;  %v1928_v3 = vmul.f32 0.996, %v3220_v24 }
 0x37b   : > { %v3222_v39 = vpop.eup %3221  ;;  %v2383_v42 = vmul.f32 %v2367_v32, %v5004_v33  ;;  %v2312_v29 = vsub.f32 %v2120_v7, %v2280_v50  ;;  %v2109_v22 = vand.u32 2147483647, %v5460_v60  ;;  %3231 = vlog2.f32 %v2058_v54 }
 0x37c   : > { %v2218_v14 = vadd.f32 1.0, %v5496_v15  ;;  %v2107_v57 = vadd.f32 1.0, %v2106_v17  ;;  %3233 = vrcp.f32 %v5460_v60  ;;  %vm1799_vm2 = vcmp.eq.f32.partialorder %v5450_v5, inf }
 0x37d   : > { %v2658_v35 = vpack.c.bf16 %v2384_v59, %v2383_v42  ;;  %v2267_v8 = vadd.f32 1.0, %v2266_v61  ;;  %v2269_v33 = vand.u32 2147483647, %v5473_v44  ;;  %v1798_v49 = vmul.f32 %v3222_v39, %v5450_v5 }
 0x37e   : > { %3235 = vlog2.f32 %v2218_v14  ;;  %v2328_v12 = vmul.f32 0.5, %v2312_v29  ;;  %v2061_v13 = vmul.f32 -0.5, %v5476_v36  ;;  %v1802_v37 = vand.u32 2147483648, %v5450_v5 }
 0x37f   : > { %v3224_v0 = vpop.eup %3223  ;;  %2686 = vst [vmem:[%s5225_s12 + $0x10] sm:$0xff] %v2658_v35   ;;  %3237 = vrsqrt.f32 %v5502_v27  ;;  %v1944_v9 = vsel %vm1896_vm6, %v1928_v3, 1.0  ;;  %vm5516_vm4 = vcmp.lt.f32.partialorder %v2109_v22, 0.0004427343  ;;  %v1800_v21 = vsel %vm1799_vm2, %v5450_v5, %v1798_v49 }
 0x380   : > { %v3226_v6 = vpop.eup %3225  ;;  %vm1801_vm8 = vcmp.eq.f32.partialorder %v5450_v5, 0.0  ;;  %v2105_v45 = vmul.f32 0.6931472, %v3224_v0  ;;  %v2108_v28 = vmul.f32 %v2107_v57, %v5460_v60  ;;  %v2221_v55 = vmul.f32 -0.5, %v5496_v15 }
 0x381   : > { %v3228_v31 = vpop.eup %3227  ;;  %v1803_v62 = vsel %vm1801_vm8, %v1802_v37, %v1800_v21  ;;  %vm5524_vm7 = vcmp.lt.f32.partialorder %v2269_v33, 0.0004427343  ;;  %v2064_v47 = vand.u32 2147483647, %v5476_v36  ;;  %3239 = vrsqrt.f32 %v5512_v4 }
 0x382   : > { %v3230_v46 = vpop.eup %3229  ;;  %v5529_v34 = vmax.f32 %v1803_v62, 1e-15  ;;  %v2360_v63 = vmul.f32 %v3226_v6, %v2328_v12  ;;  %v2268_v51 = vmul.f32 %v2267_v8, %v5473_v44  ;;  %v2062_v53 = vadd.f32 1.0, %v2061_v13 }
 0x383   : > { %v2265_v5 = vmul.f32 0.6931472, %v3230_v46  ;;  %v1927_v60 = vmul.f32 0.996, %v3228_v31  ;;  %v2224_v56 = vand.u32 2147483647, %v5496_v15  ;;  %v2111_v43 = vsel %vm5516_vm4, %v2108_v28, %v2105_v45 }
 0x384   : > { %v5535_v26 = vmin.f32 %v5529_v34, 0.996  ;;  %3241 = vrcp.f32 %v5465_v58  ;;  %v2222_v38 = vadd.f32 1.0, %v2221_v55  ;;  %vm1895_vm9 = vcmp.gt.f32.partialorder %v5454_v20, 0.996 }
 0x385   : > { %v2271_v48 = vsel %vm5524_vm7, %v2268_v51, %v2265_v5  ;;  %v3232_v10 = vpop.eup %3231  ;;  %3243 = vrcp.f32 %v5476_v36  ;;  %v2376_v23 = vmul.f32 %v2360_v63, %v1944_v9  ;;  %v2063_v41 = vmul.f32 %v2062_v53, %v5476_v36 }
 0x386   : > { %v2311_v44 = vsub.f32 %v2111_v43, %v2271_v48  ;;  %v2049_v1 = vadd.f32 1.0, %v5535_v26  ;;  %v3234_v30 = vpop.eup %3233  ;;  %vm5546_vm11 = vcmp.lt.f32.partialorder %v2064_v47, 0.0004427343  ;;  %v2145_v59 = vsub.f32 0.0, %v5535_v26 }
 0x387   : > { %v1943_v17 = vsel %vm1895_vm9, %v1927_v60, 1.0  ;;  %vm5551_vm13 = vcmp.lt.f32.partialorder %v2224_v56, 0.0004427343  ;;  %v2060_v50 = vmul.f32 0.6931472, %v3232_v10  ;;  %v2223_v39 = vmul.f32 %v2222_v38, %v5496_v15 }
 0x388   : > { %v3236_v32 = vpop.eup %3235  ;;  %v2327_v54 = vmul.f32 0.5, %v2311_v44  ;;  %3245 = vlog2.f32 %v2049_v1  ;;  %v2209_v36 = vadd.f32 1.0, %v2145_v59  ;;  %vm1862_vm10 = vcmp.eq.f32.partialorder %v5502_v27, inf }
 0x389   : > { %v3238_v7 = vpop.eup %3237  ;;  %v2220_v61 = vmul.f32 0.6931472, %v3236_v32  ;;  %vm1864_vm12 = vcmp.eq.f32.partialorder %v5502_v27, 0.0  ;;  %v2392_v3 = vmul.f32 %v2376_v23, %v5012_v40  ;;  %v1865_v14 = vand.u32 2147483648, %v5502_v27 }
 0x38a   : > { %v2359_v42 = vmul.f32 %v3234_v30, %v2327_v54  ;;  %v1861_v29 = vmul.f32 %v3238_v7, %v5502_v27  ;;  %3247 = vlog2.f32 %v2209_v36  ;;  %vm1855_vm15 = vcmp.eq.f32.partialorder %v5512_v4, inf }
 0x38b   : > { %v2226_v22 = vsel %vm5551_vm13, %v2223_v39, %v2220_v61  ;;  %v3240_v35 = vpop.eup %3239  ;;  %3249 = vrcp.f32 %v5529_v34  ;;  %v2066_v8 = vsel %vm5546_vm11, %v2063_v41, %v2060_v50  ;;  %v2052_v33 = vmul.f32 -0.5, %v5535_v26 }
 0x38c   : > { %v2375_v57 = vmul.f32 %v2359_v42, %v1943_v17  ;;  %v1863_v15 = vsel %vm1862_vm10, %v5502_v27, %v1861_v29  ;;  %v1854_v49 = vmul.f32 %v3240_v35, %v5512_v4  ;;  %v2306_v12 = vsub.f32 %v2066_v8, %v2226_v22 }
 0x38d   : > { %v1866_v40 = vsel %vm1864_vm12, %v1865_v14, %v1863_v15  ;;  %v2212_v13 = vmul.f32 -0.5, %v2145_v59  ;;  %v1858_v9 = vand.u32 2147483648, %v5512_v4  ;;  %vm1857_vm14 = vcmp.eq.f32.partialorder %v5512_v4, 0.0 }
 0x38e   : > { %v2391_v0 = vmul.f32 %v2375_v57, %v5026_v19  ;;  %v5571_v37 = vmax.f32 %v1866_v40, 1e-15  ;;  %v3242_v6 = vpop.eup %3241  ;;  %v1856_v27 = vsel %vm1855_vm15, %v5512_v4, %v1854_v49  ;;  %v2053_v31 = vadd.f32 1.0, %v2052_v33 }
 0x38f   : > { %v3244_v52 = vpop.eup %3243  ;;  %v1859_v28 = vsel %vm1857_vm14, %v1858_v9, %v1856_v27  ;;  %v2322_v19 = vmul.f32 0.5, %v2306_v12  ;;  %v2055_v62 = vand.u32 2147483647, %v5535_v26  ;;  %v2213_v46 = vadd.f32 1.0, %v2212_v13 }
 0x390   : > { %v2678_v21 = vpack.c.bf16 %v2392_v3, %v2391_v0  ;;  %v5577_v45 = vmin.f32 %v5571_v37, 0.996  ;;  %3251 = vrcp.f32 %v5535_v26  ;;  %v2215_v11 = vand.u32 2147483647, %v2145_v59 }
 0x391   : > { %v5583_v63 = vmax.f32 %v1859_v28, 1e-15  ;;  %v1922_v53 = vmul.f32 0.996, %v3242_v6  ;;  %v2054_v60 = vmul.f32 %v2053_v31, %v5535_v26  ;;  %v2354_v43 = vmul.f32 %v3244_v52, %v2322_v19 }
 0x392   : > { %v3246_v55 = vpop.eup %3245  ;;  %2690 = vst [vmem:[%s5225_s12 + $0x30] sm:$0xff] %v2678_v21   ;;  %v2130_v47 = vadd.f32 1.0, %v5577_v45  ;;  %v2154_v4 = vsub.f32 0.0, %v5577_v45  ;;  %v2214_v38 = vmul.f32 %v2213_v46, %v2145_v59  ;;  %vm2056_vm0 = vcmp.lt.f32.partialorder %v2055_v62, 0.0004427343 }
 0x393   : > { %v2051_v5 = vmul.f32 0.6931472, %v3246_v55  ;;  %vm2216_vm1 = vcmp.lt.f32.partialorder %v2215_v11, 0.0004427343  ;;  %v5588_v44 = vmin.f32 %v5583_v63, 0.996 }
 0x394   : > { %v3248_v51 = vpop.eup %3247  ;;  %3253 = vlog2.f32 %v2130_v47  ;;  %v2290_v10 = vadd.f32 1.0, %v2154_v4  ;;  %vm1890_vm5 = vcmp.gt.f32.partialorder %v5465_v58, 0.996  ;;  %v2133_v54 = vmul.f32 -0.5, %v5577_v45 }
 0x395   : > { %v3250_v56 = vpop.eup %3249  ;;  %v2211_v48 = vmul.f32 0.6931472, %v3248_v51  ;;  %v2057_v1 = vsel %vm2056_vm0, %v2054_v60, %v2051_v5  ;;  %v1938_v23 = vsel %vm1890_vm5, %v1922_v53, 1.0  ;;  %v2121_v26 = vadd.f32 1.0, %v5588_v44 }
 0x396   : > { %3255 = vlog2.f32 %v2290_v10  ;;  %v2370_v24 = vmul.f32 %v2354_v43, %v1938_v23  ;;  %v1921_v32 = vmul.f32 0.996, %v3250_v56  ;;  %v2153_v17 = vsub.f32 0.0, %v5588_v44 }
 0x397   : > { %v2217_v30 = vsel %vm2216_vm1, %v2214_v38, %v2211_v48  ;;  %v2293_v20 = vmul.f32 -0.5, %v2154_v4  ;;  %3257 = vlog2.f32 %v2121_v26  ;;  %vm1889_vm3 = vcmp.gt.f32.partialorder %v5529_v34, 0.996 }
 0x398   : > { %v2305_v41 = vsub.f32 %v2057_v1, %v2217_v30  ;;  %3259 = vrcp.f32 %v5571_v37  ;;  %v2281_v58 = vadd.f32 1.0, %v2153_v17  ;;  %v2386_v61 = vmul.f32 %v2370_v24, %v5034_v16 }
 0x399   : > { %v1937_v39 = vsel %vm1889_vm3, %v1921_v32, 1.0  ;;  %v2134_v29 = vadd.f32 1.0, %v2133_v54  ;;  %v2294_v3 = vadd.f32 1.0, %v2293_v20  ;;  %v2136_v22 = vand.u32 2147483647, %v5577_v45 }
 0x39a   : > { %v2321_v59 = vmul.f32 0.5, %v2305_v41  ;;  %v3252_v7 = vpop.eup %3251  ;;  %3261 = vlog2.f32 %v2281_v58  ;;  %v2296_v14 = vand.u32 2147483647, %v2154_v4  ;;  %v2124_v57 = vmul.f32 -0.5, %v5588_v44 }
 0x39b   : > { %3263 = vrcp.f32 %v5577_v45  ;;  %v2284_v16 = vmul.f32 -0.5, %v2153_v17  ;;  %v2135_v33 = vmul.f32 %v2134_v29, %v5577_v45  ;;  %v2295_v49 = vmul.f32 %v2294_v3, %v2154_v4 }
 0x39c   : > { %v2353_v50 = vmul.f32 %v3252_v7, %v2321_v59  ;;  %3265 = vrcp.f32 %v5583_v63  ;;  %vm2137_vm6 = vcmp.lt.f32.partialorder %v2136_v22, 0.0004427343  ;;  %vm2297_vm2 = vcmp.lt.f32.partialorder %v2296_v14, 0.0004427343 }
 0x39d   : > { %3267 = vrcp.f32 %v5588_v44  ;;  %v2125_v6 = vadd.f32 1.0, %v2124_v57  ;;  %v2127_v52 = vand.u32 2147483647, %v5588_v44  ;;  %v2287_v21 = vand.u32 2147483647, %v2153_v17 }
 0x39e   : > { %v3254_v36 = vpop.eup %3253  ;;  %v2369_v42 = vmul.f32 %v2353_v50, %v1937_v39  ;;  %vm1898_vm7 = vcmp.gt.f32.partialorder %v5571_v37, 0.996  ;;  %vm1897_vm9 = vcmp.gt.f32.partialorder %v5583_v63, 0.996 }
 0x39f   : > { %v2132_v34 = vmul.f32 0.6931472, %v3254_v36  ;;  %v2126_v62 = vmul.f32 %v2125_v6, %v5588_v44  ;;  %vm2128_vm4 = vcmp.lt.f32.partialorder %v2127_v52, 0.0004427343  ;;  %vm2288_vm8 = vcmp.lt.f32.partialorder %v2287_v21, 0.0004427343 }
 0x3a0   : > { %v2385_v35 = vmul.f32 %v2369_v42, %v5045_v25  ;;  %v3256_v15 = vpop.eup %3255  ;;  %v2285_v25 = vadd.f32 1.0, %v2284_v16 }
 0x3a1   : > { %v2292_v40 = vmul.f32 0.6931472, %v3256_v15  ;;  %v3258_v0 = vpop.eup %3257  ;;  %v2138_v12 = vsel %vm2137_vm6, %v2135_v33, %v2132_v34 }
 0x3a2   : > { %v2663_v8 = vpack.c.bf16 %v2386_v61, %v2385_v35  ;;  %v3260_v27 = vpop.eup %3259  ;;  %v2123_v31 = vmul.f32 0.6931472, %v3258_v0  ;;  %v2286_v11 = vmul.f32 %v2285_v25, %v2153_v17 }
 0x3a3   : > { %v2298_v13 = vsel %vm2297_vm2, %v2295_v49, %v2292_v40  ;;  %v1930_v19 = vmul.f32 0.996, %v3260_v27 }
 0x3a4   : > { %2687 = vst [vmem:[%s5225_s12 + $0x18] sm:$0xff] %v2663_v8   ;;  %v2314_v9 = vsub.f32 %v2138_v12, %v2298_v13  ;;  %v3262_v28 = vpop.eup %3261  ;;  %v2129_v4 = vsel %vm2128_vm4, %v2126_v62, %v2123_v31 }
 0x3a5   : > { %v3264_v55 = vpop.eup %3263  ;;  %v2283_v46 = vmul.f32 0.6931472, %v3262_v28  ;;  %v1946_v60 = vsel %vm1898_vm7, %v1930_v19, 1.0 }
 0x3a6   : > { %v2330_v45 = vmul.f32 0.5, %v2314_v9  ;;  %v3266_v47 = vpop.eup %3265 }
 0x3a7   : > { %v2289_v51 = vsel %vm2288_vm8, %v2286_v11, %v2283_v46  ;;  %v1929_v56 = vmul.f32 0.996, %v3266_v47  ;;  %v3268_v43 = vpop.eup %3267 }
 0x3a8   : > { %v2362_v5 = vmul.f32 %v3264_v55, %v2330_v45  ;;  %v2313_v53 = vsub.f32 %v2129_v4, %v2289_v51 }
 0x3a9   : > { %v1945_v44 = vsel %vm1897_vm9, %v1929_v56, 1.0 }
 0x3aa   : > { %v2378_v48 = vmul.f32 %v2362_v5, %v1946_v60  ;;  %v2329_v38 = vmul.f32 0.5, %v2313_v53 }
 0x3ac   : > { %v2361_v10 = vmul.f32 %v3268_v43, %v2329_v38  ;;  %v2394_v1 = vmul.f32 %v2378_v48, %v5051_v2 }
 0x3ae   : > { %v2377_v30 = vmul.f32 %v2361_v10, %v1945_v44 }
 0x3b0   : > { %v2393_v37 = vmul.f32 %v2377_v30, %v5056_v18 }
 0x3b2   : > { %v2683_v63 = vpack.c.bf16 %v2394_v1, %v2393_v37 }
 0x3b4   : > { %2691 = vst [vmem:[%s5225_s12 + $0x38] sm:$0xff] %v2683_v63  }
 0x3b5   : > { %3283 = shalt.err (!%p3280_p3)
}
 0x3b6   : > { %s3284_s30 = scalar_lea.hbm %s5616_s21, 1024  ;;  %s3288_s7 = scalar_lea.hbm %s5668_s4, 2048 }
 0x3b7   : > { %p3285_p4 = scmp.ne.s32.totalorder %s5616_s21, %s3284_s30  ;;  %p3289_p9 = scmp.lt.u32.totalorder %s5616_s21, %s5668_s4 }
 0x3b8   : > { %p3290_p10 = scmp.lt.u32.totalorder %s3288_s7, %s3284_s30  ;;  %p3292_p12 = scmp.lt.u32.totalorder %s3284_s30, %s5616_s21 }
 0x3b9   : > { %p3286_p7 = pnand %p3285_p4, %p3403_p5 }
 0x3ba   : > { %p3291_p11 = por %p3290_p10, %p3289_p9 }
 0x3bb   : > { %p3287_p8 = pneg %p3286_p7 }
 0x3bc   : > { %p3293_p13 = por %p3292_p12, %p3291_p11 }
 0x3be   : > { %p3294_p0 = pnand %p3293_p13, %p3287_p8 }
 0x3c0   : > { %3297 = shalt.err (!%p3294_p0)
}
 0x3c1   : > { %s3335_s10 = smov 64   ;;  %s3336_s11 = smov 4  }
 0x3c2   : > { %2780 = dma.vmem_to_hbm [thread:$0]  (%p3403_p5), %s5618_s14, 1024, %s5616_s21, %s5623_s23, %s3335_s10, %s3335_s10, %s3336_s11  }
 0x3c3 PF: > { %p2786_p1 = scmp.ge.s32.totalorder %s3332_s20, 2  ;;  %s2504_s12 = sand.u32 1, %s3320_s17  }
 0x3c4   : > { %s2505_s13 = scalar_lea.sflag [#allocation4], %s2504_s12 }
 0x3c5   : > { %p2783_p2 = pnand %p2786_p1, %p3407_p6 }
 0x3c7   : > { %3315 = dma.done.wait (!%p2783_p2), %s2505_s13, 1024  }
 0x3c8   : > { %3317 = vsyncadd (!%p2783_p2), %s2505_s13, 4294966272  ;;  %p15_p3 = scmp.ge.s32.totalorder %s3390_s22, 4   ;;  %s5846_s17 = smov %s3324_s18 }
 0x3c9   : > { %s5847_s18 = smov %s3328_s19  ;;  %s5848_s19 = smov %s3401_s25 }
 0x3ca   : > { %s5849_s20 = smov %s3390_s22  ;;  %17 = sbr.rel (!%p15_p3) target bundleno = 5 (0x5), region = 71 }
 0x3d1   :  { %2510 = vsyncpa [#allocation4], 1 }
 0x3d2   :  { %2512 = vsyncpa [#allocation4 + $0x1], 1 }

</bundles_post_ra>
